<compile_context>
chip_gen: v7x
topology: tpu7x:2x2x1
jax: 0.10.0
libtpu: 0.0.40
codegen_flags: <defaults>
</compile_context>

<pallas_src>
import jax
import jax.numpy as jnp
from jax.experimental import pallas as pl
from jax.experimental.pallas import tpu as pltpu


# ----------------------------------------------------------------------------
# In-kernel helpers (trace-time Python; everything lowers to VMEM/MXU ops).
# ----------------------------------------------------------------------------

def _circular_pad_rows(dst_ref, src):
    """Store `src` (H, L) into `dst_ref` (H + 2p, L) with circular row padding."""
    hs = src.shape[0]
    p = (dst_ref.shape[0] - hs) // 2
    dst_ref[p:p + hs, :] = src
    if p > 0:
        dst_ref[0:p, :] = dst_ref[hs:hs + p, :]                 # top wrap  = last p rows
        dst_ref[p + hs:p + hs + p, :] = dst_ref[p:2 * p, :]      # bottom wrap = first p rows


def _banded_conv(src_ref, wb_ref, bias_ref, relu):
    """Conv2d as K row-shifted matmuls against banded weight matrices.

    src_ref:  (H_out + K - 1, W_in*Cin)   rows already (circularly) H-padded
    wb_ref:   (K, W_in*Cin, W_out*Cout)   banded weights (kw taps + W wrap folded in)
    bias_ref: (1, W_out*Cout)
    returns:  (H_out, W_out*Cout) value in the same row-flat channels-last layout.
    """
    k = wb_ref.shape[0]
    h_out = src_ref.shape[0] - k + 1
    acc = jnp.dot(src_ref[0:h_out, :], wb_ref[0], preferred_element_type=jnp.float32)
    for kh in range(1, k):
        acc = acc + jnp.dot(src_ref[kh:kh + h_out, :], wb_ref[kh],
                            preferred_element_type=jnp.float32)
    acc = acc + bias_ref[...]
    if relu:
        acc = jnp.maximum(acc, 0.0)
    return acc


# ----------------------------------------------------------------------------
# Fused kernel: one grid step per batch element.
# ----------------------------------------------------------------------------

def _reverse_fused_kernel(
    delta_ref,                        # SMEM (B,) int32 (scalar prefetch)
    stop_ref,                         # (1, H, W)
    wbe_ref, bbe_ref,                 # encoder  7x7 circular pad 3
    wb1_ref, bb1_ref,                 # conv1    5x5 circular pad 4
    wb2_ref, bb2_ref,                 # conv2    3x3 valid
    wb3_ref, bb3_ref,                 # conv3    3x3 valid
    wbd_ref, bbd_ref,                 # decoder  3x3 circular pad 1
    out_ref,                          # (1, H, W)
    x_ref,                            # (H,   W*IC)  current activation
    xpe_ref,                          # (H+6, W)     H-padded encoder input
    xp1_ref,                          # (H+8, W*IC)  H-padded conv1 input
    h1_ref,                           # (H+4, W1*CH) conv1 output
    h2_ref,                           # (H+2, W2*CH) conv2 output
    xpd_ref,                          # (H+2, W*IC)  H-padded decoder input
):
    bi = pl.program_id(0)

    # encoder: x = relu(enc(stop - 0.5))
    _circular_pad_rows(xpe_ref, stop_ref[0] - 0.5)
    x_ref[...] = _banded_conv(xpe_ref, wbe_ref, bbe_ref, relu=True)

    # Exactly delta[b] reverse iterations for this sample (== PyTorch masked
    # blend over range(delta.max()), since sample b is only overwritten while
    # i < delta[b] and the convs act per sample).
    def body(_, carry):
        _circular_pad_rows(xp1_ref, x_ref[...])
        h1_ref[...] = _banded_conv(xp1_ref, wb1_ref, bb1_ref, relu=True)
        h2_ref[...] = _banded_conv(h1_ref, wb2_ref, bb2_ref, relu=True)
        x_ref[...] = _banded_conv(h2_ref, wb3_ref, bb3_ref, relu=True)
        return carry

    jax.lax.fori_loop(0, delta_ref[bi], body, 0)

    # decoder (no relu)
    _circular_pad_rows(xpd_ref, x_ref[...])
    out_ref[0] = _banded_conv(xpd_ref, wbd_ref, bbd_ref, relu=False)


# ----------------------------------------------------------------------------
# One-time weight preprocessing (outside the kernel): banded weight matrices
# and per-row bias vectors for the row-flat channels-last layout.
# ----------------------------------------------------------------------------

def _banded_weights(w, w_in, pad, circular):
    """w: (K, K, Cin, Cout) -> (K, w_in*Cin, w_out*Cout) banded matrices with
    band[kh, wi*Cin+ci, wo*Cout+co] = w[kh, kw, ci, co] where wi is the input
    column feeding output column wo through tap kw (circular wrap folded in)."""
    K, _, cin, cout = w.shape
    w_out = w_in + 2 * pad - K + 1
    bands = []
    for kh in range(K):
        band = jnp.zeros((w_in * cin, w_out * cout), jnp.float32)
        for kw in range(K):
            src = jnp.arange(w_out) + kw - pad
            if circular:
                src = src % w_in
            sel = (jnp.arange(w_in)[:, None] == src[None, :]).astype(jnp.float32)
            band = band + jnp.kron(sel, w[kh, kw].astype(jnp.float32))
        bands.append(band)
    return jnp.stack(bands, axis=0)


def _bias_row(bias, w_out):
    return jnp.tile(bias.astype(jnp.float32), w_out)[None, :]


def init_params(key, info_ch=8, ch=16):
    def conv_init(k, K, cin, cout):
        k1, k2 = jax.random.split(k)
        bound = 1.0 / jnp.sqrt(jnp.float32(cin * K * K))
        w = jax.random.uniform(k1, (K, K, cin, cout), jnp.float32, -bound, bound)
        b = jax.random.uniform(k2, (cout,), jnp.float32, -bound, bound)
        return w, b

    keys = jax.random.split(key, 5)
    return {
        "encoder": conv_init(keys[0], 7, 1, info_ch),   # Conv2d(1, IC, 7, pad=3, circular)
        "conv1": conv_init(keys[1], 5, info_ch, ch),    # Conv2d(IC, CH, 5, pad=4, circular)
        "conv2": conv_init(keys[2], 3, ch, ch),         # Conv2d(CH, CH, 3)
        "conv3": conv_init(keys[3], 3, ch, info_ch),    # Conv2d(CH, IC, 3)
        "decoder": conv_init(keys[4], 3, info_ch, 1),   # Conv2d(IC, 1, 3, pad=1, circular)
    }


def prepare_params(params, H, W):
    del H  # banding depends only on widths
    we, be = params["encoder"]
    w1, b1 = params["conv1"]
    w2, b2 = params["conv2"]
    w3, b3 = params["conv3"]
    wd, bd = params["decoder"]
    w1o = W + 2 * 4 - 5 + 1   # conv1 output width
    w2o = w1o - 3 + 1         # conv2 output width
    w3o = w2o - 3 + 1         # conv3 output width (== W)
    assert w3o == W
    return {
        "wbe": _banded_weights(we, W, 3, True),    "bbe": _bias_row(be, W),
        "wb1": _banded_weights(w1, W, 4, True),    "bb1": _bias_row(b1, w1o),
        "wb2": _banded_weights(w2, w1o, 0, False), "bb2": _bias_row(b2, w2o),
        "wb3": _banded_weights(w3, w2o, 0, False), "bb3": _bias_row(b3, w3o),
        "wbd": _banded_weights(wd, W, 1, True),    "bbd": _bias_row(bd, W),
    }


_WEIGHT_NAMES = ["wbe", "bbe", "wb1", "bb1", "wb2", "bb2", "wb3", "bb3", "wbd", "bbd"]


@jax.jit
def reverse_model_forward(prep, stop_nchw, delta):
    B, _, H, W = stop_nchw.shape
    stop2 = stop_nchw[:, 0, :, :]                      # (B, H, W) == row-flat layout for Cin=1

    ic = prep["bbe"].shape[1] // W                     # info_ch
    w1o, w2o = W + 4, W + 2
    ch = prep["bb1"].shape[1] // w1o

    def _const_spec(arr):
        nd = arr.ndim
        return pl.BlockSpec(arr.shape, lambda b, d, _n=nd: (0,) * _n)

    in_specs = [pl.BlockSpec((1, H, W), lambda b, d: (b, 0, 0))]
    in_specs += [_const_spec(prep[n]) for n in _WEIGHT_NAMES]

    grid_spec = pltpu.PrefetchScalarGridSpec(
        num_scalar_prefetch=1,
        grid=(B,),
        in_specs=in_specs,
        out_specs=pl.BlockSpec((1, H, W), lambda b, d: (b, 0, 0)),
        scratch_shapes=[
            pltpu.VMEM((H, W * ic), jnp.float32),        # x
            pltpu.VMEM((H + 6, W), jnp.float32),         # encoder H-pad
            pltpu.VMEM((H + 8, W * ic), jnp.float32),    # conv1 H-pad
            pltpu.VMEM((H + 4, w1o * ch), jnp.float32),  # conv1 out
            pltpu.VMEM((H + 2, w2o * ch), jnp.float32),  # conv2 out
            pltpu.VMEM((H + 2, W * ic), jnp.float32),    # decoder H-pad
        ],
    )

    out2 = pl.pallas_call(
        _reverse_fused_kernel,
        out_shape=jax.ShapeDtypeStruct((B, H, W), jnp.float32),
        grid_spec=grid_spec,
        compiler_params=pltpu.CompilerParams(dimension_semantics=("parallel",)),
    )(delta.astype(jnp.int32), stop2, *[prep[n] for n in _WEIGHT_NAMES])

    return out2[:, None, :, :]                          # (B, 1, H, W)


# ----------------------------------------------------------------------------
if __name__ == "__main__":
    key = jax.random.PRNGKey(0)
    kp, ks = jax.random.split(key)

    info_ch, ch = 8, 16
    B, H, W = 2, 16, 16

    params = init_params(kp, info_ch=info_ch, ch=ch)
    prep = prepare_params(params, H, W)                 # one-time weight preprocessing

    stop = jax.random.uniform(ks, (B, 1, H, W), dtype=jnp.float32)
    delta = jnp.array([2, 3], dtype=jnp.int32)

    out = reverse_model_forward(prep, stop, delta)
    out = jax.block_until_ready(out)
    assert out.shape == (B, 1, H, W), out.shape
    assert out.dtype == jnp.float32
    print("KERNEL_OK")
</pallas_src>

<mosaic_0001>
module attributes {stable_mosaic.version = 11 : i64} {
  func.func @_reverse_fused_kernel(%arg0: i32, %arg1: memref<2xi32, #tpu.memory_space<smem>>, %arg2: memref<1x16x16xf32, #tpu.memory_space<vmem>>, %arg3: memref<7x16x128xf32, #tpu.memory_space<vmem>>, %arg4: memref<1x128xf32, #tpu.memory_space<vmem>>, %arg5: memref<5x128x320xf32, #tpu.memory_space<vmem>>, %arg6: memref<1x320xf32, #tpu.memory_space<vmem>>, %arg7: memref<3x320x288xf32, #tpu.memory_space<vmem>>, %arg8: memref<1x288xf32, #tpu.memory_space<vmem>>, %arg9: memref<3x288x128xf32, #tpu.memory_space<vmem>>, %arg10: memref<1x128xf32, #tpu.memory_space<vmem>>, %arg11: memref<3x128x16xf32, #tpu.memory_space<vmem>>, %arg12: memref<1x16xf32, #tpu.memory_space<vmem>>, %arg13: memref<1x16x16xf32, #tpu.memory_space<vmem>>, %arg14: memref<16x128xf32, #tpu.memory_space<vmem>>, %arg15: memref<22x16xf32, #tpu.memory_space<vmem>>, %arg16: memref<24x128xf32, #tpu.memory_space<vmem>>, %arg17: memref<20x320xf32, #tpu.memory_space<vmem>>, %arg18: memref<18x288xf32, #tpu.memory_space<vmem>>, %arg19: memref<18x128xf32, #tpu.memory_space<vmem>>) attributes {dimension_semantics = [#tpu.dimension_semantics<parallel>], iteration_bounds = array<i64: 2>, scalar_prefetch = 1 : i64, scratch_operands = 6 : i64, tpu.core_type = #tpu.core_type<tc>, window_params = [{transform_indices = @transform_0, window_bounds = array<i64: 1, 16, 16>}, {pipeline_mode = #tpu.pipeline_mode<synchronous>, transform_indices = @transform_1, window_bounds = array<i64: 7, 16, 128>}, {pipeline_mode = #tpu.pipeline_mode<synchronous>, transform_indices = @transform_2, window_bounds = array<i64: 1, 128>}, {pipeline_mode = #tpu.pipeline_mode<synchronous>, transform_indices = @transform_3, window_bounds = array<i64: 5, 128, 320>}, {pipeline_mode = #tpu.pipeline_mode<synchronous>, transform_indices = @transform_4, window_bounds = array<i64: 1, 320>}, {pipeline_mode = #tpu.pipeline_mode<synchronous>, transform_indices = @transform_5, window_bounds = array<i64: 3, 320, 288>}, {pipeline_mode = #tpu.pipeline_mode<synchronous>, transform_indices = @transform_6, window_bounds = array<i64: 1, 288>}, {pipeline_mode = #tpu.pipeline_mode<synchronous>, transform_indices = @transform_7, window_bounds = array<i64: 3, 288, 128>}, {pipeline_mode = #tpu.pipeline_mode<synchronous>, transform_indices = @transform_8, window_bounds = array<i64: 1, 128>}, {pipeline_mode = #tpu.pipeline_mode<synchronous>, transform_indices = @transform_9, window_bounds = array<i64: 3, 128, 16>}, {pipeline_mode = #tpu.pipeline_mode<synchronous>, transform_indices = @transform_10, window_bounds = array<i64: 1, 16>}, {transform_indices = @transform_11, window_bounds = array<i64: 1, 16, 16>}]} {
    %c0 = arith.constant 0 : index
    %c0_0 = arith.constant 0 : index
    %c0_1 = arith.constant 0 : index
    %0 = vector.load %arg2[%c0, %c0_0, %c0_1] : memref<1x16x16xf32, #tpu.memory_space<vmem>>, vector<1x16x16xf32>
    %1 = vector.shape_cast %0 : vector<1x16x16xf32> to vector<16x16xf32>
    %cst = arith.constant 5.000000e-01 : f32
    %2 = vector.broadcast %cst : f32 to vector<16x16xf32>
    %3 = arith.subf %1, %2 : vector<16x16xf32>
    %c3 = arith.constant 3 : index
    %c0_2 = arith.constant 0 : index
    %4 = vector.load %arg15[%c3, %c0_2] : memref<22x16xf32, #tpu.memory_space<vmem>>, vector<16x16xf32>
    tpu.vector_store %arg15[%c3, %c0_2], %3 {strides = array<i32>} : memref<22x16xf32, #tpu.memory_space<vmem>>, vector<16x16xf32>,
    %c16 = arith.constant 16 : index
    %c0_3 = arith.constant 0 : index
    %5 = vector.load %arg15[%c16, %c0_3] : memref<22x16xf32, #tpu.memory_space<vmem>>, vector<3x16xf32>
    %c0_4 = arith.constant 0 : index
    %c0_5 = arith.constant 0 : index
    %6 = vector.load %arg15[%c0_4, %c0_5] : memref<22x16xf32, #tpu.memory_space<vmem>>, vector<3x16xf32>
    tpu.vector_store %arg15[%c0_4, %c0_5], %5 {strides = array<i32>} : memref<22x16xf32, #tpu.memory_space<vmem>>, vector<3x16xf32>,
    %c3_6 = arith.constant 3 : index
    %c0_7 = arith.constant 0 : index
    %7 = vector.load %arg15[%c3_6, %c0_7] : memref<22x16xf32, #tpu.memory_space<vmem>>, vector<3x16xf32>
    %c19 = arith.constant 19 : index
    %c0_8 = arith.constant 0 : index
    %8 = vector.load %arg15[%c19, %c0_8] : memref<22x16xf32, #tpu.memory_space<vmem>>, vector<3x16xf32>
    tpu.vector_store %arg15[%c19, %c0_8], %7 {strides = array<i32>} : memref<22x16xf32, #tpu.memory_space<vmem>>, vector<3x16xf32>,
    %c0_9 = arith.constant 0 : index
    %c0_10 = arith.constant 0 : index
    %9 = vector.load %arg15[%c0_9, %c0_10] : memref<22x16xf32, #tpu.memory_space<vmem>>, vector<16x16xf32>
    %c0_11 = arith.constant 0 : index
    %c0_12 = arith.constant 0 : index
    %c0_13 = arith.constant 0 : index
    %10 = vector.load %arg3[%c0_11, %c0_12, %c0_13] : memref<7x16x128xf32, #tpu.memory_space<vmem>>, vector<1x16x128xf32>
    %11 = vector.shape_cast %10 : vector<1x16x128xf32> to vector<16x128xf32>
    %cst_14 = arith.constant dense<0.000000e+00> : vector<16x128xf32>
    %12 = tpu.matmul %9, %11, %cst_14 {dimension_numbers = #tpu.dot_dimension_numbers<[1], [0], [0], [1], [0, 0, 1, 1], [], []>} : vector<16x16xf32>, vector<16x128xf32>, vector<16x128xf32> -> vector<16x128xf32>
    %c1 = arith.constant 1 : index
    %c0_15 = arith.constant 0 : index
    %13 = vector.load %arg15[%c1, %c0_15] : memref<22x16xf32, #tpu.memory_space<vmem>>, vector<16x16xf32>
    %c1_16 = arith.constant 1 : index
    %c0_17 = arith.constant 0 : index
    %c0_18 = arith.constant 0 : index
    %14 = vector.load %arg3[%c1_16, %c0_17, %c0_18] : memref<7x16x128xf32, #tpu.memory_space<vmem>>, vector<1x16x128xf32>
    %15 = vector.shape_cast %14 : vector<1x16x128xf32> to vector<16x128xf32>
    %cst_19 = arith.constant dense<0.000000e+00> : vector<16x128xf32>
    %16 = tpu.matmul %13, %15, %cst_19 {dimension_numbers = #tpu.dot_dimension_numbers<[1], [0], [0], [1], [0, 0, 1, 1], [], []>} : vector<16x16xf32>, vector<16x128xf32>, vector<16x128xf32> -> vector<16x128xf32>
    %17 = arith.addf %12, %16 : vector<16x128xf32>
    %c2 = arith.constant 2 : index
    %c0_20 = arith.constant 0 : index
    %18 = vector.load %arg15[%c2, %c0_20] : memref<22x16xf32, #tpu.memory_space<vmem>>, vector<16x16xf32>
    %c2_21 = arith.constant 2 : index
    %c0_22 = arith.constant 0 : index
    %c0_23 = arith.constant 0 : index
    %19 = vector.load %arg3[%c2_21, %c0_22, %c0_23] : memref<7x16x128xf32, #tpu.memory_space<vmem>>, vector<1x16x128xf32>
    %20 = vector.shape_cast %19 : vector<1x16x128xf32> to vector<16x128xf32>
    %cst_24 = arith.constant dense<0.000000e+00> : vector<16x128xf32>
    %21 = tpu.matmul %18, %20, %cst_24 {dimension_numbers = #tpu.dot_dimension_numbers<[1], [0], [0], [1], [0, 0, 1, 1], [], []>} : vector<16x16xf32>, vector<16x128xf32>, vector<16x128xf32> -> vector<16x128xf32>
    %22 = arith.addf %17, %21 : vector<16x128xf32>
    %c3_25 = arith.constant 3 : index
    %c0_26 = arith.constant 0 : index
    %23 = vector.load %arg15[%c3_25, %c0_26] : memref<22x16xf32, #tpu.memory_space<vmem>>, vector<16x16xf32>
    %c3_27 = arith.constant 3 : index
    %c0_28 = arith.constant 0 : index
    %c0_29 = arith.constant 0 : index
    %24 = vector.load %arg3[%c3_27, %c0_28, %c0_29] : memref<7x16x128xf32, #tpu.memory_space<vmem>>, vector<1x16x128xf32>
    %25 = vector.shape_cast %24 : vector<1x16x128xf32> to vector<16x128xf32>
    %cst_30 = arith.constant dense<0.000000e+00> : vector<16x128xf32>
    %26 = tpu.matmul %23, %25, %cst_30 {dimension_numbers = #tpu.dot_dimension_numbers<[1], [0], [0], [1], [0, 0, 1, 1], [], []>} : vector<16x16xf32>, vector<16x128xf32>, vector<16x128xf32> -> vector<16x128xf32>
    %27 = arith.addf %22, %26 : vector<16x128xf32>
    %c4 = arith.constant 4 : index
    %c0_31 = arith.constant 0 : index
    %28 = vector.load %arg15[%c4, %c0_31] : memref<22x16xf32, #tpu.memory_space<vmem>>, vector<16x16xf32>
    %c4_32 = arith.constant 4 : index
    %c0_33 = arith.constant 0 : index
    %c0_34 = arith.constant 0 : index
    %29 = vector.load %arg3[%c4_32, %c0_33, %c0_34] : memref<7x16x128xf32, #tpu.memory_space<vmem>>, vector<1x16x128xf32>
    %30 = vector.shape_cast %29 : vector<1x16x128xf32> to vector<16x128xf32>
    %cst_35 = arith.constant dense<0.000000e+00> : vector<16x128xf32>
    %31 = tpu.matmul %28, %30, %cst_35 {dimension_numbers = #tpu.dot_dimension_numbers<[1], [0], [0], [1], [0, 0, 1, 1], [], []>} : vector<16x16xf32>, vector<16x128xf32>, vector<16x128xf32> -> vector<16x128xf32>
    %32 = arith.addf %27, %31 : vector<16x128xf32>
    %c5 = arith.constant 5 : index
    %c0_36 = arith.constant 0 : index
    %33 = vector.load %arg15[%c5, %c0_36] : memref<22x16xf32, #tpu.memory_space<vmem>>, vector<16x16xf32>
    %c5_37 = arith.constant 5 : index
    %c0_38 = arith.constant 0 : index
    %c0_39 = arith.constant 0 : index
    %34 = vector.load %arg3[%c5_37, %c0_38, %c0_39] : memref<7x16x128xf32, #tpu.memory_space<vmem>>, vector<1x16x128xf32>
    %35 = vector.shape_cast %34 : vector<1x16x128xf32> to vector<16x128xf32>
    %cst_40 = arith.constant dense<0.000000e+00> : vector<16x128xf32>
    %36 = tpu.matmul %33, %35, %cst_40 {dimension_numbers = #tpu.dot_dimension_numbers<[1], [0], [0], [1], [0, 0, 1, 1], [], []>} : vector<16x16xf32>, vector<16x128xf32>, vector<16x128xf32> -> vector<16x128xf32>
    %37 = arith.addf %32, %36 : vector<16x128xf32>
    %c6 = arith.constant 6 : index
    %c0_41 = arith.constant 0 : index
    %38 = vector.load %arg15[%c6, %c0_41] : memref<22x16xf32, #tpu.memory_space<vmem>>, vector<16x16xf32>
    %c6_42 = arith.constant 6 : index
    %c0_43 = arith.constant 0 : index
    %c0_44 = arith.constant 0 : index
    %39 = vector.load %arg3[%c6_42, %c0_43, %c0_44] : memref<7x16x128xf32, #tpu.memory_space<vmem>>, vector<1x16x128xf32>
    %40 = vector.shape_cast %39 : vector<1x16x128xf32> to vector<16x128xf32>
    %cst_45 = arith.constant dense<0.000000e+00> : vector<16x128xf32>
    %41 = tpu.matmul %38, %40, %cst_45 {dimension_numbers = #tpu.dot_dimension_numbers<[1], [0], [0], [1], [0, 0, 1, 1], [], []>} : vector<16x16xf32>, vector<16x128xf32>, vector<16x128xf32> -> vector<16x128xf32>
    %42 = arith.addf %37, %41 : vector<16x128xf32>
    %c0_46 = arith.constant 0 : index
    %c0_47 = arith.constant 0 : index
    %43 = vector.load %arg4[%c0_46, %c0_47] : memref<1x128xf32, #tpu.memory_space<vmem>>, vector<1x128xf32>
    %44 = vector.broadcast %43 : vector<1x128xf32> to vector<16x128xf32>
    %45 = arith.addf %42, %44 : vector<16x128xf32>
    %cst_48 = arith.constant 0.000000e+00 : f32
    %46 = vector.broadcast %cst_48 : f32 to vector<16x128xf32>
    %47 = arith.maximumf %45, %46 : vector<16x128xf32>
    %c0_49 = arith.constant 0 : index
    %c0_50 = arith.constant 0 : index
    %48 = vector.load %arg14[%c0_49, %c0_50] : memref<16x128xf32, #tpu.memory_space<vmem>>, vector<16x128xf32>
    tpu.vector_store %arg14[%c0_49, %c0_50], %47 {strides = array<i32>} : memref<16x128xf32, #tpu.memory_space<vmem>>, vector<16x128xf32>,
    %49 = arith.index_cast %arg0 : i32 to index
    %50 = memref.load %arg1[%49] : memref<2xi32, #tpu.memory_space<smem>>
    %c0_i32 = arith.constant 0 : i32
    %c0_i32_51 = arith.constant 0 : i32
    %51 = arith.subi %50, %c0_i32_51 : i32
    %52 = arith.addi %c0_i32_51, %51 : i32
    %c1_i32 = arith.constant 1 : i32
    scf.for %arg20 = %c0_i32_51 to %52 step %c1_i32  : i32 {
      %c0_86 = arith.constant 0 : index
      %c0_87 = arith.constant 0 : index
      %79 = vector.load %arg14[%c0_86, %c0_87] : memref<16x128xf32, #tpu.memory_space<vmem>>, vector<16x128xf32>
      %c4_88 = arith.constant 4 : index
      %c0_89 = arith.constant 0 : index
      %80 = vector.load %arg16[%c4_88, %c0_89] : memref<24x128xf32, #tpu.memory_space<vmem>>, vector<16x128xf32>
      tpu.vector_store %arg16[%c4_88, %c0_89], %79 {strides = array<i32>} : memref<24x128xf32, #tpu.memory_space<vmem>>, vector<16x128xf32>,
      %c16_90 = arith.constant 16 : index
      %c0_91 = arith.constant 0 : index
      %81 = vector.load %arg16[%c16_90, %c0_91] : memref<24x128xf32, #tpu.memory_space<vmem>>, vector<4x128xf32>
      %c0_92 = arith.constant 0 : index
      %c0_93 = arith.constant 0 : index
      %82 = vector.load %arg16[%c0_92, %c0_93] : memref<24x128xf32, #tpu.memory_space<vmem>>, vector<4x128xf32>
      tpu.vector_store %arg16[%c0_92, %c0_93], %81 {strides = array<i32>} : memref<24x128xf32, #tpu.memory_space<vmem>>, vector<4x128xf32>,
      %c4_94 = arith.constant 4 : index
      %c0_95 = arith.constant 0 : index
      %83 = vector.load %arg16[%c4_94, %c0_95] : memref<24x128xf32, #tpu.memory_space<vmem>>, vector<4x128xf32>
      %c20 = arith.constant 20 : index
      %c0_96 = arith.constant 0 : index
      %84 = vector.load %arg16[%c20, %c0_96] : memref<24x128xf32, #tpu.memory_space<vmem>>, vector<4x128xf32>
      tpu.vector_store %arg16[%c20, %c0_96], %83 {strides = array<i32>} : memref<24x128xf32, #tpu.memory_space<vmem>>, vector<4x128xf32>,
      %c0_97 = arith.constant 0 : index
      %c0_98 = arith.constant 0 : index
      %85 = vector.load %arg16[%c0_97, %c0_98] : memref<24x128xf32, #tpu.memory_space<vmem>>, vector<20x128xf32>
      %c0_99 = arith.constant 0 : index
      %c0_100 = arith.constant 0 : index
      %c0_101 = arith.constant 0 : index
      %86 = vector.load %arg5[%c0_99, %c0_100, %c0_101] : memref<5x128x320xf32, #tpu.memory_space<vmem>>, vector<1x128x320xf32>
      %87 = vector.shape_cast %86 : vector<1x128x320xf32> to vector<128x320xf32>
      %cst_102 = arith.constant dense<0.000000e+00> : vector<20x320xf32>
      %88 = tpu.matmul %85, %87, %cst_102 {dimension_numbers = #tpu.dot_dimension_numbers<[1], [0], [0], [1], [0, 0, 1, 1], [], []>} : vector<20x128xf32>, vector<128x320xf32>, vector<20x320xf32> -> vector<20x320xf32>
      %c1_103 = arith.constant 1 : index
      %c0_104 = arith.constant 0 : index
      %89 = vector.load %arg16[%c1_103, %c0_104] : memref<24x128xf32, #tpu.memory_space<vmem>>, vector<20x128xf32>
      %c1_105 = arith.constant 1 : index
      %c0_106 = arith.constant 0 : index
      %c0_107 = arith.constant 0 : index
      %90 = vector.load %arg5[%c1_105, %c0_106, %c0_107] : memref<5x128x320xf32, #tpu.memory_space<vmem>>, vector<1x128x320xf32>
      %91 = vector.shape_cast %90 : vector<1x128x320xf32> to vector<128x320xf32>
      %cst_108 = arith.constant dense<0.000000e+00> : vector<20x320xf32>
      %92 = tpu.matmul %89, %91, %cst_108 {dimension_numbers = #tpu.dot_dimension_numbers<[1], [0], [0], [1], [0, 0, 1, 1], [], []>} : vector<20x128xf32>, vector<128x320xf32>, vector<20x320xf32> -> vector<20x320xf32>
      %93 = arith.addf %88, %92 : vector<20x320xf32>
      %c2_109 = arith.constant 2 : index
      %c0_110 = arith.constant 0 : index
      %94 = vector.load %arg16[%c2_109, %c0_110] : memref<24x128xf32, #tpu.memory_space<vmem>>, vector<20x128xf32>
      %c2_111 = arith.constant 2 : index
      %c0_112 = arith.constant 0 : index
      %c0_113 = arith.constant 0 : index
      %95 = vector.load %arg5[%c2_111, %c0_112, %c0_113] : memref<5x128x320xf32, #tpu.memory_space<vmem>>, vector<1x128x320xf32>
      %96 = vector.shape_cast %95 : vector<1x128x320xf32> to vector<128x320xf32>
      %cst_114 = arith.constant dense<0.000000e+00> : vector<20x320xf32>
      %97 = tpu.matmul %94, %96, %cst_114 {dimension_numbers = #tpu.dot_dimension_numbers<[1], [0], [0], [1], [0, 0, 1, 1], [], []>} : vector<20x128xf32>, vector<128x320xf32>, vector<20x320xf32> -> vector<20x320xf32>
      %98 = arith.addf %93, %97 : vector<20x320xf32>
      %c3_115 = arith.constant 3 : index
      %c0_116 = arith.constant 0 : index
      %99 = vector.load %arg16[%c3_115, %c0_116] : memref<24x128xf32, #tpu.memory_space<vmem>>, vector<20x128xf32>
      %c3_117 = arith.constant 3 : index
      %c0_118 = arith.constant 0 : index
      %c0_119 = arith.constant 0 : index
      %100 = vector.load %arg5[%c3_117, %c0_118, %c0_119] : memref<5x128x320xf32, #tpu.memory_space<vmem>>, vector<1x128x320xf32>
      %101 = vector.shape_cast %100 : vector<1x128x320xf32> to vector<128x320xf32>
      %cst_120 = arith.constant dense<0.000000e+00> : vector<20x320xf32>
      %102 = tpu.matmul %99, %101, %cst_120 {dimension_numbers = #tpu.dot_dimension_numbers<[1], [0], [0], [1], [0, 0, 1, 1], [], []>} : vector<20x128xf32>, vector<128x320xf32>, vector<20x320xf32> -> vector<20x320xf32>
      %103 = arith.addf %98, %102 : vector<20x320xf32>
      %c4_121 = arith.constant 4 : index
      %c0_122 = arith.constant 0 : index
      %104 = vector.load %arg16[%c4_121, %c0_122] : memref<24x128xf32, #tpu.memory_space<vmem>>, vector<20x128xf32>
      %c4_123 = arith.constant 4 : index
      %c0_124 = arith.constant 0 : index
      %c0_125 = arith.constant 0 : index
      %105 = vector.load %arg5[%c4_123, %c0_124, %c0_125] : memref<5x128x320xf32, #tpu.memory_space<vmem>>, vector<1x128x320xf32>
      %106 = vector.shape_cast %105 : vector<1x128x320xf32> to vector<128x320xf32>
      %cst_126 = arith.constant dense<0.000000e+00> : vector<20x320xf32>
      %107 = tpu.matmul %104, %106, %cst_126 {dimension_numbers = #tpu.dot_dimension_numbers<[1], [0], [0], [1], [0, 0, 1, 1], [], []>} : vector<20x128xf32>, vector<128x320xf32>, vector<20x320xf32> -> vector<20x320xf32>
      %108 = arith.addf %103, %107 : vector<20x320xf32>
      %c0_127 = arith.constant 0 : index
      %c0_128 = arith.constant 0 : index
      %109 = vector.load %arg6[%c0_127, %c0_128] : memref<1x320xf32, #tpu.memory_space<vmem>>, vector<1x320xf32>
      %110 = vector.broadcast %109 : vector<1x320xf32> to vector<20x320xf32>
      %111 = arith.addf %108, %110 : vector<20x320xf32>
      %cst_129 = arith.constant 0.000000e+00 : f32
      %112 = vector.broadcast %cst_129 : f32 to vector<20x320xf32>
      %113 = arith.maximumf %111, %112 : vector<20x320xf32>
      %c0_130 = arith.constant 0 : index
      %c0_131 = arith.constant 0 : index
      %114 = vector.load %arg17[%c0_130, %c0_131] : memref<20x320xf32, #tpu.memory_space<vmem>>, vector<20x320xf32>
      tpu.vector_store %arg17[%c0_130, %c0_131], %113 {strides = array<i32>} : memref<20x320xf32, #tpu.memory_space<vmem>>, vector<20x320xf32>,
      %c0_132 = arith.constant 0 : index
      %c0_133 = arith.constant 0 : index
      %115 = vector.load %arg17[%c0_132, %c0_133] : memref<20x320xf32, #tpu.memory_space<vmem>>, vector<18x320xf32>
      %c0_134 = arith.constant 0 : index
      %c0_135 = arith.constant 0 : index
      %c0_136 = arith.constant 0 : index
      %116 = vector.load %arg7[%c0_134, %c0_135, %c0_136] : memref<3x320x288xf32, #tpu.memory_space<vmem>>, vector<1x320x288xf32>
      %117 = vector.shape_cast %116 : vector<1x320x288xf32> to vector<320x288xf32>
      %cst_137 = arith.constant dense<0.000000e+00> : vector<18x288xf32>
      %118 = tpu.matmul %115, %117, %cst_137 {dimension_numbers = #tpu.dot_dimension_numbers<[1], [0], [0], [1], [0, 0, 1, 1], [], []>} : vector<18x320xf32>, vector<320x288xf32>, vector<18x288xf32> -> vector<18x288xf32>
      %c1_138 = arith.constant 1 : index
      %c0_139 = arith.constant 0 : index
      %119 = vector.load %arg17[%c1_138, %c0_139] : memref<20x320xf32, #tpu.memory_space<vmem>>, vector<18x320xf32>
      %c1_140 = arith.constant 1 : index
      %c0_141 = arith.constant 0 : index
      %c0_142 = arith.constant 0 : index
      %120 = vector.load %arg7[%c1_140, %c0_141, %c0_142] : memref<3x320x288xf32, #tpu.memory_space<vmem>>, vector<1x320x288xf32>
      %121 = vector.shape_cast %120 : vector<1x320x288xf32> to vector<320x288xf32>
      %cst_143 = arith.constant dense<0.000000e+00> : vector<18x288xf32>
      %122 = tpu.matmul %119, %121, %cst_143 {dimension_numbers = #tpu.dot_dimension_numbers<[1], [0], [0], [1], [0, 0, 1, 1], [], []>} : vector<18x320xf32>, vector<320x288xf32>, vector<18x288xf32> -> vector<18x288xf32>
      %123 = arith.addf %118, %122 : vector<18x288xf32>
      %c2_144 = arith.constant 2 : index
      %c0_145 = arith.constant 0 : index
      %124 = vector.load %arg17[%c2_144, %c0_145] : memref<20x320xf32, #tpu.memory_space<vmem>>, vector<18x320xf32>
      %c2_146 = arith.constant 2 : index
      %c0_147 = arith.constant 0 : index
      %c0_148 = arith.constant 0 : index
      %125 = vector.load %arg7[%c2_146, %c0_147, %c0_148] : memref<3x320x288xf32, #tpu.memory_space<vmem>>, vector<1x320x288xf32>
      %126 = vector.shape_cast %125 : vector<1x320x288xf32> to vector<320x288xf32>
      %cst_149 = arith.constant dense<0.000000e+00> : vector<18x288xf32>
      %127 = tpu.matmul %124, %126, %cst_149 {dimension_numbers = #tpu.dot_dimension_numbers<[1], [0], [0], [1], [0, 0, 1, 1], [], []>} : vector<18x320xf32>, vector<320x288xf32>, vector<18x288xf32> -> vector<18x288xf32>
      %128 = arith.addf %123, %127 : vector<18x288xf32>
      %c0_150 = arith.constant 0 : index
      %c0_151 = arith.constant 0 : index
      %129 = vector.load %arg8[%c0_150, %c0_151] : memref<1x288xf32, #tpu.memory_space<vmem>>, vector<1x288xf32>
      %130 = vector.broadcast %129 : vector<1x288xf32> to vector<18x288xf32>
      %131 = arith.addf %128, %130 : vector<18x288xf32>
      %cst_152 = arith.constant 0.000000e+00 : f32
      %132 = vector.broadcast %cst_152 : f32 to vector<18x288xf32>
      %133 = arith.maximumf %131, %132 : vector<18x288xf32>
      %c0_153 = arith.constant 0 : index
      %c0_154 = arith.constant 0 : index
      %134 = vector.load %arg18[%c0_153, %c0_154] : memref<18x288xf32, #tpu.memory_space<vmem>>, vector<18x288xf32>
      tpu.vector_store %arg18[%c0_153, %c0_154], %133 {strides = array<i32>} : memref<18x288xf32, #tpu.memory_space<vmem>>, vector<18x288xf32>,
      %c0_155 = arith.constant 0 : index
      %c0_156 = arith.constant 0 : index
      %135 = vector.load %arg18[%c0_155, %c0_156] : memref<18x288xf32, #tpu.memory_space<vmem>>, vector<16x288xf32>
      %c0_157 = arith.constant 0 : index
      %c0_158 = arith.constant 0 : index
      %c0_159 = arith.constant 0 : index
      %136 = vector.load %arg9[%c0_157, %c0_158, %c0_159] : memref<3x288x128xf32, #tpu.memory_space<vmem>>, vector<1x288x128xf32>
      %137 = vector.shape_cast %136 : vector<1x288x128xf32> to vector<288x128xf32>
      %cst_160 = arith.constant dense<0.000000e+00> : vector<16x128xf32>
      %138 = tpu.matmul %135, %137, %cst_160 {dimension_numbers = #tpu.dot_dimension_numbers<[1], [0], [0], [1], [0, 0, 1, 1], [], []>} : vector<16x288xf32>, vector<288x128xf32>, vector<16x128xf32> -> vector<16x128xf32>
      %c1_161 = arith.constant 1 : index
      %c0_162 = arith.constant 0 : index
      %139 = vector.load %arg18[%c1_161, %c0_162] : memref<18x288xf32, #tpu.memory_space<vmem>>, vector<16x288xf32>
      %c1_163 = arith.constant 1 : index
      %c0_164 = arith.constant 0 : index
      %c0_165 = arith.constant 0 : index
      %140 = vector.load %arg9[%c1_163, %c0_164, %c0_165] : memref<3x288x128xf32, #tpu.memory_space<vmem>>, vector<1x288x128xf32>
      %141 = vector.shape_cast %140 : vector<1x288x128xf32> to vector<288x128xf32>
      %cst_166 = arith.constant dense<0.000000e+00> : vector<16x128xf32>
      %142 = tpu.matmul %139, %141, %cst_166 {dimension_numbers = #tpu.dot_dimension_numbers<[1], [0], [0], [1], [0, 0, 1, 1], [], []>} : vector<16x288xf32>, vector<288x128xf32>, vector<16x128xf32> -> vector<16x128xf32>
      %143 = arith.addf %138, %142 : vector<16x128xf32>
      %c2_167 = arith.constant 2 : index
      %c0_168 = arith.constant 0 : index
      %144 = vector.load %arg18[%c2_167, %c0_168] : memref<18x288xf32, #tpu.memory_space<vmem>>, vector<16x288xf32>
      %c2_169 = arith.constant 2 : index
      %c0_170 = arith.constant 0 : index
      %c0_171 = arith.constant 0 : index
      %145 = vector.load %arg9[%c2_169, %c0_170, %c0_171] : memref<3x288x128xf32, #tpu.memory_space<vmem>>, vector<1x288x128xf32>
      %146 = vector.shape_cast %145 : vector<1x288x128xf32> to vector<288x128xf32>
      %cst_172 = arith.constant dense<0.000000e+00> : vector<16x128xf32>
      %147 = tpu.matmul %144, %146, %cst_172 {dimension_numbers = #tpu.dot_dimension_numbers<[1], [0], [0], [1], [0, 0, 1, 1], [], []>} : vector<16x288xf32>, vector<288x128xf32>, vector<16x128xf32> -> vector<16x128xf32>
      %148 = arith.addf %143, %147 : vector<16x128xf32>
      %c0_173 = arith.constant 0 : index
      %c0_174 = arith.constant 0 : index
      %149 = vector.load %arg10[%c0_173, %c0_174] : memref<1x128xf32, #tpu.memory_space<vmem>>, vector<1x128xf32>
      %150 = vector.broadcast %149 : vector<1x128xf32> to vector<16x128xf32>
      %151 = arith.addf %148, %150 : vector<16x128xf32>
      %cst_175 = arith.constant 0.000000e+00 : f32
      %152 = vector.broadcast %cst_175 : f32 to vector<16x128xf32>
      %153 = arith.maximumf %151, %152 : vector<16x128xf32>
      %c0_176 = arith.constant 0 : index
      %c0_177 = arith.constant 0 : index
      %154 = vector.load %arg14[%c0_176, %c0_177] : memref<16x128xf32, #tpu.memory_space<vmem>>, vector<16x128xf32>
      tpu.vector_store %arg14[%c0_176, %c0_177], %153 {strides = array<i32>} : memref<16x128xf32, #tpu.memory_space<vmem>>, vector<16x128xf32>,
    }
    %c0_52 = arith.constant 0 : index
    %c0_53 = arith.constant 0 : index
    %53 = vector.load %arg14[%c0_52, %c0_53] : memref<16x128xf32, #tpu.memory_space<vmem>>, vector<16x128xf32>
    %c1_54 = arith.constant 1 : index
    %c0_55 = arith.constant 0 : index
    %54 = vector.load %arg19[%c1_54, %c0_55] : memref<18x128xf32, #tpu.memory_space<vmem>>, vector<16x128xf32>
    tpu.vector_store %arg19[%c1_54, %c0_55], %53 {strides = array<i32>} : memref<18x128xf32, #tpu.memory_space<vmem>>, vector<16x128xf32>,
    %c16_56 = arith.constant 16 : index
    %c0_57 = arith.constant 0 : index
    %55 = vector.load %arg19[%c16_56, %c0_57] : memref<18x128xf32, #tpu.memory_space<vmem>>, vector<1x128xf32>
    %c0_58 = arith.constant 0 : index
    %c0_59 = arith.constant 0 : index
    %56 = vector.load %arg19[%c0_58, %c0_59] : memref<18x128xf32, #tpu.memory_space<vmem>>, vector<1x128xf32>
    tpu.vector_store %arg19[%c0_58, %c0_59], %55 {strides = array<i32>} : memref<18x128xf32, #tpu.memory_space<vmem>>, vector<1x128xf32>,
    %c1_60 = arith.constant 1 : index
    %c0_61 = arith.constant 0 : index
    %57 = vector.load %arg19[%c1_60, %c0_61] : memref<18x128xf32, #tpu.memory_space<vmem>>, vector<1x128xf32>
    %c17 = arith.constant 17 : index
    %c0_62 = arith.constant 0 : index
    %58 = vector.load %arg19[%c17, %c0_62] : memref<18x128xf32, #tpu.memory_space<vmem>>, vector<1x128xf32>
    tpu.vector_store %arg19[%c17, %c0_62], %57 {strides = array<i32>} : memref<18x128xf32, #tpu.memory_space<vmem>>, vector<1x128xf32>,
    %c0_63 = arith.constant 0 : index
    %c0_64 = arith.constant 0 : index
    %59 = vector.load %arg19[%c0_63, %c0_64] : memref<18x128xf32, #tpu.memory_space<vmem>>, vector<16x128xf32>
    %c0_65 = arith.constant 0 : index
    %c0_66 = arith.constant 0 : index
    %c0_67 = arith.constant 0 : index
    %60 = vector.load %arg11[%c0_65, %c0_66, %c0_67] : memref<3x128x16xf32, #tpu.memory_space<vmem>>, vector<1x128x16xf32>
    %61 = vector.shape_cast %60 : vector<1x128x16xf32> to vector<128x16xf32>
    %cst_68 = arith.constant dense<0.000000e+00> : vector<16x16xf32>
    %62 = tpu.matmul %59, %61, %cst_68 {dimension_numbers = #tpu.dot_dimension_numbers<[1], [0], [0], [1], [0, 0, 1, 1], [], []>} : vector<16x128xf32>, vector<128x16xf32>, vector<16x16xf32> -> vector<16x16xf32>
    %c1_69 = arith.constant 1 : index
    %c0_70 = arith.constant 0 : index
    %63 = vector.load %arg19[%c1_69, %c0_70] : memref<18x128xf32, #tpu.memory_space<vmem>>, vector<16x128xf32>
    %c1_71 = arith.constant 1 : index
    %c0_72 = arith.constant 0 : index
    %c0_73 = arith.constant 0 : index
    %64 = vector.load %arg11[%c1_71, %c0_72, %c0_73] : memref<3x128x16xf32, #tpu.memory_space<vmem>>, vector<1x128x16xf32>
    %65 = vector.shape_cast %64 : vector<1x128x16xf32> to vector<128x16xf32>
    %cst_74 = arith.constant dense<0.000000e+00> : vector<16x16xf32>
    %66 = tpu.matmul %63, %65, %cst_74 {dimension_numbers = #tpu.dot_dimension_numbers<[1], [0], [0], [1], [0, 0, 1, 1], [], []>} : vector<16x128xf32>, vector<128x16xf32>, vector<16x16xf32> -> vector<16x16xf32>
    %67 = arith.addf %62, %66 : vector<16x16xf32>
    %c2_75 = arith.constant 2 : index
    %c0_76 = arith.constant 0 : index
    %68 = vector.load %arg19[%c2_75, %c0_76] : memref<18x128xf32, #tpu.memory_space<vmem>>, vector<16x128xf32>
    %c2_77 = arith.constant 2 : index
    %c0_78 = arith.constant 0 : index
    %c0_79 = arith.constant 0 : index
    %69 = vector.load %arg11[%c2_77, %c0_78, %c0_79] : memref<3x128x16xf32, #tpu.memory_space<vmem>>, vector<1x128x16xf32>
    %70 = vector.shape_cast %69 : vector<1x128x16xf32> to vector<128x16xf32>
    %cst_80 = arith.constant dense<0.000000e+00> : vector<16x16xf32>
    %71 = tpu.matmul %68, %70, %cst_80 {dimension_numbers = #tpu.dot_dimension_numbers<[1], [0], [0], [1], [0, 0, 1, 1], [], []>} : vector<16x128xf32>, vector<128x16xf32>, vector<16x16xf32> -> vector<16x16xf32>
    %72 = arith.addf %67, %71 : vector<16x16xf32>
    %c0_81 = arith.constant 0 : index
    %c0_82 = arith.constant 0 : index
    %73 = vector.load %arg12[%c0_81, %c0_82] : memref<1x16xf32, #tpu.memory_space<vmem>>, vector<1x16xf32>
    %74 = vector.broadcast %73 : vector<1x16xf32> to vector<16x16xf32>
    %75 = arith.addf %72, %74 : vector<16x16xf32>
    %c0_83 = arith.constant 0 : index
    %c0_84 = arith.constant 0 : index
    %c0_85 = arith.constant 0 : index
    %76 = vector.load %arg13[%c0_83, %c0_84, %c0_85] : memref<1x16x16xf32, #tpu.memory_space<vmem>>, vector<1x16x16xf32>
    %77 = vector.shape_cast %76 : vector<1x16x16xf32> to vector<16x16xf32>
    %78 = vector.shape_cast %75 : vector<16x16xf32> to vector<1x16x16xf32>
    tpu.vector_store %arg13[%c0_83, %c0_84, %c0_85], %78 {strides = array<i32>} : memref<1x16x16xf32, #tpu.memory_space<vmem>>, vector<1x16x16xf32>,
    return
  }
  func.func @transform_0(%arg0: i32, %arg1: memref<2xi32, #tpu.memory_space<smem>>) -> (i32, i32, i32) {
    %c0_i32 = arith.constant 0 : i32
    %c0_i32_0 = arith.constant 0 : i32
    %c0_i32_1 = arith.constant 0 : i32
    return %arg0, %c0_i32, %c0_i32_0 : i32, i32, i32
  }
  func.func @transform_1(%arg0: i32, %arg1: memref<2xi32, #tpu.memory_space<smem>>) -> (i32, i32, i32) {
    %c0_i32 = arith.constant 0 : i32
    %c0_i32_0 = arith.constant 0 : i32
    %c0_i32_1 = arith.constant 0 : i32
    %c0_i32_2 = arith.constant 0 : i32
    return %c0_i32, %c0_i32_0, %c0_i32_1 : i32, i32, i32
  }
  func.func @transform_2(%arg0: i32, %arg1: memref<2xi32, #tpu.memory_space<smem>>) -> (i32, i32) {
    %c0_i32 = arith.constant 0 : i32
    %c0_i32_0 = arith.constant 0 : i32
    %c0_i32_1 = arith.constant 0 : i32
    return %c0_i32, %c0_i32_0 : i32, i32
  }
  func.func @transform_3(%arg0: i32, %arg1: memref<2xi32, #tpu.memory_space<smem>>) -> (i32, i32, i32) {
    %c0_i32 = arith.constant 0 : i32
    %c0_i32_0 = arith.constant 0 : i32
    %c0_i32_1 = arith.constant 0 : i32
    %c0_i32_2 = arith.constant 0 : i32
    return %c0_i32, %c0_i32_0, %c0_i32_1 : i32, i32, i32
  }
  func.func @transform_4(%arg0: i32, %arg1: memref<2xi32, #tpu.memory_space<smem>>) -> (i32, i32) {
    %c0_i32 = arith.constant 0 : i32
    %c0_i32_0 = arith.constant 0 : i32
    %c0_i32_1 = arith.constant 0 : i32
    return %c0_i32, %c0_i32_0 : i32, i32
  }
  func.func @transform_5(%arg0: i32, %arg1: memref<2xi32, #tpu.memory_space<smem>>) -> (i32, i32, i32) {
    %c0_i32 = arith.constant 0 : i32
    %c0_i32_0 = arith.constant 0 : i32
    %c0_i32_1 = arith.constant 0 : i32
    %c0_i32_2 = arith.constant 0 : i32
    return %c0_i32, %c0_i32_0, %c0_i32_1 : i32, i32, i32
  }
  func.func @transform_6(%arg0: i32, %arg1: memref<2xi32, #tpu.memory_space<smem>>) -> (i32, i32) {
    %c0_i32 = arith.constant 0 : i32
    %c0_i32_0 = arith.constant 0 : i32
    %c0_i32_1 = arith.constant 0 : i32
    return %c0_i32, %c0_i32_0 : i32, i32
  }
  func.func @transform_7(%arg0: i32, %arg1: memref<2xi32, #tpu.memory_space<smem>>) -> (i32, i32, i32) {
    %c0_i32 = arith.constant 0 : i32
    %c0_i32_0 = arith.constant 0 : i32
    %c0_i32_1 = arith.constant 0 : i32
    %c0_i32_2 = arith.constant 0 : i32
    return %c0_i32, %c0_i32_0, %c0_i32_1 : i32, i32, i32
  }
  func.func @transform_8(%arg0: i32, %arg1: memref<2xi32, #tpu.memory_space<smem>>) -> (i32, i32) {
    %c0_i32 = arith.constant 0 : i32
    %c0_i32_0 = arith.constant 0 : i32
    %c0_i32_1 = arith.constant 0 : i32
    return %c0_i32, %c0_i32_0 : i32, i32
  }
  func.func @transform_9(%arg0: i32, %arg1: memref<2xi32, #tpu.memory_space<smem>>) -> (i32, i32, i32) {
    %c0_i32 = arith.constant 0 : i32
    %c0_i32_0 = arith.constant 0 : i32
    %c0_i32_1 = arith.constant 0 : i32
    %c0_i32_2 = arith.constant 0 : i32
    return %c0_i32, %c0_i32_0, %c0_i32_1 : i32, i32, i32
  }
  func.func @transform_10(%arg0: i32, %arg1: memref<2xi32, #tpu.memory_space<smem>>) -> (i32, i32) {
    %c0_i32 = arith.constant 0 : i32
    %c0_i32_0 = arith.constant 0 : i32
    %c0_i32_1 = arith.constant 0 : i32
    return %c0_i32, %c0_i32_0 : i32, i32
  }
  func.func @transform_11(%arg0: i32, %arg1: memref<2xi32, #tpu.memory_space<smem>>) -> (i32, i32, i32) {
    %c0_i32 = arith.constant 0 : i32
    %c0_i32_0 = arith.constant 0 : i32
    %c0_i32_1 = arith.constant 0 : i32
    return %arg0, %c0_i32, %c0_i32_0 : i32, i32, i32
  }
}

</mosaic_0001>

<bundles_post_ra>
// kernel: reverse_model_forward.1
= control target key start
LH: loop header
LB: loop body
LE: loop exit
PB: predicated region body
PF: predicated region fallthrough
CT: control target
= control target key end

     0   :  { %s10245_s0 = inlined_call_operand.vmem [shape: s32[2], index: 0, kind: input, shape index: {}]   ;;  %s10246_s1 = inlined_call_operand.vmem [shape: f32[2,16,16], index: 1, kind: input, shape index: {}]   ;;  %s10247_s2 = inlined_call_operand.vmem [shape: f32[7,16,128], index: 2, kind: input, shape index: {}]   ;;  %s10248_s3 = inlined_call_operand.vmem [shape: f32[1,128], index: 3, kind: input, shape index: {}]   ;;  %s10249_s4 = inlined_call_operand.vmem [shape: f32[5,128,320], index: 4, kind: input, shape index: {}]   ;;  %s10250_s5 = inlined_call_operand.vmem [shape: f32[1,320], index: 5, kind: input, shape index: {}]   ;;  %s10251_s6 = inlined_call_operand.vmem [shape: f32[3,320,288], index: 6, kind: input, shape index: {}]   ;;  %s10252_s7 = inlined_call_operand.vmem [shape: f32[1,288], index: 7, kind: input, shape index: {}]   ;;  %s10253_s8 = inlined_call_operand.vmem [shape: f32[3,288,128], index: 8, kind: input, shape index: {}]   ;;  %s10254_s9 = inlined_call_operand.vmem [shape: f32[1,128], index: 9, kind: input, shape index: {}]   ;;  %s10255_s10 = inlined_call_operand.vmem [shape: f32[3,128,16], index: 10, kind: input, shape index: {}]   ;;  %s10256_s11 = inlined_call_operand.vmem [shape: f32[1,16], index: 11, kind: input, shape index: {}]   ;;  %s10257_s12 = inlined_call_operand.hbm [shape: f32[2,16,16], index: 12, kind: output, shape index: {}]  }
   0x1   :  { %10259 = sst [smem:[#allocation15_spill]] %s10246_s1  ;;  %s17_s23 = sshll.u32 %s10245_s0, 4  ;;  %s18_s23 = int_to_ptr.vmem [resolvable:$true] %s17_s23 }
   0x2   :  { %10260 = sst [smem:[#allocation16_spill]] %s10247_s2  ;;  %s7296_s24 = scalar_lea.vmem %s18_s23, 16 }
   0x3   :  { %10261 = sst [smem:[#allocation17_spill]] %s10248_s3  ;;  %p7297_p0 = scmp.ne.s32.totalorder %s18_s23, %s7296_s24 }
   0x4   :  { %10262 = sst [smem:[#allocation18_spill]] %s10249_s4  ;;  %p7301_p1 = scmp.lt.s32.totalorder %s18_s23, %s18_s23 }
   0x5   :  { %p7302_p2 = scmp.lt.s32.totalorder %s7296_s24, %s7296_s24 }
   0x7   :  { %p7303_p3 = por %p7302_p2, %p7301_p1 }
   0x9   :  { %p7304_p4 = pnand %p7303_p3, %p7297_p0 }
   0xb   :  { %7307 = shalt.err (!%p7304_p4)  }
   0xc   :  { %s7382_s25 = smov [#allocation9]  }
   0xd   :  { %20 = dma.vmem_to_smem %s18_s23, 16, %s7382_s25, [#allocation8] }
   0xe   :  { %7356 = dma.done.wait [#allocation8], 16 }
   0xf   :  { %7357 = vsyncadd [#allocation8], 4294967280 }
  0x10   :  { %22 = sfence }
  0x11   :  { %23 = vsyncpa [#allocation11], 0 }
  0x12   :  { %25 = vsyncpa [#allocation11 + $0x1], 0  ;;  %s7457_s26 = smov 0   ;;  %s7459_s27 = smov 0  }
  0x13   :  { %s7461_s0 = smov 0   ;;  %s7463_s28 = smov 0  }
  0x14 LB: > { %s7478_s29 = sadd.s32 4294967295, %s7376_s28   ;;  %s4727_s30 = sadd.s32 4294967294, %s7376_s28   ;;  %s7376_s28 = sphi %s7463_s28, %s10275_s28   ;;  %s7372_s0 = sphi %s7461_s0, %s10274_s0   ;;  %s7368_s27 = sphi %s7459_s27, %s10273_s27   ;;  %s7364_s26 = sphi %s7457_s26, %s10272_s26  }
  0x15   : > { %s7482_s13 = sadd.s32 1, %s7376_s28   ;;  %s274_s14 = sadd.s32 1, %s7372_s0 }
  0x16   : > { %s271_s15 = ssub.s32 %s7376_s28, %s7482_s13  ;;  %p284_p5 = scmp.ne.s32.totalorder %s7372_s0, %s7368_s27 }
  0x17   : > { %p272_p6 = scmp.eq.s32.totalorder %s271_s15, 0  ;;  %p285_p7 = scmp.eq.s32.totalorder %s7478_s29, 1 }
  0x18   : > { %p290_p8 = scmp.ne.s32.totalorder %s7368_s27, %s7364_s26  ;;  %p291_p9 = scmp.eq.s32.totalorder %s4727_s30, 1 }
  0x19   : > { %s7493_s16 = scalar_select %p272_p6, %s7372_s0, %s274_s14  }
  0x1a   : > { %p7495_p10 = por %p285_p7, %p284_p5  ;;  %p7499_p11 = por %p291_p9, %p290_p8 }
  0x1b   : > { %10263 = sst [smem:[#allocation14_spill]] %s7493_s16  ;;  %p4730_p12 = scmp.ge.s32.totalorder %s7376_s28, 1 }
  0x1c   : > { %p347_p13 = scmp.lt.s32.totalorder %s7376_s28, 3 }
  0x1e   : > { %p348_p0 = pnand %p4730_p12, %p347_p13 }
  0x1f   : > { %s10266_s2 = sld [smem:[#allocation16_spill]] (!%p348_p0)  ;;  %p387_p1 = scmp.lt.s32.totalorder (!%p348_p0), %s7478_s29, 1  ;;  %vm396_vm0 = vcmask (!%p348_p0), 130048   ;;  %vm400_vm1 = vcmask (!%p348_p0), 124928  }
  0x20   : > { %351 = sbr.rel (%p348_p0) target bundleno = 1703 (0x6a7), region = 64  ;;  %s10258_s25 = sand.u32 (!%p348_p0), 1, %s7368_s27  }
  0x21   : > { %s7521_s15 = sshll.u32 (!%p348_p0), %s10258_s25, 4  ;;  %s10267_s1 = sld [smem:[#allocation15_spill]] (!%p348_p0) }
  0x22   : > { %s10268_s3 = sld [smem:[#allocation17_spill]] (!%p348_p0)  ;;  %s7580_s30 = scalar_lea.vmem (!%p348_p0), [#allocation10], %s7521_s15 }
  0x25   : > { %v4746_v0 = vld [vmem:[%s10266_s2 + $0x30] sm:$0xff] (!%p348_p0)  ;;  %v4747_v1 = vld [vmem:[%s10266_s2 + $0x38] sm:$0xff] (!%p348_p0)  ;;  %v4750_v2 = vld [vmem:[%s10266_s2 + $0x40] sm:$0xff] (!%p348_p0) }
  0x26   : > { %v6277_v3 = vpack.c.bf16 (!%p348_p0), %v4747_v1, %v4746_v0  ;;  %v4751_v4 = vld [vmem:[%s10266_s2 + $0x48] sm:$0xff] (!%p348_p0)  ;;  %v4736_v5 = vld [vmem:[%s10266_s2 + $0x10] sm:$0xff] (!%p348_p0)  ;;  %v4737_v6 = vld [vmem:[%s10266_s2 + $0x18] sm:$0xff] (!%p348_p0) }
  0x27   : > { %s388_s16 = scalar_select %p387_p1, %s7478_s29, 1  ;;  %v6281_v7 = vpack.c.bf16 %v4751_v4, %v4750_v2  ;;  %v6265_v8 = vpack.c.bf16 %v4737_v6, %v4736_v5  ;;  %v406_v9 = vld [vmem:[%s10266_s2] sm:$0xff]  ;;  %v407_v10 = vld [vmem:[%s10266_s2 + $0x8] sm:$0xff]  ;;  %v4754_v16 = vld [vmem:[%s10266_s2 + $0x50] sm:$0xff] }
  0x28   : > { %6278 = vmatprep.subr.bf16.mxu0 %v6277_v3  ;;  %v6269_v11 = vpack.c.bf16 %v407_v10, %v406_v9  ;;  %v4755_v17 = vld [vmem:[%s10266_s2 + $0x58] sm:$0xff]  ;;  %v4742_v24 = vld [vmem:[%s10266_s2 + $0x20] sm:$0xff]  ;;  %v4743_v25 = vld [vmem:[%s10266_s2 + $0x28] sm:$0xff] }
  0x29   : > { %6280 = vmatpush3.bf16.msra.mxu0 %v6277_v3  ;;  %s5331_s19 = sshll.u32 %s388_s16, 4  ;;  %6266 = vmatprep.subr.bf16.mxu1 %v6265_v8  ;;  %v6285_v21 = vpack.c.bf16 %v4755_v17, %v4754_v16  ;;  %v4758_v26 = vld [vmem:[%s10266_s2 + $0x60] sm:$0xff]  ;;  %v4759_v27 = vld [vmem:[%s10266_s2 + $0x68] sm:$0xff]  ;;  %v6273_v30 = vpack.c.bf16 %v4743_v25, %v4742_v24  ;;  %s7574_s16 = sld [smem:[#allocation9 + %s7478_s29]] }
  0x2a   : > { %s391_s21 = scalar_lea.vmem %s10267_s1, %s5331_s19  ;;  %6282 = vmatprep.subr.bf16.mxu0 %v6281_v7  ;;  %6268 = vmatpush3.bf16.msra.mxu1 %v6265_v8  ;;  %v6289_v33 = vpack.c.bf16 %v4759_v27, %v4758_v26  ;;  %v4762_v43 = vld [vmem:[%s10268_s3] ss:$0 sm:$0xff] }
  0x2b   : > { %v392_v12 = vld [vmem:[%s391_s21] sm:$0xff]  ;;  %v393_v13 = vld [vmem:[%s391_s21 + $0x8] sm:$0xff]  ;;  %6270 = vmatprep.subr.bf16.mxu1 %v6269_v11 }
  0x2c   : > { %v4734_v14 = vadd.f32 -0.5, %v392_v12  ;;  %v4735_v15 = vadd.f32 -0.5, %v393_v13 }
  0x2e   : > { %397 = vst.msk [vmem:[#allocation3 + $0x3] sm:$0xff] %vm396_vm0, %v4734_v14  ;;  %398 = vst.msk [vmem:[#allocation3 + $0xb] sm:$0xff] %vm396_vm0, %v4735_v15 }
  0x2f   : > { %p4763_p2 = scmp.le.s32.totalorder %s7574_s16, 0 }
  0x30   : > { %s7583_s14 = smov (!%p4763_p2), 0  }
  0x35   : > { %v663_v18 = vld [vmem:[#allocation3 + $0x3] sm:$0xff]  ;;  %v664_v19 = vld [vmem:[#allocation3 + $0xb] sm:$0xff] }
  0x36   : > { %v399_v20 = vld [vmem:[#allocation3 + $0x10] sm:$0x7]  ;;  %5823 = vmatprep.mubr.msk.f32.mxu0 %vm396_vm0, %v663_v18  ;;  %v402_v22 = vld [vmem:[#allocation3 + $0x3] sm:$0x7]  ;;  %v405_v35 = vld [vmem:[#allocation3 + $0x8] sm:$0xff] }
  0x37   : > { %401 = vst.msk [vmem:[#allocation3] sm:$0x7] %vm400_vm1, %v399_v20  ;;  %v751_v23 = vld [vmem:[#allocation3 + $0x4] sm:$0xff]  ;;  %5824 = vmatmul.mubr.msk.f32.vlgmr.msra.gmra.mrb[0].mxu0 %vm396_vm0, %v664_v19  ;;  %403 = vst.msk [vmem:[#allocation3 + $0x13] sm:$0x7] %vm400_vm1, %v402_v22 }
  0x38   : > { %6284 = vmatpush3.bf16.msra.mxu0 %v6281_v7  ;;  %5830 = vmatprep.mubr.msk.f32.mxu0 %vm396_vm0, %v751_v23  ;;  %v409_v28 = vld [vmem:[#allocation3 + $0x9] sm:$0xff] }
  0x39   : > { %6286 = vmatprep.subr.bf16.mxu0 %v6285_v21  ;;  %v839_v34 = vld [vmem:[#allocation3 + $0x5] sm:$0xff] }
  0x3a   : > { %v927_v38 = vld [vmem:[#allocation3 + $0x6] sm:$0xff] }
  0x3b   : > { %v576_v39 = vld [vmem:[#allocation3 + $0xa] sm:$0xff] }
  0x3e   : > { %v408_v29 = vld [vmem:[#allocation3 + $0x1] sm:$0xff]  ;;  %v752_v31 = vld [vmem:[#allocation3 + $0xc] sm:$0xff] }
  0x3f   : > { %5802 = vmatprep.mubr.msk.f32.mxu1 %vm396_vm0, %v408_v29  ;;  %v404_v32 = vld [vmem:[#allocation3] sm:$0xff]  ;;  %5831 = vmatmul.mubr.msk.f32.vlgmr.msra.gmra.mrb[0].mxu0 %vm396_vm0, %v752_v31  ;;  %v840_v36 = vld [vmem:[#allocation3 + $0xd] sm:$0xff] }
  0x40   : > { %5803 = vmatmul.mubr.msk.f32.vlgmr.msra.gmra.mrb[0].mxu1 %vm396_vm0, %v409_v28  ;;  %6288 = vmatpush3.bf16.msra.mxu0 %v6285_v21  ;;  %v575_v37 = vld [vmem:[#allocation3 + $0x2] sm:$0xff]  ;;  %v928_v40 = vld [vmem:[#allocation3 + $0xe] sm:$0xff] }
  0x41   : > { %6272 = vmatpush3.bf16.msra.mxu1 %v6269_v11  ;;  %5809 = vmatprep.mubr.msk.f32.mxu1 %vm396_vm0, %v404_v32 }
  0x42   : > { %6274 = vmatprep.subr.bf16.mxu1 %v6273_v30  ;;  %5837 = vmatprep.mubr.msk.f32.mxu0 %vm396_vm0, %v839_v34 }
  0x43   : > { %6290 = vmatprep.subr.bf16.mxu0 %v6289_v33 }
  0x47   : > { %5838 = vmatmul.mubr.msk.f32.vlgmr.msra.gmra.mrb[0].mxu0 %vm396_vm0, %v840_v36 }
  0x48   : > { %5810 = vmatmul.mubr.msk.f32.vlgmr.msra.gmra.mrb[0].mxu1 %vm396_vm0, %v405_v35  ;;  %6292 = vmatpush3.bf16.msra.mxu0 %v6289_v33 }
  0x49   : > { %6276 = vmatpush3.bf16.msra.mxu1 %v6273_v30  ;;  %5816 = vmatprep.mubr.msk.f32.mxu1 %vm396_vm0, %v575_v37 }
  0x4a   : > { %5844 = vmatprep.mubr.msk.f32.mxu0 %vm396_vm0, %v927_v38 }
  0x4f   : > { %5845 = vmatmul.mubr.msk.f32.vlgmr.msra.gmra.mrb[0].mxu0 %vm396_vm0, %v928_v40 }
  0x50   : > { %5817 = vmatmul.mubr.msk.f32.vlgmr.msra.gmra.mrb[0].mxu1 %vm396_vm0, %v576_v39 }
 0x122   : > { %v5846_v42 = vpop.f32.mrb[0].mxu0 }
 0x123   : > { %v5818_v41 = vpop.f32.mrb[0].mxu1  ;;  %v1004_v46 = vpop.f32.mrb[1].mxu0 }
 0x124   : > { %v7161_v44 = vadd.f32 %v5846_v42, %v5818_v41  ;;  %v652_v45 = vpop.f32.mrb[1].mxu1 }
 0x125   : > { %v7162_v47 = vadd.f32 %v1004_v46, %v652_v45  ;;  %4703 = sbr.rel (%p4763_p2) target bundleno = 1404 (0x57c), region = 116 }
 0x126   : > { %v1023_v48 = vadd.f32 %v7161_v44, %v4762_v43 }
 0x127   : > { %v1022_v49 = vadd.f32 %v7162_v47, %v4762_v43 }
 0x128   : > { %v1025_v50 = vmax.f32 %v1023_v48, 0.0 }
 0x129   : > { %v1024_v51 = vmax.f32 %v1022_v49, 0.0 }
 0x12a   : > { %1027 = vst [vmem:[#allocation2 + $0x8] sm:$0xff] %v1025_v50 }
 0x12b   : > { %1026 = vst [vmem:[#allocation2] sm:$0xff] %v1024_v51 }
 0x12c LB: >> { %s10269_s4 = sld [smem:[#allocation18_spill]]  ;;  %v7383_v55 = vmov 0.0|0.0   ;;  %vm7384_vm2 = vmmov 0   ;;  %v7385_v60 = vmov 0.0   ;;  %vm2181_vm3 = vcmask 523264   ;;  %s1032_s14 = sadd.s32 1, %s7380_s14   ;;  %s7380_s14 = sphi %s7583_s14, %s1032_s14  }
 0x12d   : >> { %6325 = vmatprep.subr.bf16.mxu1 %v7383_v55  ;;  %5879 = vmatprep.mubr.msk.f32.mxu1 %vm7384_vm2, %v7385_v60  ;;  %vm2188_vm4 = vcmask 519168   ;;  %vm2455_vm5 = vcmask 1046528   ;;  %vm3276_vm6 = vcmask 1045504   ;;  %vm3676_vm7 = vcmask 261120   ;;  %p1031_p3 = scmp.ge.s32.totalorder %s1032_s14, %s7574_s16 }
 0x12e   : >> { %1210 = vmatprep.mubr.f32.mxu0 %v7385_v60  ;;  %vm3683_vm8 = vcmask 254976  }
 0x131   : >> { %v1036_v39 = vld [vmem:[#allocation2 + $0x8] sm:$0xff] }
 0x132   : >> { %v4765_v52 = vld [vmem:[%s10269_s4 + $0x188] sm:$0xff]  ;;  %v4768_v53 = vld [vmem:[%s10269_s4 + $0x1a0] sm:$0xff]  ;;  %v4766_v54 = vld [vmem:[%s10269_s4 + $0x190] sm:$0xff]  ;;  %1038 = vst [vmem:[#allocation4 + $0xc] sm:$0xff] %v1036_v39 }
 0x133   : >> { %v6293_v56 = vpack.c.bf16 %v4768_v53, %v4765_v52  ;;  %v4769_v57 = vld [vmem:[%s10269_s4 + $0x1a8] sm:$0xff]  ;;  %v4764_v58 = vld [vmem:[%s10269_s4 + $0x180] sm:$0xff]  ;;  %v4767_v59 = vld [vmem:[%s10269_s4 + $0x198] sm:$0xff] }
 0x134   : >> { %v6326_v61 = vpack.c.bf16 %v4769_v57, %v4766_v54  ;;  %v6295_v62 = vpack.c.bf16 %v4767_v59, %v4764_v58  ;;  %v4771_v63 = vld [vmem:[%s10269_s4 + $0x1b8] sm:$0xff]  ;;  %v4774_v0 = vld [vmem:[%s10269_s4 + $0x1d0] sm:$0xff]  ;;  %v4772_v1 = vld [vmem:[%s10269_s4 + $0x1c0] sm:$0xff] }
 0x135   : >> { %6294 = vmatprep.subr.bf16.mxu0 %v6293_v56  ;;  %v6297_v2 = vpack.c.bf16 %v4774_v0, %v4771_v63  ;;  %v4775_v3 = vld [vmem:[%s10269_s4 + $0x1d8] sm:$0xff]  ;;  %v4770_v4 = vld [vmem:[%s10269_s4 + $0x1b0] sm:$0xff]  ;;  %v4773_v5 = vld [vmem:[%s10269_s4 + $0x1c8] sm:$0xff] }
 0x136   : >> { %6327 = vmatpush3.bf16.msra.mxu1 %v6326_v61  ;;  %6296 = vmatpush1.bf16.msra.mxu0 %v6295_v62  ;;  %v6329_v6 = vpack.c.bf16 %v4775_v3, %v4772_v1  ;;  %v6299_v7 = vpack.c.bf16 %v4773_v5, %v4770_v4  ;;  %v4777_v8 = vld [vmem:[%s10269_s4 + $0x1e8] sm:$0xff]  ;;  %v4780_v9 = vld [vmem:[%s10269_s4 + $0x200] sm:$0xff]  ;;  %v4778_v10 = vld [vmem:[%s10269_s4 + $0x1f0] sm:$0xff] }
 0x137   : >> { %6328 = vmatprep.subr.bf16.mxu1 %v7383_v55  ;;  %6298 = vmatprep.subr.bf16.mxu0 %v6297_v2  ;;  %v6301_v11 = vpack.c.bf16 %v4780_v9, %v4777_v8  ;;  %v4781_v12 = vld [vmem:[%s10269_s4 + $0x208] sm:$0xff]  ;;  %v4776_v13 = vld [vmem:[%s10269_s4 + $0x1e0] sm:$0xff]  ;;  %v4779_v14 = vld [vmem:[%s10269_s4 + $0x1f8] sm:$0xff] }
 0x138   : >> { %v4783_v15 = vld [vmem:[%s10269_s4 + $0x218] sm:$0xff]  ;;  %v4786_v16 = vld [vmem:[%s10269_s4 + $0x230] sm:$0xff]  ;;  %v6332_v17 = vpack.c.bf16 %v4781_v12, %v4778_v10  ;;  %v6303_v18 = vpack.c.bf16 %v4779_v14, %v4776_v13  ;;  %v4784_v19 = vld [vmem:[%s10269_s4 + $0x220] sm:$0xff] }
 0x139   : >> { %v6305_v20 = vpack.c.bf16 %v4786_v16, %v4783_v15  ;;  %v4787_v21 = vld [vmem:[%s10269_s4 + $0x238] sm:$0xff]  ;;  %v4782_v22 = vld [vmem:[%s10269_s4 + $0x210] sm:$0xff]  ;;  %v4785_v23 = vld [vmem:[%s10269_s4 + $0x228] sm:$0xff] }
 0x13a   : >> { %6330 = vmatpush3.bf16.msra.mxu1 %v6329_v6  ;;  %6300 = vmatpush1.bf16.msra.mxu0 %v6299_v7  ;;  %v4789_v24 = vld [vmem:[%s10269_s4 + $0x248] sm:$0xff]  ;;  %v4792_v25 = vld [vmem:[%s10269_s4 + $0x260] sm:$0xff]  ;;  %v6335_v26 = vpack.c.bf16 %v4787_v21, %v4784_v19  ;;  %v6307_v27 = vpack.c.bf16 %v4785_v23, %v4782_v22  ;;  %v4790_v28 = vld [vmem:[%s10269_s4 + $0x250] sm:$0xff] }
 0x13b   : >> { %6331 = vmatprep.subr.bf16.mxu1 %v7383_v55  ;;  %6302 = vmatprep.subr.bf16.mxu0 %v6301_v11  ;;  %v6309_v29 = vpack.c.bf16 %v4792_v25, %v4789_v24  ;;  %v4793_v30 = vld [vmem:[%s10269_s4 + $0x268] sm:$0xff]  ;;  %v4788_v31 = vld [vmem:[%s10269_s4 + $0x240] sm:$0xff]  ;;  %v4791_v32 = vld [vmem:[%s10269_s4 + $0x258] sm:$0xff] }
 0x13c   : >> { %v4795_v33 = vld [vmem:[%s10269_s4 + $0x278] sm:$0xff]  ;;  %v4798_v34 = vld [vmem:[%s10269_s4 + $0x290] sm:$0xff]  ;;  %v6338_v35 = vpack.c.bf16 %v4793_v30, %v4790_v28  ;;  %v6311_v36 = vpack.c.bf16 %v4791_v32, %v4788_v31  ;;  %v4796_v37 = vld [vmem:[%s10269_s4 + $0x280] sm:$0xff] }
 0x13d   : >> { %v1035_v38 = vld [vmem:[#allocation2] sm:$0xff]  ;;  %v6313_v40 = vpack.c.bf16 %v4798_v34, %v4795_v33  ;;  %v4799_v41 = vld [vmem:[%s10269_s4 + $0x298] sm:$0xff]  ;;  %v4794_v42 = vld [vmem:[%s10269_s4 + $0x270] sm:$0xff] }
 0x13e   : >> { %6333 = vmatpush3.bf16.msra.mxu1 %v6332_v17  ;;  %6304 = vmatpush1.bf16.msra.mxu0 %v6303_v18  ;;  %v4797_v43 = vld [vmem:[%s10269_s4 + $0x288] sm:$0xff]  ;;  %1037 = vst [vmem:[#allocation4 + $0x4] sm:$0xff] %v1035_v38  ;;  %v4804_v45 = vld [vmem:[%s10269_s4 + $0x2c0] sm:$0xff]  ;;  %v6341_v46 = vpack.c.bf16 %v4799_v41, %v4796_v37  ;;  %v4802_v48 = vld [vmem:[%s10269_s4 + $0x2b0] sm:$0xff] }
 0x13f   : >> { %6334 = vmatprep.subr.bf16.mxu1 %v7383_v55  ;;  %6306 = vmatprep.subr.bf16.mxu0 %v6305_v20  ;;  %v4801_v44 = vld [vmem:[%s10269_s4 + $0x2a8] sm:$0xff]  ;;  %v6315_v47 = vpack.c.bf16 %v4797_v43, %v4794_v42  ;;  %v4800_v51 = vld [vmem:[%s10269_s4 + $0x2a0] sm:$0xff]  ;;  %v4803_v52 = vld [vmem:[%s10269_s4 + $0x2b8] sm:$0xff] }
 0x140   : >> { %v6317_v49 = vpack.c.bf16 %v4804_v45, %v4801_v44  ;;  %v4805_v50 = vld [vmem:[%s10269_s4 + $0x2c8] sm:$0xff]  ;;  %v4807_v53 = vld [vmem:[%s10269_s4 + $0x2d8] sm:$0xff]  ;;  %v4810_v54 = vld [vmem:[%s10269_s4 + $0x2f0] sm:$0xff]  ;;  %v6319_v57 = vpack.c.bf16 %v4803_v52, %v4800_v51 }
 0x141   : >> { %v6344_v56 = vpack.c.bf16 %v4805_v50, %v4802_v48  ;;  %v4808_v58 = vld [vmem:[%s10269_s4 + $0x2e0] sm:$0xff]  ;;  %v1039_v59 = vld [vmem:[#allocation4 + $0x10] sm:$0xf]  ;;  %v6321_v61 = vpack.c.bf16 %v4810_v54, %v4807_v53  ;;  %v4806_v63 = vld [vmem:[%s10269_s4 + $0x2d0] sm:$0xff] }
 0x142   : >> { %6336 = vmatpush3.bf16.msra.mxu1 %v6335_v26  ;;  %6308 = vmatpush1.bf16.msra.mxu0 %v6307_v27  ;;  %v4811_v62 = vld [vmem:[%s10269_s4 + $0x2f8] sm:$0xff]  ;;  %v4809_v0 = vld [vmem:[%s10269_s4 + $0x2e8] sm:$0xff]  ;;  %1040 = vst [vmem:[#allocation4] sm:$0xf] %v1039_v59  ;;  %v1050_v2 = vld [vmem:[%s10269_s4 + $0x20] sm:$0xff] }
 0x143   : >> { %6337 = vmatprep.subr.bf16.mxu1 %v7383_v55  ;;  %6310 = vmatprep.subr.bf16.mxu0 %v6309_v29  ;;  %v1047_v1 = vld [vmem:[%s10269_s4 + $0x8] sm:$0xff]  ;;  %v6347_v3 = vpack.c.bf16 %v4811_v62, %v4808_v58  ;;  %v6323_v4 = vpack.c.bf16 %v4809_v0, %v4806_v63  ;;  %v1048_v5 = vld [vmem:[%s10269_s4 + $0x10] sm:$0xff]  ;;  %v1046_v8 = vld [vmem:[%s10269_s4] sm:$0xff] }
 0x144   : >> { %v6349_v6 = vpack.c.bf16 %v1050_v2, %v1047_v1  ;;  %v1051_v7 = vld [vmem:[%s10269_s4 + $0x28] sm:$0xff]  ;;  %v1049_v9 = vld [vmem:[%s10269_s4 + $0x18] sm:$0xff]  ;;  %v1056_v11 = vld [vmem:[%s10269_s4 + $0x50] sm:$0xff] }
 0x145   : >> { %v1053_v10 = vld [vmem:[%s10269_s4 + $0x38] sm:$0xff]  ;;  %v1041_v12 = vld [vmem:[#allocation4 + $0x4] sm:$0xf]  ;;  %v6382_v14 = vpack.c.bf16 %v1051_v7, %v1048_v5  ;;  %v6351_v15 = vpack.c.bf16 %v1049_v9, %v1046_v8  ;;  %v1054_v16 = vld [vmem:[%s10269_s4 + $0x40] sm:$0xff] }
 0x146   : >> { %6339 = vmatpush3.bf16.msra.mxu1 %v6338_v35  ;;  %6312 = vmatpush1.bf16.msra.mxu0 %v6311_v36  ;;  %1042 = vst [vmem:[#allocation4 + $0x14] sm:$0xf] %v1041_v12  ;;  %v6353_v17 = vpack.c.bf16 %v1056_v11, %v1053_v10  ;;  %v1057_v18 = vld [vmem:[%s10269_s4 + $0x58] sm:$0xff]  ;;  %v1052_v19 = vld [vmem:[%s10269_s4 + $0x30] sm:$0xff]  ;;  %v1055_v20 = vld [vmem:[%s10269_s4 + $0x48] sm:$0xff] }
 0x147   : >> { %6340 = vmatprep.subr.bf16.mxu1 %v7383_v55  ;;  %6314 = vmatprep.subr.bf16.mxu0 %v6313_v40  ;;  %v1059_v21 = vld [vmem:[%s10269_s4 + $0x68] sm:$0xff]  ;;  %v1062_v22 = vld [vmem:[%s10269_s4 + $0x80] sm:$0xff]  ;;  %v6385_v23 = vpack.c.bf16 %v1057_v18, %v1054_v16  ;;  %v6355_v24 = vpack.c.bf16 %v1055_v20, %v1052_v19  ;;  %v1060_v25 = vld [vmem:[%s10269_s4 + $0x70] sm:$0xff] }
 0x148   : >> { %v1095_v26 = vld [vmem:[#allocation4 + $0x9] sm:$0xff]  ;;  %v6357_v27 = vpack.c.bf16 %v1062_v22, %v1059_v21  ;;  %v1063_v28 = vld [vmem:[%s10269_s4 + $0x88] sm:$0xff]  ;;  %v1058_v29 = vld [vmem:[%s10269_s4 + $0x60] sm:$0xff] }
 0x149   : >> { %v1094_v13 = vld [vmem:[#allocation4 + $0x1] sm:$0xff]  ;;  %v1061_v30 = vld [vmem:[%s10269_s4 + $0x78] sm:$0xff]  ;;  %v6388_v33 = vpack.c.bf16 %v1063_v28, %v1060_v25  ;;  %v1066_v35 = vld [vmem:[%s10269_s4 + $0xa0] sm:$0xff] }
 0x14a   : >> { %6342 = vmatpush3.bf16.msra.mxu1 %v6341_v46  ;;  %6316 = vmatpush1.bf16.msra.mxu0 %v6315_v47  ;;  %v1065_v31 = vld [vmem:[%s10269_s4 + $0x98] sm:$0xff]  ;;  %v1068_v32 = vld [vmem:[%s10269_s4 + $0xb0] sm:$0xff]  ;;  %v6359_v34 = vpack.c.bf16 %v1061_v30, %v1058_v29  ;;  %v1067_v40 = vld [vmem:[%s10269_s4 + $0xa8] sm:$0xff] }
 0x14b   : >> { %6343 = vmatprep.subr.bf16.mxu1 %v7383_v55  ;;  %6318 = vmatprep.subr.bf16.mxu0 %v6317_v49  ;;  %v6361_v37 = vpack.c.bf16 %v1068_v32, %v1065_v31  ;;  %v1069_v38 = vld [vmem:[%s10269_s4 + $0xb8] sm:$0xff]  ;;  %v1064_v39 = vld [vmem:[%s10269_s4 + $0x90] sm:$0xff]  ;;  %v1071_v41 = vld [vmem:[%s10269_s4 + $0xc8] sm:$0xff] }
 0x14c   : >> { %v1074_v42 = vld [vmem:[%s10269_s4 + $0xe0] sm:$0xff]  ;;  %v6391_v43 = vpack.c.bf16 %v1069_v38, %v1066_v35  ;;  %v6363_v44 = vpack.c.bf16 %v1067_v40, %v1064_v39  ;;  %v1072_v45 = vld [vmem:[%s10269_s4 + $0xd0] sm:$0xff]  ;;  %v1075_v47 = vld [vmem:[%s10269_s4 + $0xe8] sm:$0xff] }
 0x14d   : >> { %v1096_v36 = vld [vmem:[#allocation4 + $0x11] sm:$0xf]  ;;  %v6365_v46 = vpack.c.bf16 %v1074_v42, %v1071_v41  ;;  %v1070_v48 = vld [vmem:[%s10269_s4 + $0xc0] sm:$0xff]  ;;  %v1080_v51 = vld [vmem:[%s10269_s4 + $0x110] sm:$0xff]  ;;  %v6394_v52 = vpack.c.bf16 %v1075_v47, %v1072_v45 }
 0x14e   : >> { %6345 = vmatpush3.bf16.msra.mxu1 %v6344_v56  ;;  %6320 = vmatpush1.bf16.msra.mxu0 %v6319_v57  ;;  %v1073_v49 = vld [vmem:[%s10269_s4 + $0xd8] sm:$0xff]  ;;  %v1078_v54 = vld [vmem:[%s10269_s4 + $0x100] sm:$0xff]  ;;  %v1076_v58 = vld [vmem:[%s10269_s4 + $0xf0] sm:$0xff] }
 0x14f   : >> { %6346 = vmatprep.subr.bf16.mxu1 %v7383_v55  ;;  %6322 = vmatprep.subr.bf16.mxu0 %v6321_v61  ;;  %v1077_v50 = vld [vmem:[%s10269_s4 + $0xf8] sm:$0xff]  ;;  %v6367_v53 = vpack.c.bf16 %v1073_v49, %v1070_v48  ;;  %v1079_v59 = vld [vmem:[%s10269_s4 + $0x108] sm:$0xff]  ;;  %v1086_v62 = vld [vmem:[%s10269_s4 + $0x140] sm:$0xff] }
 0x150   : >> { %v6369_v56 = vpack.c.bf16 %v1080_v51, %v1077_v50  ;;  %v1081_v57 = vld [vmem:[%s10269_s4 + $0x118] sm:$0xff]  ;;  %v1083_v61 = vld [vmem:[%s10269_s4 + $0x128] sm:$0xff]  ;;  %v6371_v0 = vpack.c.bf16 %v1079_v59, %v1076_v58  ;;  %v1084_v1 = vld [vmem:[%s10269_s4 + $0x130] sm:$0xff] }
 0x151   : >> { %v6397_v63 = vpack.c.bf16 %v1081_v57, %v1078_v54  ;;  %v6373_v2 = vpack.c.bf16 %v1086_v62, %v1083_v61  ;;  %v1085_v5 = vld [vmem:[%s10269_s4 + $0x138] sm:$0xff]  ;;  %v1092_v7 = vld [vmem:[%s10269_s4 + $0x170] sm:$0xff]  ;;  %v1090_v10 = vld [vmem:[%s10269_s4 + $0x160] sm:$0xff] }
 0x152   : >> { %6348 = vmatpush3.bf16.msra.mxu1 %v6347_v3  ;;  %6324 = vmatpush1.bf16.msra.mxu0 %v6323_v4  ;;  %v1087_v3 = vld [vmem:[%s10269_s4 + $0x148] sm:$0xff]  ;;  %v1082_v4 = vld [vmem:[%s10269_s4 + $0x120] sm:$0xff]  ;;  %v1093_v12 = vld [vmem:[%s10269_s4 + $0x178] sm:$0xff] }
 0x153   : >> { %6381 = vmatprep.subr.bf16.mxu1 %v7383_v55  ;;  %6350 = vmatprep.subr.bf16.mxu0 %v6349_v6  ;;  %v1089_v6 = vld [vmem:[%s10269_s4 + $0x158] sm:$0xff]  ;;  %v6400_v8 = vpack.c.bf16 %v1087_v3, %v1084_v1  ;;  %v6375_v9 = vpack.c.bf16 %v1085_v5, %v1082_v4  ;;  %v4816_v16 = vld [vmem:[%s10269_s4 + $0x320] sm:$0xff]  ;;  %v4814_v19 = vld [vmem:[%s10269_s4 + $0x310] sm:$0xff] }
 0x154   : >> { %v6377_v11 = vpack.c.bf16 %v1092_v7, %v1089_v6  ;;  %v4817_v21 = vld [vmem:[%s10269_s4 + $0x328] sm:$0xff]  ;;  %v4812_v22 = vld [vmem:[%s10269_s4 + $0x300] sm:$0xff]  ;;  %v4822_v25 = vld [vmem:[%s10269_s4 + $0x350] sm:$0xff] }
 0x155   : >> { %5880 = vmatmul.mubr.f32.vlgmr.msra.gmra.mrb[0].mxu1 %v1094_v13  ;;  %1211 = vmatmul.mubr.f32.vlgmr.msra.gmra.mrb[0].mxu0 %v1094_v13  ;;  %v1088_v13 = vld [vmem:[%s10269_s4 + $0x150] sm:$0xff]  ;;  %v4820_v29 = vld [vmem:[%s10269_s4 + $0x340] sm:$0xff]  ;;  %v4823_v31 = vld [vmem:[%s10269_s4 + $0x358] sm:$0xff] }
 0x156   : >> { %6383 = vmatpush3.bf16.msra.mxu1 %v6382_v14  ;;  %6352 = vmatpush1.bf16.msra.mxu0 %v6351_v15  ;;  %v1091_v14 = vld [vmem:[%s10269_s4 + $0x168] sm:$0xff]  ;;  %v4818_v32 = vld [vmem:[%s10269_s4 + $0x330] sm:$0xff]  ;;  %v4828_v35 = vld [vmem:[%s10269_s4 + $0x380] sm:$0xff] }
 0x157   : >> { %6384 = vmatprep.subr.bf16.mxu1 %v7383_v55  ;;  %6354 = vmatprep.subr.bf16.mxu0 %v6353_v17  ;;  %v4813_v15 = vld [vmem:[%s10269_s4 + $0x308] sm:$0xff]  ;;  %v6403_v17 = vpack.c.bf16 %v1093_v12, %v1090_v10  ;;  %v6379_v18 = vpack.c.bf16 %v1091_v14, %v1088_v13  ;;  %v4826_v38 = vld [vmem:[%s10269_s4 + $0x370] sm:$0xff]  ;;  %v4824_v42 = vld [vmem:[%s10269_s4 + $0x360] sm:$0xff] }
 0x158   : >> { %5882 = vmatprep.mubr.msk.f32.mxu1 %vm7384_vm2, %v7385_v60  ;;  %1216 = vmatprep.mubr.f32.mxu0 %v7385_v60  ;;  %v6405_v20 = vpack.c.bf16 %v4816_v16, %v4813_v15  ;;  %v1044_v39 = vld [vmem:[#allocation4 + $0x8] sm:$0xff]  ;;  %v4829_v41 = vld [vmem:[%s10269_s4 + $0x388] sm:$0xff]  ;;  %v4832_v48 = vld [vmem:[%s10269_s4 + $0x3a0] sm:$0xff] }
 0x159   : >> { %5883 = vmatmul.mubr.f32.gmra.mrb[2].mxu1 %v1095_v26  ;;  %1217 = vmatmul.mubr.f32.gmra.mrb[2].mxu0 %v1095_v26  ;;  %v1043_v26 = vld [vmem:[#allocation4] sm:$0xff]  ;;  %v4834_v45 = vld [vmem:[%s10269_s4 + $0x3b0] sm:$0xff]  ;;  %v1045_v49 = vld [vmem:[#allocation4 + $0x10] sm:$0xf] }
 0x15a   : >> { %6386 = vmatpush3.bf16.msra.mxu1 %v6385_v23  ;;  %6356 = vmatpush1.bf16.msra.mxu0 %v6355_v24  ;;  %v4815_v23 = vld [vmem:[%s10269_s4 + $0x318] sm:$0xff]  ;;  %v4837_v54 = vld [vmem:[%s10269_s4 + $0x3c8] sm:$0xff]  ;;  %v4838_v59 = vld [vmem:[%s10269_s4 + $0x3d0] sm:$0xff] }
 0x15b   : >> { %6387 = vmatprep.subr.bf16.mxu1 %v7383_v55  ;;  %6358 = vmatprep.subr.bf16.mxu0 %v6357_v27  ;;  %v4819_v24 = vld [vmem:[%s10269_s4 + $0x338] sm:$0xff]  ;;  %v6438_v27 = vpack.c.bf16 %v4817_v21, %v4814_v19  ;;  %v6407_v28 = vpack.c.bf16 %v4815_v23, %v4812_v22  ;;  %v4841_v62 = vld [vmem:[%s10269_s4 + $0x3e8] sm:$0xff]  ;;  %v4844_v5 = vld [vmem:[%s10269_s4 + $0x400] sm:$0xff] }
 0x15c   : >> { %5885 = vmatprep.mubr.msk.f32.mxu1 %vm7384_vm2, %v7385_v60  ;;  %1222 = vmatprep.mubr.f32.mxu0 %v7385_v60  ;;  %v6409_v30 = vpack.c.bf16 %v4822_v25, %v4819_v24  ;;  %v4835_v51 = vld [vmem:[%s10269_s4 + $0x3b8] sm:$0xff]  ;;  %v6450_v3 = vpack.c.bf16 %v4841_v62, %v4838_v59  ;;  %v4849_v10 = vld [vmem:[%s10269_s4 + $0x428] sm:$0xff]  ;;  %v4850_v14 = vld [vmem:[%s10269_s4 + $0x430] sm:$0xff] }
 0x15d   : >> { %5886 = vmatmul.mubr.f32.gmra.mrb[4].mxu1 %v1096_v36  ;;  %1223 = vmatmul.mubr.f32.gmra.mrb[4].mxu0 %v1096_v36  ;;  %v6441_v36 = vpack.c.bf16 %v4823_v31, %v4820_v29  ;;  %v6447_v57 = vpack.c.bf16 %v4835_v51, %v4832_v48  ;;  %v4843_v1 = vld [vmem:[%s10269_s4 + $0x3f8] sm:$0xff]  ;;  %v4853_v16 = vld [vmem:[%s10269_s4 + $0x448] sm:$0xff]  ;;  %v4856_v23 = vld [vmem:[%s10269_s4 + $0x460] sm:$0xff] }
 0x15e   : >> { %6389 = vmatpush3.bf16.msra.mxu1 %v6388_v33  ;;  %6360 = vmatpush1.bf16.msra.mxu0 %v6359_v34  ;;  %v4821_v33 = vld [vmem:[%s10269_s4 + $0x348] sm:$0xff]  ;;  %v4847_v7 = vld [vmem:[%s10269_s4 + $0x418] sm:$0xff]  ;;  %v6456_v21 = vpack.c.bf16 %v4853_v16, %v4850_v14  ;;  %v4864_v29 = vld [vmem:[%s10269_s4 + $0x4a0] sm:$0xff] }
 0x15f   : >> { %6390 = vmatprep.subr.bf16.mxu1 %v7383_v55  ;;  %6362 = vmatprep.subr.bf16.mxu0 %v6361_v37  ;;  %v4825_v34 = vld [vmem:[%s10269_s4 + $0x368] sm:$0xff]  ;;  %v6411_v37 = vpack.c.bf16 %v4821_v33, %v4818_v32  ;;  %v6453_v12 = vpack.c.bf16 %v4847_v7, %v4844_v5  ;;  %v4855_v19 = vld [vmem:[%s10269_s4 + $0x458] sm:$0xff]  ;;  %v4862_v32 = vld [vmem:[%s10269_s4 + $0x490] sm:$0xff] }
 0x160   : >> { %5920 = vmatprep.mubr.msk.f32.mxu1 %vm7384_vm2, %v7385_v60  ;;  %1373 = vmatprep.mubr.f32.mxu0 %v7385_v60  ;;  %v6413_v40 = vpack.c.bf16 %v4828_v35, %v4825_v34  ;;  %v4859_v25 = vld [vmem:[%s10269_s4 + $0x478] sm:$0xff]  ;;  %v4865_v34 = vld [vmem:[%s10269_s4 + $0x4a8] sm:$0xff]  ;;  %v4860_v35 = vld [vmem:[%s10269_s4 + $0x480] sm:$0xff] }
 0x161   : >> { %v4876_v48 = vld [vmem:[%s10269_s4 + $0x500] sm:$0xff]  ;;  %v4882_v59 = vld [vmem:[%s10269_s4 + $0x530] sm:$0xff]  ;;  %v4885_v5 = vld [vmem:[%s10269_s4 + $0x548] sm:$0xff] }
 0x162   : >> { %6392 = vmatpush3.bf16.msra.mxu1 %v6391_v43  ;;  %6364 = vmatpush1.bf16.msra.mxu0 %v6363_v44  ;;  %v4827_v43 = vld [vmem:[%s10269_s4 + $0x378] sm:$0xff] }
 0x163   : >> { %6393 = vmatprep.subr.bf16.mxu1 %v7383_v55  ;;  %6366 = vmatprep.subr.bf16.mxu0 %v6365_v46  ;;  %v4831_v44 = vld [vmem:[%s10269_s4 + $0x398] sm:$0xff]  ;;  %v6444_v46 = vpack.c.bf16 %v4829_v41, %v4826_v38  ;;  %v6415_v47 = vpack.c.bf16 %v4827_v43, %v4824_v42  ;;  %v4870_v38 = vld [vmem:[%s10269_s4 + $0x4d0] sm:$0xff]  ;;  %v4868_v42 = vld [vmem:[%s10269_s4 + $0x4c0] sm:$0xff] }
 0x164   : >> { %v6417_v50 = vpack.c.bf16 %v4834_v45, %v4831_v44  ;;  %v4871_v43 = vld [vmem:[%s10269_s4 + $0x4d8] sm:$0xff]  ;;  %v4866_v44 = vld [vmem:[%s10269_s4 + $0x4b0] sm:$0xff]  ;;  %v4869_v45 = vld [vmem:[%s10269_s4 + $0x4c8] sm:$0xff] }
 0x165   : >> { %v6467_v51 = vpack.c.bf16 %v4869_v45, %v4866_v44  ;;  %v4891_v14 = vld [vmem:[%s10269_s4 + $0x578] sm:$0xff]  ;;  %v4910_v45 = vld [vmem:[%s10269_s4 + $0x610] sm:$0xff] }
 0x166   : >> { %6395 = vmatpush3.bf16.msra.mxu1 %v6394_v52  ;;  %6368 = vmatpush1.bf16.msra.mxu0 %v6367_v53  ;;  %v4830_v52 = vld [vmem:[%s10269_s4 + $0x390] sm:$0xff]  ;;  %v4833_v53 = vld [vmem:[%s10269_s4 + $0x3a8] sm:$0xff] }
 0x167   : >> { %6396 = vmatprep.subr.bf16.mxu1 %v7383_v55  ;;  %6370 = vmatprep.subr.bf16.mxu0 %v6369_v56  ;;  %v4840_v56 = vld [vmem:[%s10269_s4 + $0x3e0] sm:$0xff]  ;;  %v6419_v58 = vpack.c.bf16 %v4833_v53, %v4830_v52  ;;  %v4874_v52 = vld [vmem:[%s10269_s4 + $0x4f0] sm:$0xff]  ;;  %v4877_v53 = vld [vmem:[%s10269_s4 + $0x508] sm:$0xff] }
 0x168   : >> { %v6421_v61 = vpack.c.bf16 %v4840_v56, %v4837_v54  ;;  %v4872_v54 = vld [vmem:[%s10269_s4 + $0x4e0] sm:$0xff]  ;;  %v4875_v56 = vld [vmem:[%s10269_s4 + $0x4f8] sm:$0xff]  ;;  %v6500_v62 = vpack.c.bf16 %v4877_v53, %v4874_v52  ;;  %v1696_v52 = vld [vmem:[#allocation4 + $0x3] sm:$0xff] }
 0x16a   : >> { %6398 = vmatpush3.bf16.msra.mxu1 %v6397_v63  ;;  %6372 = vmatpush1.bf16.msra.mxu0 %v6371_v0  ;;  %v4836_v63 = vld [vmem:[%s10269_s4 + $0x3c0] sm:$0xff]  ;;  %v4839_v0 = vld [vmem:[%s10269_s4 + $0x3d8] sm:$0xff] }
 0x16b   : >> { %6399 = vmatprep.subr.bf16.mxu1 %v7383_v55  ;;  %6374 = vmatprep.subr.bf16.mxu0 %v6373_v2  ;;  %v4846_v2 = vld [vmem:[%s10269_s4 + $0x410] sm:$0xff]  ;;  %v6423_v4 = vpack.c.bf16 %v4839_v0, %v4836_v63  ;;  %v6471_v63 = vpack.c.bf16 %v4875_v56, %v4872_v54  ;;  %v4880_v0 = vld [vmem:[%s10269_s4 + $0x520] sm:$0xff] }
 0x16c   : >> { %v6425_v6 = vpack.c.bf16 %v4846_v2, %v4843_v1  ;;  %v4883_v2 = vld [vmem:[%s10269_s4 + $0x538] sm:$0xff]  ;;  %v4916_v56 = vld [vmem:[%s10269_s4 + $0x640] sm:$0xff] }
 0x16d   : >> { %v6503_v7 = vpack.c.bf16 %v4883_v2, %v4880_v0  ;;  %v1697_v0 = vld [vmem:[#allocation4 + $0xb] sm:$0xff] }
 0x16e   : >> { %6401 = vmatpush3.bf16.msra.mxu1 %v6400_v8  ;;  %6376 = vmatpush1.bf16.msra.mxu0 %v6375_v9  ;;  %v4842_v8 = vld [vmem:[%s10269_s4 + $0x3f0] sm:$0xff]  ;;  %v4845_v9 = vld [vmem:[%s10269_s4 + $0x408] sm:$0xff] }
 0x16f   : >> { %6402 = vmatprep.subr.bf16.mxu1 %v7383_v55  ;;  %6378 = vmatprep.subr.bf16.mxu0 %v6377_v11  ;;  %v4852_v11 = vld [vmem:[%s10269_s4 + $0x440] sm:$0xff]  ;;  %v6427_v13 = vpack.c.bf16 %v4845_v9, %v4842_v8  ;;  %v4886_v9 = vld [vmem:[%s10269_s4 + $0x550] sm:$0xff] }
 0x170   : >> { %v6429_v15 = vpack.c.bf16 %v4852_v11, %v4849_v10  ;;  %v4889_v11 = vld [vmem:[%s10269_s4 + $0x568] sm:$0xff] }
 0x171   : >> { %v6506_v16 = vpack.c.bf16 %v4889_v11, %v4886_v9  ;;  %v4930_v9 = vld [vmem:[%s10269_s4 + $0x6b0] sm:$0xff] }
 0x172   : >> { %6404 = vmatpush3.bf16.msra.mxu1 %v6403_v17  ;;  %6380 = vmatpush1.bf16.msra.mxu0 %v6379_v18  ;;  %v4848_v17 = vld [vmem:[%s10269_s4 + $0x420] sm:$0xff]  ;;  %v4851_v18 = vld [vmem:[%s10269_s4 + $0x438] sm:$0xff] }
 0x173   : >> { %6437 = vmatprep.subr.bf16.mxu1 %v7383_v55  ;;  %6406 = vmatprep.subr.bf16.mxu0 %v6405_v20  ;;  %v4858_v20 = vld [vmem:[%s10269_s4 + $0x470] sm:$0xff]  ;;  %v6431_v22 = vpack.c.bf16 %v4851_v18, %v4848_v17  ;;  %v4892_v18 = vld [vmem:[%s10269_s4 + $0x580] sm:$0xff] }
 0x174   : >> { %v6433_v24 = vpack.c.bf16 %v4858_v20, %v4855_v19  ;;  %v4895_v20 = vld [vmem:[%s10269_s4 + $0x598] sm:$0xff] }
 0x175   : >> { %5921 = vmatmul.mubr.f32.vlgmr.msra.gmra.mrb[6].mxu1 %v1043_v26  ;;  %1374 = vmatmul.mubr.f32.vlgmr.msra.gmra.mrb[0].mxu0 %v1043_v26  ;;  %v4854_v26 = vld [vmem:[%s10269_s4 + $0x450] sm:$0xff] }
 0x176   : >> { %6439 = vmatpush3.bf16.msra.mxu1 %v6438_v27  ;;  %6408 = vmatpush1.bf16.msra.mxu0 %v6407_v28  ;;  %v4857_v27 = vld [vmem:[%s10269_s4 + $0x468] sm:$0xff] }
 0x177   : >> { %6440 = vmatprep.subr.bf16.mxu1 %v7383_v55  ;;  %6410 = vmatprep.subr.bf16.mxu0 %v6409_v30  ;;  %v4861_v28 = vld [vmem:[%s10269_s4 + $0x488] sm:$0xff]  ;;  %v6459_v30 = vpack.c.bf16 %v4859_v25, %v4856_v23  ;;  %v6435_v31 = vpack.c.bf16 %v4857_v27, %v4854_v26  ;;  %v6509_v25 = vpack.c.bf16 %v4895_v20, %v4892_v18  ;;  %v4898_v27 = vld [vmem:[%s10269_s4 + $0x5b0] sm:$0xff] }
 0x178   : >> { %5923 = vmatprep.mubr.msk.f32.mxu1 %vm7384_vm2, %v7385_v60  ;;  %1379 = vmatprep.mubr.f32.mxu0 %v7385_v60  ;;  %v6461_v33 = vpack.c.bf16 %v4864_v29, %v4861_v28  ;;  %v4897_v23 = vld [vmem:[%s10269_s4 + $0x5a8] sm:$0xff] }
 0x179   : >> { %5924 = vmatmul.mubr.f32.gmra.mrb[8].mxu1 %v1044_v39  ;;  %1380 = vmatmul.mubr.f32.gmra.mrb[2].mxu0 %v1044_v39  ;;  %v1472_v39 = vld [vmem:[#allocation4 + $0x2] sm:$0xff] }
 0x17a   : >> { %6442 = vmatpush3.bf16.msra.mxu1 %v6441_v36  ;;  %6412 = vmatpush1.bf16.msra.mxu0 %v6411_v37  ;;  %v4863_v36 = vld [vmem:[%s10269_s4 + $0x498] sm:$0xff]  ;;  %v4901_v29 = vld [vmem:[%s10269_s4 + $0x5c8] sm:$0xff] }
 0x17b   : >> { %6443 = vmatprep.subr.bf16.mxu1 %v7383_v55  ;;  %6414 = vmatprep.subr.bf16.mxu0 %v6413_v40  ;;  %v4867_v37 = vld [vmem:[%s10269_s4 + $0x4b8] sm:$0xff]  ;;  %v6494_v40 = vpack.c.bf16 %v4865_v34, %v4862_v32  ;;  %v6463_v41 = vpack.c.bf16 %v4863_v36, %v4860_v35  ;;  %v6512_v34 = vpack.c.bf16 %v4901_v29, %v4898_v27  ;;  %v4904_v36 = vld [vmem:[%s10269_s4 + $0x5e0] sm:$0xff]  ;;  %v4933_v18 = vld [vmem:[%s10269_s4 + $0x6c8] sm:$0xff] }
 0x17c   : >> { %5926 = vmatprep.mubr.msk.f32.mxu1 %vm7384_vm2, %v7385_v60  ;;  %1385 = vmatprep.mubr.f32.mxu0 %v7385_v60  ;;  %v4903_v32 = vld [vmem:[%s10269_s4 + $0x5d8] sm:$0xff] }
 0x17d   : >> { %5927 = vmatmul.mubr.f32.gmra.mrb[10].mxu1 %v1045_v49  ;;  %1386 = vmatmul.mubr.f32.gmra.mrb[4].mxu0 %v1045_v49  ;;  %v1473_v49 = vld [vmem:[#allocation4 + $0xa] sm:$0xff] }
 0x17e   : >> { %6445 = vmatpush3.bf16.msra.mxu1 %v6444_v46  ;;  %6416 = vmatpush1.bf16.msra.mxu0 %v6415_v47  ;;  %v6465_v46 = vpack.c.bf16 %v4870_v38, %v4867_v37  ;;  %v4873_v47 = vld [vmem:[%s10269_s4 + $0x4e8] sm:$0xff]  ;;  %v4907_v38 = vld [vmem:[%s10269_s4 + $0x5f8] sm:$0xff] }
 0x17f   : >> { %6446 = vmatprep.subr.bf16.mxu1 %v7383_v55  ;;  %6418 = vmatprep.subr.bf16.mxu0 %v6417_v50  ;;  %v6497_v50 = vpack.c.bf16 %v4871_v43, %v4868_v42  ;;  %v4912_v42 = vld [vmem:[%s10269_s4 + $0x620] sm:$0xff]  ;;  %v6515_v43 = vpack.c.bf16 %v4907_v38, %v4904_v36  ;;  %v4939_v27 = vld [vmem:[%s10269_s4 + $0x6f8] sm:$0xff]  ;;  %v4945_v36 = vld [vmem:[%s10269_s4 + $0x728] sm:$0xff] }
 0x180   : >> { %5961 = vmatprep.mubr.msk.f32.mxu1 %vm7384_vm2, %v7385_v60  ;;  %1588 = vmatprep.mubr.f32.mxu0 %v7385_v60 }
 0x182   : >> { %6448 = vmatpush3.bf16.msra.mxu1 %v6447_v57  ;;  %6420 = vmatpush1.bf16.msra.mxu0 %v6419_v58  ;;  %v6469_v57 = vpack.c.bf16 %v4876_v48, %v4873_v47  ;;  %v4879_v58 = vld [vmem:[%s10269_s4 + $0x518] sm:$0xff]  ;;  %v4913_v47 = vld [vmem:[%s10269_s4 + $0x628] sm:$0xff]  ;;  %v4908_v48 = vld [vmem:[%s10269_s4 + $0x600] sm:$0xff] }
 0x183   : >> { %6449 = vmatprep.subr.bf16.mxu1 %v7383_v55  ;;  %6422 = vmatprep.subr.bf16.mxu0 %v6421_v61  ;;  %v1474_v61 = vld [vmem:[#allocation4 + $0x12] sm:$0xf]  ;;  %v6473_v1 = vpack.c.bf16 %v4882_v59, %v4879_v58  ;;  %v6550_v53 = vpack.c.bf16 %v4913_v47, %v4910_v45  ;;  %v4914_v58 = vld [vmem:[%s10269_s4 + $0x630] sm:$0xff]  ;;  %v4917_v59 = vld [vmem:[%s10269_s4 + $0x648] sm:$0xff] }
 0x184   : >> { %v6523_v2 = vpack.c.bf16 %v4917_v59, %v4914_v58  ;;  %v4951_v45 = vld [vmem:[%s10269_s4 + $0x758] sm:$0xff] }
 0x185   : >> { %v7295_v58 = vld [vmem:[#allocation4 + $0xc] sm:$0xff]  ;;  %v1922_v59 = vld [vmem:[#allocation4 + $0x14] sm:$0xf] }
 0x186   : >> { %6451 = vmatpush3.bf16.msra.mxu1 %v6450_v3  ;;  %6424 = vmatpush1.bf16.msra.mxu0 %v6423_v4  ;;  %v4878_v3 = vld [vmem:[%s10269_s4 + $0x510] sm:$0xff]  ;;  %v4881_v4 = vld [vmem:[%s10269_s4 + $0x528] sm:$0xff] }
 0x187   : >> { %6452 = vmatprep.subr.bf16.mxu1 %v7383_v55  ;;  %6426 = vmatprep.subr.bf16.mxu0 %v6425_v6  ;;  %v4888_v6 = vld [vmem:[%s10269_s4 + $0x560] sm:$0xff]  ;;  %v6475_v8 = vpack.c.bf16 %v4881_v4, %v4878_v3  ;;  %v4922_v3 = vld [vmem:[%s10269_s4 + $0x670] sm:$0xff]  ;;  %v4925_v4 = vld [vmem:[%s10269_s4 + $0x688] sm:$0xff] }
 0x188   : >> { %v6477_v10 = vpack.c.bf16 %v4888_v6, %v4885_v5  ;;  %v4920_v5 = vld [vmem:[%s10269_s4 + $0x660] sm:$0xff]  ;;  %v4923_v6 = vld [vmem:[%s10269_s4 + $0x678] sm:$0xff]  ;;  %v6556_v11 = vpack.c.bf16 %v4925_v4, %v4922_v3  ;;  %v4966_v3 = vld [vmem:[%s10251_s6 + $0x410] sm:$0xff] }
 0x18a   : >> { %6454 = vmatpush3.bf16.msra.mxu1 %v6453_v12  ;;  %6428 = vmatpush1.bf16.msra.mxu0 %v6427_v13  ;;  %v4884_v12 = vld [vmem:[%s10269_s4 + $0x540] sm:$0xff]  ;;  %v4887_v13 = vld [vmem:[%s10269_s4 + $0x558] sm:$0xff] }
 0x18b   : >> { %6455 = vmatprep.subr.bf16.mxu1 %v7383_v55  ;;  %6430 = vmatprep.subr.bf16.mxu0 %v6429_v15  ;;  %v4894_v15 = vld [vmem:[%s10269_s4 + $0x590] sm:$0xff]  ;;  %v6479_v17 = vpack.c.bf16 %v4887_v13, %v4884_v12  ;;  %v6527_v12 = vpack.c.bf16 %v4923_v6, %v4920_v5  ;;  %v4928_v13 = vld [vmem:[%s10269_s4 + $0x6a0] sm:$0xff] }
 0x18c   : >> { %v6481_v19 = vpack.c.bf16 %v4894_v15, %v4891_v14  ;;  %v4931_v15 = vld [vmem:[%s10269_s4 + $0x6b8] sm:$0xff]  ;;  %v4962_v6 = vld [vmem:[%s10251_s6 + $0x3f0] sm:$0xff] }
 0x18d   : >> { %v6559_v20 = vpack.c.bf16 %v4931_v15, %v4928_v13  ;;  %v4971_v13 = vld [vmem:[%s10251_s6 + $0x438] sm:$0xff] }
 0x18e   : >> { %6457 = vmatpush3.bf16.msra.mxu1 %v6456_v21  ;;  %6432 = vmatpush1.bf16.msra.mxu0 %v6431_v22  ;;  %v4890_v21 = vld [vmem:[%s10269_s4 + $0x570] sm:$0xff]  ;;  %v4893_v22 = vld [vmem:[%s10269_s4 + $0x588] sm:$0xff]  ;;  %v4975_v15 = vld [vmem:[%s10251_s6 + $0x458] sm:$0xff] }
 0x18f   : >> { %6458 = vmatprep.subr.bf16.mxu1 %v7383_v55  ;;  %6434 = vmatprep.subr.bf16.mxu0 %v6433_v24  ;;  %v4900_v24 = vld [vmem:[%s10269_s4 + $0x5c0] sm:$0xff]  ;;  %v6483_v26 = vpack.c.bf16 %v4893_v22, %v4890_v21  ;;  %v4934_v22 = vld [vmem:[%s10269_s4 + $0x6d0] sm:$0xff] }
 0x190   : >> { %v6485_v28 = vpack.c.bf16 %v4900_v24, %v4897_v23  ;;  %v4937_v24 = vld [vmem:[%s10269_s4 + $0x6e8] sm:$0xff] }
 0x191   : >> { %v6562_v29 = vpack.c.bf16 %v4937_v24, %v4934_v22  ;;  %v4984_v22 = vld [vmem:[%s10251_s6 + $0x4a0] sm:$0xff] }
 0x192   : >> { %6460 = vmatpush3.bf16.msra.mxu1 %v6459_v30  ;;  %6436 = vmatpush1.bf16.msra.mxu0 %v6435_v31  ;;  %v4896_v30 = vld [vmem:[%s10269_s4 + $0x5a0] sm:$0xff]  ;;  %v4899_v31 = vld [vmem:[%s10269_s4 + $0x5b8] sm:$0xff] }
 0x193   : >> { %6493 = vmatprep.subr.bf16.mxu1 %v7383_v55  ;;  %6462 = vmatprep.subr.bf16.mxu0 %v6461_v33  ;;  %v4906_v33 = vld [vmem:[%s10269_s4 + $0x5f0] sm:$0xff]  ;;  %v6487_v35 = vpack.c.bf16 %v4899_v31, %v4896_v30  ;;  %v4940_v31 = vld [vmem:[%s10269_s4 + $0x700] sm:$0xff] }
 0x194   : >> { %v6489_v37 = vpack.c.bf16 %v4906_v33, %v4903_v32  ;;  %v4943_v33 = vld [vmem:[%s10269_s4 + $0x718] sm:$0xff]  ;;  %v4980_v24 = vld [vmem:[%s10251_s6 + $0x480] sm:$0xff] }
 0x195   : >> { %5962 = vmatmul.mubr.f32.vlgmr.msra.gmra.mrb[12].mxu1 %v1472_v39  ;;  %1589 = vmatmul.mubr.f32.vlgmr.msra.gmra.mrb[0].mxu0 %v1472_v39  ;;  %v4902_v39 = vld [vmem:[%s10269_s4 + $0x5d0] sm:$0xff]  ;;  %v6565_v38 = vpack.c.bf16 %v4943_v33, %v4940_v31  ;;  %v4989_v31 = vld [vmem:[%s10251_s6 + $0x4c8] sm:$0xff] }
 0x196   : >> { %6495 = vmatpush3.bf16.msra.mxu1 %v6494_v40  ;;  %6464 = vmatpush1.bf16.msra.mxu0 %v6463_v41  ;;  %v4905_v40 = vld [vmem:[%s10269_s4 + $0x5e8] sm:$0xff] }
 0x197   : >> { %5964 = vmatprep.mubr.msk.f32.mxu1 %vm7384_vm2, %v7385_v60  ;;  %6496 = vmatprep.subr.bf16.mxu1 %v7383_v55  ;;  %v4909_v41 = vld [vmem:[%s10269_s4 + $0x608] sm:$0xff]  ;;  %v6491_v44 = vpack.c.bf16 %v4905_v40, %v4902_v39  ;;  %v4946_v40 = vld [vmem:[%s10269_s4 + $0x730] sm:$0xff] }
 0x198   : >> { %6466 = vmatprep.subr.bf16.mxu0 %v6465_v46  ;;  %1594 = vmatprep.mubr.f32.mxu0 %v7385_v60  ;;  %v6517_v46 = vpack.c.bf16 %v4912_v42, %v4909_v41  ;;  %v4949_v42 = vld [vmem:[%s10269_s4 + $0x748] sm:$0xff] }
 0x199   : >> { %5965 = vmatmul.mubr.f32.gmra.mrb[14].mxu1 %v1473_v49  ;;  %1595 = vmatmul.mubr.f32.gmra.mrb[2].mxu0 %v1473_v49  ;;  %v4911_v49 = vld [vmem:[%s10269_s4 + $0x618] sm:$0xff]  ;;  %v6568_v47 = vpack.c.bf16 %v4949_v42, %v4946_v40  ;;  %v4993_v33 = vld [vmem:[%s10251_s6 + $0x4e8] sm:$0xff]  ;;  %v5002_v40 = vld [vmem:[%s10251_s6 + $0x530] sm:$0xff] }
 0x19a   : >> { %6498 = vmatpush3.bf16.msra.mxu1 %v6497_v50  ;;  %6468 = vmatpush1.bf16.msra.mxu0 %v6467_v51  ;;  %v4915_v50 = vld [vmem:[%s10269_s4 + $0x638] sm:$0xff]  ;;  %v4918_v51 = vld [vmem:[%s10269_s4 + $0x650] sm:$0xff]  ;;  %v6519_v54 = vpack.c.bf16 %v4911_v49, %v4908_v48  ;;  %v4952_v49 = vld [vmem:[%s10269_s4 + $0x760] sm:$0xff] }
 0x19b   : >> { %5967 = vmatprep.mubr.msk.f32.mxu1 %vm7384_vm2, %v7385_v60  ;;  %6499 = vmatprep.subr.bf16.mxu1 %v7383_v55 }
 0x19c   : >> { %6470 = vmatprep.subr.bf16.mxu0 %v6469_v57  ;;  %1600 = vmatprep.mubr.f32.mxu0 %v7385_v60  ;;  %v4919_v57 = vld [vmem:[%s10269_s4 + $0x658] sm:$0xff] }
 0x19d   : >> { %5968 = vmatmul.mubr.f32.gmra.mrb[16].mxu1 %v1474_v61  ;;  %1601 = vmatmul.mubr.f32.gmra.mrb[4].mxu0 %v1474_v61  ;;  %v6521_v61 = vpack.c.bf16 %v4918_v51, %v4915_v50  ;;  %v4955_v51 = vld [vmem:[%s10269_s4 + $0x778] sm:$0xff] }
 0x19e   : >> { %6501 = vmatpush3.bf16.msra.mxu1 %v6500_v62  ;;  %6472 = vmatpush1.bf16.msra.mxu0 %v6471_v63  ;;  %v4921_v62 = vld [vmem:[%s10269_s4 + $0x668] sm:$0xff]  ;;  %v4924_v63 = vld [vmem:[%s10269_s4 + $0x680] sm:$0xff] }
 0x19f   : >> { %6502 = vmatprep.subr.bf16.mxu1 %v7383_v55  ;;  %6474 = vmatprep.subr.bf16.mxu0 %v6473_v1  ;;  %v6553_v1 = vpack.c.bf16 %v4919_v57, %v4916_v56  ;;  %v7294_v57 = vld [vmem:[#allocation4 + $0x4] sm:$0xff] }
 0x1a0   : >> { %6002 = vmatprep.mubr.msk.f32.mxu1 %vm7384_vm2, %v7385_v60  ;;  %1812 = vmatprep.mubr.f32.mxu0 %v7385_v60 }
 0x1a2   : >> { %6504 = vmatpush3.bf16.msra.mxu1 %v6503_v7  ;;  %6476 = vmatpush1.bf16.msra.mxu0 %v6475_v8  ;;  %v6525_v7 = vpack.c.bf16 %v4924_v63, %v4921_v62  ;;  %v4927_v8 = vld [vmem:[%s10269_s4 + $0x698] sm:$0xff]  ;;  %v4960_v62 = vld [vmem:[%s10251_s6 + $0x3e0] sm:$0xff] }
 0x1a3   : >> { %6505 = vmatprep.subr.bf16.mxu1 %v7383_v55  ;;  %6478 = vmatprep.subr.bf16.mxu0 %v6477_v10  ;;  %v1698_v10 = vld [vmem:[#allocation4 + $0x13] sm:$0xf]  ;;  %v6529_v14 = vpack.c.bf16 %v4930_v9, %v4927_v8  ;;  %v4956_v63 = vld [vmem:[%s10251_s6 + $0x3c0] sm:$0xff]  ;;  %v4969_v8 = vld [vmem:[%s10251_s6 + $0x428] sm:$0xff] }
 0x1a4   : >> { %v4972_v9 = vld [vmem:[%s10251_s6 + $0x440] sm:$0xff] }
 0x1a6   : >> { %6507 = vmatpush3.bf16.msra.mxu1 %v6506_v16  ;;  %6480 = vmatpush1.bf16.msra.mxu0 %v6479_v17  ;;  %v4926_v16 = vld [vmem:[%s10269_s4 + $0x690] sm:$0xff]  ;;  %v4929_v17 = vld [vmem:[%s10269_s4 + $0x6a8] sm:$0xff] }
 0x1a7   : >> { %6508 = vmatprep.subr.bf16.mxu1 %v7383_v55  ;;  %6482 = vmatprep.subr.bf16.mxu0 %v6481_v19  ;;  %v4936_v19 = vld [vmem:[%s10269_s4 + $0x6e0] sm:$0xff]  ;;  %v6531_v21 = vpack.c.bf16 %v4929_v17, %v4926_v16  ;;  %v4978_v16 = vld [vmem:[%s10251_s6 + $0x470] sm:$0xff] }
 0x1a8   : >> { %v6533_v23 = vpack.c.bf16 %v4936_v19, %v4933_v18  ;;  %v6585_v17 = vpack.c.bf16 %v4978_v16, %v4975_v15  ;;  %v4974_v18 = vld [vmem:[%s10251_s6 + $0x450] sm:$0xff]  ;;  %v4977_v19 = vld [vmem:[%s10251_s6 + $0x468] sm:$0xff]  ;;  %v5016_v16 = vld [vmem:[%s10251_s6 + $0x5a0] sm:$0xff] }
 0x1aa   : >> { %6510 = vmatpush3.bf16.msra.mxu1 %v6509_v25  ;;  %6484 = vmatpush1.bf16.msra.mxu0 %v6483_v26  ;;  %v4932_v25 = vld [vmem:[%s10269_s4 + $0x6c0] sm:$0xff]  ;;  %v4935_v26 = vld [vmem:[%s10269_s4 + $0x6d8] sm:$0xff] }
 0x1ab   : >> { %6511 = vmatprep.subr.bf16.mxu1 %v7383_v55  ;;  %6486 = vmatprep.subr.bf16.mxu0 %v6485_v28  ;;  %v4942_v28 = vld [vmem:[%s10269_s4 + $0x710] sm:$0xff]  ;;  %v6535_v30 = vpack.c.bf16 %v4935_v26, %v4932_v25  ;;  %v4983_v25 = vld [vmem:[%s10251_s6 + $0x498] sm:$0xff] }
 0x1ac   : >> { %v6537_v32 = vpack.c.bf16 %v4942_v28, %v4939_v27  ;;  %v6591_v26 = vpack.c.bf16 %v4983_v25, %v4980_v24  ;;  %v4987_v27 = vld [vmem:[%s10251_s6 + $0x4b8] sm:$0xff]  ;;  %v4990_v28 = vld [vmem:[%s10251_s6 + $0x4d0] sm:$0xff]  ;;  %v5025_v25 = vld [vmem:[%s10251_s6 + $0x5e8] sm:$0xff] }
 0x1ad   : >> { %v5022_v24 = vld [vmem:[%s10251_s6 + $0x5d0] sm:$0xff] }
 0x1ae   : >> { %6513 = vmatpush3.bf16.msra.mxu1 %v6512_v34  ;;  %6488 = vmatpush1.bf16.msra.mxu0 %v6487_v35  ;;  %v4938_v34 = vld [vmem:[%s10269_s4 + $0x6f0] sm:$0xff]  ;;  %v4941_v35 = vld [vmem:[%s10269_s4 + $0x708] sm:$0xff] }
 0x1af   : >> { %6514 = vmatprep.subr.bf16.mxu1 %v7383_v55  ;;  %6490 = vmatprep.subr.bf16.mxu0 %v6489_v37  ;;  %v4948_v37 = vld [vmem:[%s10269_s4 + $0x740] sm:$0xff]  ;;  %v6539_v39 = vpack.c.bf16 %v4941_v35, %v4938_v34 }
 0x1b0   : >> { %v6541_v41 = vpack.c.bf16 %v4948_v37, %v4945_v36  ;;  %v4996_v34 = vld [vmem:[%s10251_s6 + $0x500] sm:$0xff]  ;;  %v4995_v37 = vld [vmem:[%s10251_s6 + $0x4f8] sm:$0xff] }
 0x1b1   : >> { %v6597_v35 = vpack.c.bf16 %v4996_v34, %v4993_v33  ;;  %v4992_v36 = vld [vmem:[%s10251_s6 + $0x4e0] sm:$0xff] }
 0x1b2   : >> { %6516 = vmatpush3.bf16.msra.mxu1 %v6515_v43  ;;  %6492 = vmatpush1.bf16.msra.mxu0 %v6491_v44  ;;  %v4944_v43 = vld [vmem:[%s10269_s4 + $0x720] sm:$0xff]  ;;  %v4947_v44 = vld [vmem:[%s10269_s4 + $0x738] sm:$0xff] }
 0x1b3   : >> { %6549 = vmatprep.subr.bf16.mxu1 %v7383_v55  ;;  %6518 = vmatprep.subr.bf16.mxu0 %v6517_v46  ;;  %v4954_v46 = vld [vmem:[%s10269_s4 + $0x770] sm:$0xff]  ;;  %v6543_v48 = vpack.c.bf16 %v4947_v44, %v4944_v43  ;;  %v5001_v43 = vld [vmem:[%s10251_s6 + $0x528] sm:$0xff] }
 0x1b4   : >> { %v6545_v50 = vpack.c.bf16 %v4954_v46, %v4951_v45  ;;  %v5005_v44 = vld [vmem:[%s10251_s6 + $0x548] sm:$0xff]  ;;  %v5008_v45 = vld [vmem:[%s10251_s6 + $0x560] sm:$0xff] }
 0x1b5   : >> { %6003 = vmatmul.mubr.f32.vlgmr.msra.gmra.mrb[18].mxu1 %v1696_v52  ;;  %1813 = vmatmul.mubr.f32.vlgmr.msra.gmra.mrb[0].mxu0 %v1696_v52  ;;  %v4950_v52 = vld [vmem:[%s10269_s4 + $0x750] sm:$0xff] }
 0x1b6   : >> { %6551 = vmatpush3.bf16.msra.mxu1 %v6550_v53  ;;  %6520 = vmatpush1.bf16.msra.mxu0 %v6519_v54  ;;  %v4953_v53 = vld [vmem:[%s10269_s4 + $0x768] sm:$0xff]  ;;  %v6571_v54 = vpack.c.bf16 %v4955_v51, %v4952_v49  ;;  %v5004_v49 = vld [vmem:[%s10251_s6 + $0x540] sm:$0xff] }
 0x1b7   : >> { %6005 = vmatprep.mubr.msk.f32.mxu1 %vm7384_vm2, %v7385_v60  ;;  %6552 = vmatprep.subr.bf16.mxu1 %v7383_v55  ;;  %v6547_v56 = vpack.c.bf16 %v4953_v53, %v4950_v52  ;;  %v5007_v52 = vld [vmem:[%s10251_s6 + $0x558] sm:$0xff]  ;;  %v4958_v53 = vld [vmem:[%s10251_s6 + $0x3d0] sm:$0xff] }
 0x1b8   : >> { %6522 = vmatprep.subr.bf16.mxu0 %v6521_v61  ;;  %1818 = vmatprep.mubr.f32.mxu0 %v7385_v60  ;;  %v4957_v61 = vld [vmem:[%s10251_s6 + $0x3c8] sm:$0xff] }
 0x1b9   : >> { %6006 = vmatmul.mubr.f32.gmra.mrb[20].mxu1 %v1697_v0  ;;  %1819 = vmatmul.mubr.f32.gmra.mrb[2].mxu0 %v1697_v0  ;;  %v6573_v0 = vpack.c.bf16 %v4960_v62, %v4957_v61  ;;  %v5015_v61 = vld [vmem:[%s10251_s6 + $0x598] sm:$0xff]  ;;  %v6607_v62 = vpack.c.bf16 %v5007_v52, %v5004_v49  ;;  %v5037_v52 = vld [vmem:[%s10251_s6 + $0x648] sm:$0xff] }
 0x1ba   : >> { %6554 = vmatpush3.bf16.msra.mxu1 %v6553_v1  ;;  %6524 = vmatpush1.bf16.msra.mxu0 %v6523_v2  ;;  %v4959_v1 = vld [vmem:[%s10251_s6 + $0x3d8] sm:$0xff] }
 0x1bb   : >> { %6008 = vmatprep.mubr.msk.f32.mxu1 %vm7384_vm2, %v7385_v60  ;;  %6555 = vmatprep.subr.bf16.mxu1 %v7383_v55  ;;  %v4963_v2 = vld [vmem:[%s10251_s6 + $0x3f8] sm:$0xff]  ;;  %v6575_v4 = vpack.c.bf16 %v4959_v1, %v4956_v63  ;;  %v4964_v1 = vld [vmem:[%s10251_s6 + $0x400] sm:$0xff] }
 0x1bc   : >> { %6526 = vmatprep.subr.bf16.mxu0 %v6525_v7  ;;  %1824 = vmatprep.mubr.f32.mxu0 %v7385_v60  ;;  %v6577_v5 = vpack.c.bf16 %v4966_v3, %v4963_v2  ;;  %v4965_v7 = vld [vmem:[%s10251_s6 + $0x408] sm:$0xff]  ;;  %v4967_v2 = vld [vmem:[%s10251_s6 + $0x418] sm:$0xff] }
 0x1bd   : >> { %6009 = vmatmul.mubr.f32.gmra.mrb[22].mxu1 %v1698_v10  ;;  %1825 = vmatmul.mubr.f32.gmra.mrb[4].mxu0 %v1698_v10  ;;  %v6579_v10 = vpack.c.bf16 %v4965_v7, %v4962_v6  ;;  %v5018_v6 = vld [vmem:[%s10251_s6 + $0x5b0] sm:$0xff]  ;;  %v5021_v7 = vld [vmem:[%s10251_s6 + $0x5c8] sm:$0xff] }
 0x1be   : >> { %6557 = vmatpush3.bf16.msra.mxu1 %v6556_v11  ;;  %6528 = vmatpush1.bf16.msra.mxu0 %v6527_v12  ;;  %v6581_v11 = vpack.c.bf16 %v4972_v9, %v4969_v8  ;;  %v4968_v12 = vld [vmem:[%s10251_s6 + $0x420] sm:$0xff]  ;;  %v5017_v8 = vld [vmem:[%s10251_s6 + $0x5a8] sm:$0xff] }
 0x1bf   : >> { %6558 = vmatprep.subr.bf16.mxu1 %v7383_v55  ;;  %6530 = vmatprep.subr.bf16.mxu0 %v6529_v14  ;;  %v6583_v14 = vpack.c.bf16 %v4971_v13, %v4968_v12  ;;  %v5020_v9 = vld [vmem:[%s10251_s6 + $0x5c0] sm:$0xff]  ;;  %v4973_v12 = vld [vmem:[%s10251_s6 + $0x448] sm:$0xff] }
 0x1c0   : >> { %6043 = vmatprep.mubr.msk.f32.mxu1 %vm7384_vm2, %v7385_v60  ;;  %2036 = vmatprep.mubr.f32.mxu0 %v7385_v60  ;;  %v6613_v15 = vpack.c.bf16 %v5020_v9, %v5017_v8  ;;  %v4994_v8 = vld [vmem:[%s10251_s6 + $0x4f0] sm:$0xff]  ;;  %v4997_v9 = vld [vmem:[%s10251_s6 + $0x508] sm:$0xff] }
 0x1c2   : >> { %6560 = vmatpush3.bf16.msra.mxu1 %v6559_v20  ;;  %6532 = vmatpush1.bf16.msra.mxu0 %v6531_v21  ;;  %v6587_v20 = vpack.c.bf16 %v4977_v19, %v4974_v18  ;;  %v4981_v21 = vld [vmem:[%s10251_s6 + $0x488] sm:$0xff]  ;;  %v5023_v19 = vld [vmem:[%s10251_s6 + $0x5d8] sm:$0xff] }
 0x1c3   : >> { %6561 = vmatprep.subr.bf16.mxu1 %v7383_v55  ;;  %6534 = vmatprep.subr.bf16.mxu0 %v6533_v23  ;;  %v6589_v23 = vpack.c.bf16 %v4984_v22, %v4981_v21  ;;  %v5024_v21 = vld [vmem:[%s10251_s6 + $0x5e0] sm:$0xff] }
 0x1c6   : >> { %6563 = vmatpush3.bf16.msra.mxu1 %v6562_v29  ;;  %6536 = vmatpush1.bf16.msra.mxu0 %v6535_v30  ;;  %v6593_v29 = vpack.c.bf16 %v4990_v28, %v4987_v27  ;;  %v4986_v30 = vld [vmem:[%s10251_s6 + $0x4b0] sm:$0xff]  ;;  %v6619_v27 = vpack.c.bf16 %v5025_v25, %v5022_v24  ;;  %v4976_v28 = vld [vmem:[%s10251_s6 + $0x460] sm:$0xff] }
 0x1c7   : >> { %6564 = vmatprep.subr.bf16.mxu1 %v7383_v55  ;;  %6538 = vmatprep.subr.bf16.mxu0 %v6537_v32  ;;  %v6595_v32 = vpack.c.bf16 %v4989_v31, %v4986_v30  ;;  %v5029_v31 = vld [vmem:[%s10251_s6 + $0x608] sm:$0xff]  ;;  %v5056_v24 = vld [vmem:[%s10251_s6 + $0x6e0] sm:$0xff] }
 0x1ca   : >> { %6566 = vmatpush3.bf16.msra.mxu1 %v6565_v38  ;;  %6540 = vmatpush1.bf16.msra.mxu0 %v6539_v39  ;;  %v6599_v38 = vpack.c.bf16 %v4995_v37, %v4992_v36  ;;  %v4999_v39 = vld [vmem:[%s10251_s6 + $0x518] sm:$0xff]  ;;  %v5033_v36 = vld [vmem:[%s10251_s6 + $0x628] sm:$0xff]  ;;  %v5028_v37 = vld [vmem:[%s10251_s6 + $0x600] sm:$0xff] }
 0x1cb   : >> { %6567 = vmatprep.subr.bf16.mxu1 %v7383_v55  ;;  %6542 = vmatprep.subr.bf16.mxu0 %v6541_v41  ;;  %v4998_v41 = vld [vmem:[%s10251_s6 + $0x510] sm:$0xff]  ;;  %v6601_v42 = vpack.c.bf16 %v5002_v40, %v4999_v39  ;;  %v5031_v40 = vld [vmem:[%s10251_s6 + $0x618] sm:$0xff] }
 0x1cc   : >> { %v6603_v46 = vpack.c.bf16 %v5001_v43, %v4998_v41  ;;  %v4982_v41 = vld [vmem:[%s10251_s6 + $0x490] sm:$0xff]  ;;  %v6623_v43 = vpack.c.bf16 %v5031_v40, %v5028_v37 }
 0x1ce   : >> { %6569 = vmatpush3.bf16.msra.mxu1 %v6568_v47  ;;  %6544 = vmatpush1.bf16.msra.mxu0 %v6543_v48  ;;  %v5006_v47 = vld [vmem:[%s10251_s6 + $0x550] sm:$0xff]  ;;  %v5009_v48 = vld [vmem:[%s10251_s6 + $0x568] sm:$0xff] }
 0x1cf   : >> { %6570 = vmatprep.subr.bf16.mxu1 %v7383_v55  ;;  %6546 = vmatprep.subr.bf16.mxu0 %v6545_v50  ;;  %v6605_v50 = vpack.c.bf16 %v5008_v45, %v5005_v44  ;;  %v6653_v51 = vpack.c.bf16 %v5009_v48, %v5006_v47  ;;  %v5035_v45 = vld [vmem:[%s10251_s6 + $0x638] sm:$0xff]  ;;  %v5036_v47 = vld [vmem:[%s10251_s6 + $0x640] sm:$0xff] }
 0x1d2   : >> { %6572 = vmatpush3.bf16.msra.mxu1 %v6571_v54  ;;  %6548 = vmatpush1.bf16.msra.mxu0 %v6547_v56  ;;  %v4961_v54 = vld [vmem:[%s10251_s6 + $0x3e8] sm:$0xff] }
 0x1d3   : >> { %6574 = vmatprep.subr.bf16.mxu0 %v6573_v0  ;;  %v6655_v56 = vpack.c.bf16 %v4961_v54, %v4958_v53  ;;  %6654 = vmatprep.subr.bf16.mxu1 %v6653_v51  ;;  %v5010_v0 = vld [vmem:[%s10251_s6 + $0x570] sm:$0xff] }
 0x1d4   : >> { %v5034_v51 = vld [vmem:[%s10251_s6 + $0x630] sm:$0xff] }
 0x1d5   : >> { %6044 = vmatmul.mubr.f32.vlgmr.msra.gmra.mrb[24].mxu1 %v7294_v57  ;;  %2037 = vmatmul.mubr.f32.vlgmr.msra.gmra.mrb[0].mxu0 %v7294_v57  ;;  %v5011_v57 = vld [vmem:[%s10251_s6 + $0x578] sm:$0xff] }
 0x1d6   : >> { %6046 = vmatprep.mubr.msk.f32.mxu1 %vm7384_vm2, %v7385_v60  ;;  %2042 = vmatprep.mubr.f32.mxu0 %v7385_v60 }
 0x1d7   : >> { %6576 = vmatpush1.bf16.msra.mxu0 %v6575_v4  ;;  %6656 = vmatpush3.bf16.msra.mxu1 %v6655_v56  ;;  %v5013_v4 = vld [vmem:[%s10251_s6 + $0x588] sm:$0xff]  ;;  %v6627_v56 = vpack.c.bf16 %v5037_v52, %v5034_v51 }
 0x1d8   : >> { %6578 = vmatprep.subr.bf16.mxu0 %v6577_v5  ;;  %v6659_v5 = vpack.c.bf16 %v4967_v2, %v4964_v1  ;;  %v6611_v13 = vpack.c.bf16 %v5013_v4, %v5010_v0  ;;  %v5045_v2 = vld [vmem:[%s10251_s6 + $0x688] sm:$0xff]  ;;  %v5043_v4 = vld [vmem:[%s10251_s6 + $0x678] sm:$0xff] }
 0x1d9   : >> { %6047 = vmatmul.mubr.f32.gmra.mrb[26].mxu1 %v7295_v58  ;;  %2043 = vmatmul.mubr.f32.gmra.mrb[2].mxu0 %v7295_v58  ;;  %v5014_v58 = vld [vmem:[%s10251_s6 + $0x590] sm:$0xff] }
 0x1da   : >> { %6049 = vmatprep.mubr.msk.f32.mxu1 %vm7384_vm2, %v7385_v60  ;;  %2048 = vmatprep.mubr.f32.mxu0 %v7385_v60  ;;  %v6609_v3 = vpack.c.bf16 %v5014_v58, %v5011_v57  ;;  %v4988_v57 = vld [vmem:[%s10251_s6 + $0x4c0] sm:$0xff]  ;;  %v4991_v58 = vld [vmem:[%s10251_s6 + $0x4d8] sm:$0xff] }
 0x1db   : >> { %6580 = vmatpush1.bf16.msra.mxu0 %v6579_v10  ;;  %v6661_v10 = vpack.c.bf16 %v5021_v7, %v5018_v6 }
 0x1dc   : >> { %6582 = vmatprep.subr.bf16.mxu0 %v6581_v11  ;;  %v4970_v11 = vld [vmem:[%s10251_s6 + $0x430] sm:$0xff] }
 0x1dd   : >> { %6050 = vmatmul.mubr.f32.gmra.mrb[28].mxu1 %v1922_v59  ;;  %2049 = vmatmul.mubr.f32.gmra.mrb[4].mxu0 %v1922_v59  ;;  %v5012_v59 = vld [vmem:[%s10251_s6 + $0x580] sm:$0xff] }
 0x1de   : >> { %v6657_v63 = vpack.c.bf16 %v5015_v61, %v5012_v59  ;;  %v6675_v59 = vpack.c.bf16 %v4991_v58, %v4988_v57  ;;  %v5041_v61 = vld [vmem:[%s10251_s6 + $0x668] sm:$0xff]  ;;  %v2144_v57 = vld [vmem:[%s10250_s5] sm:$0x7] }
 0x1df   : >> { %6584 = vmatpush1.bf16.msra.mxu0 %v6583_v14  ;;  %v6663_v14 = vpack.c.bf16 %v4973_v12, %v4970_v11  ;;  %v5047_v11 = vld [vmem:[%s10251_s6 + $0x698] sm:$0xff]  ;;  %v5050_v12 = vld [vmem:[%s10251_s6 + $0x6b0] sm:$0xff] }
 0x1e0   : >> { %6586 = vmatprep.subr.bf16.mxu0 %v6585_v17  ;;  %6658 = vmatprep.subr.bf16.mxu1 %v6657_v63  ;;  %v5019_v17 = vld [vmem:[%s10251_s6 + $0x5b8] sm:$0xff]  ;;  %v5042_v63 = vld [vmem:[%s10251_s6 + $0x670] sm:$0xff] }
 0x1e1   : >> { %6660 = vmatpush3.bf16.msra.mxu1 %v6659_v5  ;;  %v6615_v18 = vpack.c.bf16 %v5019_v17, %v5016_v16  ;;  %v6677_v6 = vpack.c.bf16 %v5045_v2, %v5042_v63  ;;  %v5046_v16 = vld [vmem:[%s10251_s6 + $0x690] sm:$0xff]  ;;  %v5049_v17 = vld [vmem:[%s10251_s6 + $0x6a8] sm:$0xff] }
 0x1e2   : >> { %6662 = vmatprep.subr.bf16.mxu1 %v6661_v10  ;;  %v6679_v10 = vpack.c.bf16 %v4997_v9, %v4994_v8 }
 0x1e3   : >> { %6588 = vmatpush1.bf16.msra.mxu0 %v6587_v20  ;;  %v5026_v20 = vld [vmem:[%s10251_s6 + $0x5f0] sm:$0xff] }
 0x1e4   : >> { %6590 = vmatprep.subr.bf16.mxu0 %v6589_v23  ;;  %v6617_v22 = vpack.c.bf16 %v5026_v20, %v5023_v19  ;;  %v5027_v23 = vld [vmem:[%s10251_s6 + $0x5f8] sm:$0xff]  ;;  %v6635_v19 = vpack.c.bf16 %v5049_v17, %v5046_v16  ;;  %v5000_v20 = vld [vmem:[%s10251_s6 + $0x520] sm:$0xff] }
 0x1e5   : >> { %6664 = vmatpush3.bf16.msra.mxu1 %v6663_v14  ;;  %v6633_v14 = vpack.c.bf16 %v5050_v12, %v5047_v11 }
 0x1e7   : >> { %6592 = vmatpush1.bf16.msra.mxu0 %v6591_v26  ;;  %v6665_v26 = vpack.c.bf16 %v5027_v23, %v5024_v21  ;;  %v5003_v21 = vld [vmem:[%s10251_s6 + $0x538] sm:$0xff]  ;;  %v5053_v23 = vld [vmem:[%s10251_s6 + $0x6c8] sm:$0xff] }
 0x1e8   : >> { %6594 = vmatprep.subr.bf16.mxu0 %v6593_v29  ;;  %v4979_v29 = vld [vmem:[%s10251_s6 + $0x478] sm:$0xff]  ;;  %v6637_v25 = vpack.c.bf16 %v5056_v24, %v5053_v23 }
 0x1e9   : >> { %v6667_v30 = vpack.c.bf16 %v4979_v29, %v4976_v28  ;;  %6666 = vmatprep.subr.bf16.mxu1 %v6665_v26 }
 0x1eb   : >> { %6596 = vmatpush1.bf16.msra.mxu0 %v6595_v32  ;;  %v5032_v32 = vld [vmem:[%s10251_s6 + $0x620] sm:$0xff]  ;;  %6668 = vmatpush3.bf16.msra.mxu1 %v6667_v30 }
 0x1ec   : >> { %6598 = vmatprep.subr.bf16.mxu0 %v6597_v35  ;;  %v6621_v34 = vpack.c.bf16 %v5032_v32, %v5029_v31  ;;  %v5030_v35 = vld [vmem:[%s10251_s6 + $0x610] sm:$0xff] }
 0x1ed   : >> { %v6669_v39 = vpack.c.bf16 %v5033_v36, %v5030_v35 }
 0x1ef   : >> { %6600 = vmatpush1.bf16.msra.mxu0 %v6599_v38  ;;  %6670 = vmatprep.subr.bf16.mxu1 %v6669_v39 }
 0x1f0   : >> { %6602 = vmatprep.subr.bf16.mxu0 %v6601_v42  ;;  %v4985_v42 = vld [vmem:[%s10251_s6 + $0x4a8] sm:$0xff] }
 0x1f1   : >> { %v6671_v44 = vpack.c.bf16 %v4985_v42, %v4982_v41 }
 0x1f3   : >> { %6604 = vmatpush1.bf16.msra.mxu0 %v6603_v46  ;;  %v5038_v46 = vld [vmem:[%s10251_s6 + $0x650] sm:$0xff]  ;;  %6672 = vmatpush3.bf16.msra.mxu1 %v6671_v44 }
 0x1f4   : >> { %6606 = vmatprep.subr.bf16.mxu0 %v6605_v50  ;;  %v6625_v49 = vpack.c.bf16 %v5038_v46, %v5035_v45  ;;  %v5039_v50 = vld [vmem:[%s10251_s6 + $0x658] sm:$0xff] }
 0x1f5   : >> { %v6673_v54 = vpack.c.bf16 %v5039_v50, %v5036_v47 }
 0x1f7   : >> { %6608 = vmatpush1.bf16.msra.mxu0 %v6607_v62  ;;  %6674 = vmatprep.subr.bf16.mxu1 %v6673_v54  ;;  %v5044_v62 = vld [vmem:[%s10251_s6 + $0x680] sm:$0xff] }
 0x1f8   : >> { %6610 = vmatprep.subr.bf16.mxu0 %v6609_v3  ;;  %6676 = vmatpush3.bf16.msra.mxu1 %v6675_v59  ;;  %v6629_v1 = vpack.c.bf16 %v5044_v62, %v5041_v61  ;;  %v5040_v3 = vld [vmem:[%s10251_s6 + $0x660] sm:$0xff] }
 0x1f9   : >> { %v6631_v7 = vpack.c.bf16 %v5043_v4, %v5040_v3  ;;  %6678 = vmatprep.subr.bf16.mxu1 %v6677_v6 }
 0x1fb   : >> { %6612 = vmatpush1.bf16.msra.mxu0 %v6611_v13  ;;  %v5048_v13 = vld [vmem:[%s10251_s6 + $0x6a0] sm:$0xff] }
 0x1fc   : >> { %6614 = vmatprep.subr.bf16.mxu0 %v6613_v15  ;;  %6680 = vmatpush3.bf16.msra.mxu1 %v6679_v10  ;;  %v5051_v15 = vld [vmem:[%s10251_s6 + $0x6b8] sm:$0xff] }
 0x1ff   : >> { %6616 = vmatpush1.bf16.msra.mxu0 %v6615_v18  ;;  %v6681_v18 = vpack.c.bf16 %v5051_v15, %v5048_v13 }
 0x200   : >> { %6618 = vmatprep.subr.bf16.mxu0 %v6617_v22  ;;  %v6683_v22 = vpack.c.bf16 %v5003_v21, %v5000_v20 }
 0x201   : >> { %6682 = vmatprep.subr.bf16.mxu1 %v6681_v18 }
 0x202   : >> { %6684 = vmatpush3.bf16.msra.mxu1 %v6683_v22 }
 0x203   : >> { %6620 = vmatpush1.bf16.msra.mxu0 %v6619_v27  ;;  %6685 = vmatprep.subr.bf16.mxu1 %v7383_v55 }
 0x204   : >> { %6622 = vmatprep.subr.bf16.mxu0 %v6621_v34 }
 0x207   : >> { %6624 = vmatpush1.bf16.msra.mxu0 %v6623_v43 }
 0x208   : >> { %6626 = vmatprep.subr.bf16.mxu0 %v6625_v49 }
 0x20b   : >> { %6628 = vmatpush1.bf16.msra.mxu0 %v6627_v56 }
 0x20c   : >> { %6630 = vmatprep.subr.bf16.mxu0 %v6629_v1 }
 0x20f   : >> { %6632 = vmatpush1.bf16.msra.mxu0 %v6631_v7 }
 0x210   : >> { %6634 = vmatprep.subr.bf16.mxu0 %v6633_v14 }
 0x213   : >> { %6636 = vmatpush1.bf16.msra.mxu0 %v6635_v19 }
 0x214   : >> { %6638 = vmatprep.subr.bf16.mxu0 %v6637_v25 }
 0x228   : >> { %v8591_v33 = vpop.f32.mrb[0].mxu1 }
 0x229   : >> { %v5881_v38 = vpop.f32.mrb[1].mxu1 }
 0x22c   : >> { %v1300_v48 = vpop.f32.mrb[2].mxu1 }
 0x22d   : >> { %v5884_v53 = vpop.f32.mrb[3].mxu1 }
 0x22e   : >> { %v2146_v53 = vlaneseq }
 0x230   : >> { %v1305_v0 = vpop.f32.mrb[4].mxu1  ;;  %v8691_v54 = vshrl.u32 %v2146_v53, 7 }
 0x231   : >> { %v5887_v5 = vpop.f32.mrb[5].mxu1 }
 0x232   : >> { %v2148_v56 = vsub.s32 0, %v8691_v54  ;;  %v2152_v58 = vsub.s32 1, %v8691_v54  ;;  %v2156_v59 = vsub.s32 2, %v8691_v54 }
 0x234   : >> { %v2149_v61 = vrot.slane %v2144_v57, %v2148_v56  ;;  %v2153_v62 = vrot.slane %v2144_v57, %v2152_v58  ;;  %v2157_v63 = vrot.slane %v2144_v57, %v2156_v59  ;;  %v5065_v57 = vld [vmem:[%s10251_s6 + $0x728] sm:$0xff] }
 0x248   : >> { %v1458_v26 = vpop.f32.mrb[6].mxu1 }
 0x249   : >> { %v1459_v27 = vadd.f32 %v1458_v26, %v8591_v33  ;;  %v5922_v28 = vpop.f32.mrb[7].mxu1 }
 0x24c   : >> { %v1463_v29 = vpop.f32.mrb[8].mxu1 }
 0x24d   : >> { %v1464_v30 = vadd.f32 %v1463_v29, %v1300_v48  ;;  %v5925_v31 = vpop.f32.mrb[9].mxu1 }
 0x24e   : >> { %v5052_v31 = vld [vmem:[%s10251_s6 + $0x6c0] sm:$0xff] }
 0x250   : >> { %v1468_v32 = vpop.f32.mrb[10].mxu1 }
 0x251   : >> { %v1469_v34 = vadd.f32 %v1468_v32, %v1305_v0  ;;  %v5928_v35 = vpop.f32.mrb[11].mxu1  ;;  %v5055_v32 = vld [vmem:[%s10251_s6 + $0x6d8] sm:$0xff] }
 0x268   : >> { %v1673_v36 = vpop.f32.mrb[12].mxu1 }
 0x269   : >> { %v1689_v37 = vadd.f32 %v1673_v36, %v1459_v27  ;;  %v5963_v38 = vpop.f32.mrb[13].mxu1  ;;  %v5054_v36 = vld [vmem:[%s10251_s6 + $0x6d0] sm:$0xff] }
 0x26c   : >> { %v1678_v39 = vpop.f32.mrb[14].mxu1 }
 0x26d   : >> { %v1692_v40 = vadd.f32 %v1678_v39, %v1464_v30  ;;  %v5966_v41 = vpop.f32.mrb[15].mxu1 }
 0x26e   : >> { %v5059_v41 = vld [vmem:[%s10251_s6 + $0x6f8] sm:$0xff] }
 0x270   : >> { %v1683_v42 = vpop.f32.mrb[16].mxu1 }
 0x271   : >> { %v1695_v43 = vadd.f32 %v1683_v42, %v1469_v34  ;;  %v5969_v44 = vpop.f32.mrb[17].mxu1  ;;  %v5062_v42 = vld [vmem:[%s10251_s6 + $0x710] sm:$0xff] }
 0x288   : >> { %v1897_v45 = vpop.f32.mrb[18].mxu1 }
 0x289   : >> { %v1913_v46 = vadd.f32 %v1897_v45, %v1689_v37  ;;  %v6004_v47 = vpop.f32.mrb[19].mxu1  ;;  %v5057_v37 = vld [vmem:[%s10251_s6 + $0x6e8] sm:$0xff] }
 0x28a   : >> { %v6686_v47 = vpack.c.bf16 %v5057_v37, %v5054_v36  ;;  %v2201_v37 = vld [vmem:[%s10251_s6 + $0x10] sm:$0xff] }
 0x28c   : >> { %v1902_v33 = vpop.f32.mrb[20].mxu1 }
 0x28d   : >> { %v1916_v49 = vadd.f32 %v1902_v33, %v1692_v40  ;;  %v6007_v50 = vpop.f32.mrb[21].mxu1  ;;  %v5058_v33 = vld [vmem:[%s10251_s6 + $0x6f0] sm:$0xff] }
 0x28e   : >> { %v6641_v50 = vpack.c.bf16 %v5062_v42, %v5059_v41  ;;  %v2209_v41 = vld [vmem:[%s10251_s6 + $0x50] sm:$0xff] }
 0x290   : >> { %v1907_v48 = vpop.f32.mrb[22].mxu1 }
 0x291   : >> { %v1919_v51 = vadd.f32 %v1907_v48, %v1695_v43  ;;  %v6010_v52 = vpop.f32.mrb[23].mxu1  ;;  %v5061_v48 = vld [vmem:[%s10251_s6 + $0x708] sm:$0xff] }
 0x292   : >> { %v5063_v52 = vld [vmem:[%s10251_s6 + $0x718] sm:$0xff] }
 0x2a8   : >> { %v2121_v0 = vpop.f32.mrb[24].mxu1  ;;  %v2038_v1 = vpop.f32.mrb[0].mxu0 }
 0x2a9   : >> { %v2137_v2 = vadd.f32 %v2121_v0, %v1913_v46  ;;  %v2161_v3 = vadd.f32 %v2149_v61, %v2038_v1  ;;  %v2040_v4 = vpop.f32.mrb[1].mxu0  ;;  %v6045_v5 = vpop.f32.mrb[25].mxu1  ;;  %v6639_v46 = vpack.c.bf16 %v5055_v32, %v5052_v31  ;;  %v2199_v31 = vld [vmem:[%s10251_s6] sm:$0xff]  ;;  %v2202_v32 = vld [vmem:[%s10251_s6 + $0x18] sm:$0xff] }
 0x2aa   : >> { %v2162_v6 = vadd.f32 %v2153_v62, %v2040_v4 }
 0x2ab   : >> { %v2163_v7 = vadd.f32 %v2157_v63, %v2137_v2  ;;  %v8705_v8 = vmax.f32 %v2161_v3, 0.0  ;;  %v5064_v2 = vld [vmem:[%s10251_s6 + $0x720] sm:$0xff]  ;;  %v5067_v3 = vld [vmem:[%s10251_s6 + $0x738] sm:$0xff] }
 0x2ac   : >> { %v8707_v9 = vmax.f32 %v2162_v6, 0.0  ;;  %v2126_v10 = vpop.f32.mrb[26].mxu1  ;;  %v2044_v11 = vpop.f32.mrb[2].mxu0  ;;  %v5066_v6 = vld [vmem:[%s10251_s6 + $0x730] sm:$0xff] }
 0x2ad   : >> { %v2172_v12 = vmax.f32 %v2163_v7, 0.0  ;;  %2179 = vst [vmem:[#allocation5] sm:$0xff] %v8705_v8  ;;  %v2140_v13 = vadd.f32 %v2126_v10, %v1916_v49  ;;  %v2164_v14 = vadd.f32 %v2149_v61, %v2044_v11  ;;  %v2046_v15 = vpop.f32.mrb[3].mxu0  ;;  %v6048_v16 = vpop.f32.mrb[27].mxu1  ;;  %v5069_v7 = vld [vmem:[%s10251_s6 + $0x748] sm:$0xff]  ;;  %v5071_v11 = vld [vmem:[%s10251_s6 + $0x758] sm:$0xff] }
 0x2ae   : >> { %2180 = vst [vmem:[#allocation5 + $0x8] sm:$0xff] %v8707_v9  ;;  %v2165_v17 = vadd.f32 %v2153_v62, %v2046_v15  ;;  %v6692_v15 = vpack.c.bf16 %v5069_v7, %v5066_v6  ;;  %v5070_v16 = vld [vmem:[%s10251_s6 + $0x750] sm:$0xff] }
 0x2af   : >> { %2182 = vst.msk [vmem:[#allocation5 + $0x10] sm:$0xff] %vm2181_vm3, %v2172_v12  ;;  %v2166_v18 = vadd.f32 %v2157_v63, %v2140_v13  ;;  %v8712_v19 = vmax.f32 %v2164_v14, 0.0  ;;  %v5074_v12 = vld [vmem:[%s10251_s6 + $0x770] sm:$0xff]  ;;  %v6647_v14 = vpack.c.bf16 %v5067_v3, %v5064_v2  ;;  %v2211_v3 = vld [vmem:[%s10251_s6 + $0x60] sm:$0xff] }
 0x2b0   : >> { %v8714_v20 = vmax.f32 %v2165_v17, 0.0  ;;  %v2131_v21 = vpop.f32.mrb[28].mxu1  ;;  %v2050_v22 = vpop.f32.mrb[4].mxu0  ;;  %v5073_v17 = vld [vmem:[%s10251_s6 + $0x768] sm:$0xff] }
 0x2b1   : >> { %v2175_v23 = vmax.f32 %v2166_v18, 0.0  ;;  %v2143_v24 = vadd.f32 %v2131_v21, %v1919_v51  ;;  %v2167_v25 = vadd.f32 %v2149_v61, %v2050_v22  ;;  %v2052_v26 = vpop.f32.mrb[5].mxu0  ;;  %v6051_v27 = vpop.f32.mrb[29].mxu1  ;;  %v2457_v45 = vrot.slane %v8712_v19, 1  ;;  %v5060_v51 = vld [vmem:[%s10251_s6 + $0x700] sm:$0xff] }
 0x2b2   : >> { %v2168_v28 = vadd.f32 %v2153_v62, %v2052_v26  ;;  %v2460_v44 = vrot.slane %v8714_v20, 1  ;;  %v5068_v61 = vld [vmem:[%s10251_s6 + $0x740] sm:$0xff]  ;;  %v6643_v62 = vpack.c.bf16 %v5061_v48, %v5058_v33  ;;  %v6649_v21 = vpack.c.bf16 %v5074_v12, %v5071_v11  ;;  %v2249_v26 = vld [vmem:[%s10251_s6 + $0x190] sm:$0xff]  ;;  %v2252_v27 = vld [vmem:[%s10251_s6 + $0x1a8] sm:$0xff] }
 0x2b3   : >> { %2185 = vst.msk [vmem:[#allocation5 + $0x28] sm:$0xff] %vm2181_vm3, %v2175_v23  ;;  %v2169_v29 = vadd.f32 %v2157_v63, %v2143_v24  ;;  %v2176_v30 = vmax.f32 %v2167_v25, 0.0  ;;  %v6689_v63 = vpack.c.bf16 %v5063_v52, %v5060_v51  ;;  %v6645_v1 = vpack.c.bf16 %v5068_v61, %v5065_v57  ;;  %v5072_v22 = vld [vmem:[%s10251_s6 + $0x760] sm:$0xff]  ;;  %v5075_v23 = vld [vmem:[%s10251_s6 + $0x778] sm:$0xff]  ;;  %v2200_v24 = vld [vmem:[%s10251_s6 + $0x8] sm:$0xff] }
 0x2b4   : >> { %v2177_v34 = vmax.f32 %v2168_v28, 0.0  ;;  %v2319_v35 = vld [vmem:[#allocation5] sm:$0xfe]  ;;  %v6777_v36 = vpack.c.bf16 %v2252_v27, %v2249_v26  ;;  %v2205_v33 = vld [vmem:[%s10251_s6 + $0x30] sm:$0xff]  ;;  %v2210_v48 = vld [vmem:[%s10251_s6 + $0x58] sm:$0xff] }
 0x2b5   : >> { %v2178_v38 = vmax.f32 %v2169_v29, 0.0  ;;  %2186 = vst [vmem:[#allocation5 + $0x30] sm:$0xf] %v2176_v30  ;;  %v2320_v39 = vld [vmem:[#allocation5 + $0x8] sm:$0xfe]  ;;  %v2456_v40 = vrot.slane %v2319_v35, 1  ;;  %v6651_v29 = vpack.c.bf16 %v5073_v17, %v5070_v16  ;;  %v6695_v30 = vpack.c.bf16 %v5075_v23, %v5072_v22 }
 0x2b6   : >> { %2187 = vst [vmem:[#allocation5 + $0x38] sm:$0xf] %v2177_v34  ;;  %v2459_v43 = vrot.slane %v2320_v39, 1  ;;  %v2203_v25 = vld [vmem:[%s10251_s6 + $0x20] sm:$0xff]  ;;  %v2321_v34 = vld [vmem:[#allocation5 + $0x10] sm:$0xfe] }
 0x2b7   : >> { %2189 = vst.msk [vmem:[#allocation5 + $0x40] sm:$0xf] %vm2188_vm4, %v2178_v38  ;;  %v2458_v53 = vsel %vm2455_vm5, %v2456_v40, %v2457_v45  ;;  %v6697_v35 = vpack.c.bf16 %v2203_v25, %v2200_v24  ;;  %v2204_v38 = vld [vmem:[%s10251_s6 + $0x28] sm:$0xff]  ;;  %v2206_v40 = vld [vmem:[%s10251_s6 + $0x38] sm:$0xff]  ;;  %v2219_v22 = vld [vmem:[%s10251_s6 + $0xa0] sm:$0xff] }
 0x2b8   : >> { %v2461_v49 = vsel %vm2455_vm5, %v2459_v43, %v2460_v44  ;;  %v2255_v43 = vld [vmem:[%s10251_s6 + $0x1c0] sm:$0xff]  ;;  %v2212_v61 = vld [vmem:[%s10251_s6 + $0x68] sm:$0xff]  ;;  %v2218_v12 = vld [vmem:[%s10251_s6 + $0x98] sm:$0xff] }
 0x2b9   : >> { %2547 = vmatprep.mubr.f32.mxu0 %v2461_v49  ;;  %2713 = vmatprep.mubr.f32.mxu1 %v2461_v49  ;;  %v2208_v49 = vld [vmem:[%s10251_s6 + $0x48] sm:$0xff]  ;;  %v2222_v25 = vld [vmem:[%s10251_s6 + $0xb8] sm:$0xff]  ;;  %v2227_v27 = vld [vmem:[%s10251_s6 + $0xe0] sm:$0xff] }
 0x2ba   : >> { %2548 = vmatmul.mubr.f32.vlgmr.msra.gmra.mrb[6].mxu0 %v2458_v53  ;;  %2714 = vmatmul.mubr.f32.vlgmr.msra.gmra.mrb[30].mxu1 %v2458_v53  ;;  %v8804_v28 = vld [vmem:[#allocation5 + $0x28] sm:$0xff]  ;;  %v6701_v53 = vpack.c.bf16 %v2209_v41, %v2206_v40  ;;  %v2233_v40 = vld [vmem:[%s10251_s6 + $0x110] sm:$0xff]  ;;  %v2279_v41 = vld [vmem:[%s10251_s6 + $0x280] sm:$0xff] }
 0x2bb   : >> { %6640 = vmatpush1.bf16.msra.mxu0 %v6639_v46  ;;  %6687 = vmatpush3.bf16.msra.mxu1 %v6686_v47  ;;  %v2463_v39 = vrot.slane %v8804_v28, 1  ;;  %v6699_v46 = vpack.c.bf16 %v2202_v32, %v2199_v31  ;;  %v6779_v47 = vpack.c.bf16 %v2204_v38, %v2201_v37  ;;  %v2216_v11 = vld [vmem:[%s10251_s6 + $0x88] sm:$0xff]  ;;  %v6791_v32 = vpack.c.bf16 %v2222_v25, %v2219_v22  ;;  %v2225_v37 = vld [vmem:[%s10251_s6 + $0xd0] sm:$0xff]  ;;  %v2247_v25 = vld [vmem:[%s10251_s6 + $0x180] sm:$0xff] }
 0x2bc   : >> { %6642 = vmatprep.subr.bf16.mxu0 %v6641_v50  ;;  %6688 = vmatprep.subr.bf16.mxu1 %v7383_v55  ;;  %v2322_v0 = vld [vmem:[#allocation5 + $0x30] sm:$0x7]  ;;  %v2207_v50 = vld [vmem:[%s10251_s6 + $0x40] sm:$0xff]  ;;  %v2224_v26 = vld [vmem:[%s10251_s6 + $0xc8] sm:$0xff] }
 0x2bd   : >> { %v2323_v4 = vld [vmem:[#allocation5 + $0x38] sm:$0x7]  ;;  %v2465_v5 = vrot.slane %v2322_v0, 1  ;;  %v2264_v0 = vld [vmem:[%s10251_s6 + $0x208] sm:$0xff]  ;;  %v6783_v2 = vpack.c.bf16 %v2210_v48, %v2207_v50 }
 0x2be   : >> { %v2467_v10 = vrot.slane %v2323_v4, 1  ;;  %v2324_v42 = vld [vmem:[#allocation5 + $0x40] sm:$0x7]  ;;  %v2214_v4 = vld [vmem:[%s10251_s6 + $0x78] sm:$0xff]  ;;  %v2236_v48 = vld [vmem:[%s10251_s6 + $0x128] sm:$0xff] }
 0x2bf   : >> { %6644 = vmatpush1.bf16.msra.mxu0 %v6643_v62  ;;  %6690 = vmatpush3.bf16.msra.mxu1 %v6689_v63  ;;  %v2466_v18 = vsel %vm2455_vm5, %v2457_v45, %v2465_v5  ;;  %v2462_v45 = vrot.slane %v2321_v34, 1  ;;  %v2469_v52 = vrot.slane %v2324_v42, 1  ;;  %v2215_v62 = vld [vmem:[%s10251_s6 + $0x80] sm:$0xff]  ;;  %v2261_v63 = vld [vmem:[%s10251_s6 + $0x1f0] sm:$0xff]  ;;  %v6707_v16 = vpack.c.bf16 %v2214_v4, %v2211_v3  ;;  %v2282_v42 = vld [vmem:[%s10251_s6 + $0x298] sm:$0xff] }
 0x2c0   : >> { %v2468_v13 = vsel %vm2455_vm5, %v2460_v44, %v2467_v10  ;;  %6646 = vmatprep.subr.bf16.mxu0 %v6645_v1  ;;  %6691 = vmatprep.subr.bf16.mxu1 %v7383_v55  ;;  %v2258_v44 = vld [vmem:[%s10251_s6 + $0x1d8] sm:$0xff]  ;;  %v6703_v1 = vpack.c.bf16 %v2208_v49, %v2205_v33  ;;  %v6705_v6 = vpack.c.bf16 %v2215_v62, %v2212_v61  ;;  %v2231_v33 = vld [vmem:[%s10251_s6 + $0x100] sm:$0xff]  ;;  %v2240_v3 = vld [vmem:[%s10251_s6 + $0x148] sm:$0xff] }
 0x2c1   : >> { %2553 = vmatprep.mubr.f32.mxu0 %v2468_v13  ;;  %2718 = vmatprep.mubr.f32.mxu1 %v2468_v13  ;;  %v2464_v51 = vsel %vm2455_vm5, %v2462_v45, %v2463_v39  ;;  %v6781_v57 = vpack.c.bf16 %v2258_v44, %v2255_v43  ;;  %v6785_v7 = vpack.c.bf16 %v2264_v0, %v2261_v63  ;;  %v2221_v13 = vld [vmem:[%s10251_s6 + $0xb0] sm:$0xff]  ;;  %v2234_v50 = vld [vmem:[%s10251_s6 + $0x118] sm:$0xff]  ;;  %v2235_v63 = vld [vmem:[%s10251_s6 + $0x120] sm:$0xff] }
 0x2c2   : >> { %2554 = vmatmul.mubr.f32.gmra.mrb[8].mxu0 %v2466_v18  ;;  %2719 = vmatmul.mubr.f32.gmra.mrb[32].mxu1 %v2466_v18  ;;  %v2217_v18 = vld [vmem:[%s10251_s6 + $0x90] sm:$0xff]  ;;  %v6709_v23 = vpack.c.bf16 %v2221_v13, %v2218_v12  ;;  %v6713_v34 = vpack.c.bf16 %v2227_v27, %v2224_v26  ;;  %v6797_v49 = vpack.c.bf16 %v2282_v42, %v2279_v41  ;;  %v2238_v0 = vld [vmem:[%s10251_s6 + $0x138] sm:$0xff] }
 0x2c3   : >> { %2559 = vmatprep.mubr.f32.mxu0 %v2467_v10  ;;  %2723 = vmatprep.mubr.f32.mxu1 %v2467_v10  ;;  %v2213_v10 = vld [vmem:[%s10251_s6 + $0x70] sm:$0xff]  ;;  %v6799_v61 = vpack.c.bf16 %v2234_v50, %v2231_v33  ;;  %v2242_v4 = vld [vmem:[%s10251_s6 + $0x158] sm:$0xff] }
 0x2c4   : >> { %6648 = vmatpush1.bf16.msra.mxu0 %v6647_v14  ;;  %6693 = vmatpush3.bf16.msra.mxu1 %v6692_v15  ;;  %v2267_v14 = vld [vmem:[%s10251_s6 + $0x220] sm:$0xff]  ;;  %v2270_v15 = vld [vmem:[%s10251_s6 + $0x238] sm:$0xff]  ;;  %v6787_v17 = vpack.c.bf16 %v2216_v11, %v2213_v10  ;;  %v6723_v10 = vpack.c.bf16 %v2238_v0, %v2235_v63  ;;  %v2241_v13 = vld [vmem:[%s10251_s6 + $0x150] sm:$0xff] }
 0x2c5   : >> { %6650 = vmatprep.subr.bf16.mxu0 %v6649_v21  ;;  %6694 = vmatprep.subr.bf16.mxu1 %v7383_v55  ;;  %v2220_v21 = vld [vmem:[%s10251_s6 + $0xa8] sm:$0xff]  ;;  %v6789_v24 = vpack.c.bf16 %v2270_v15, %v2267_v14  ;;  %v2243_v15 = vld [vmem:[%s10251_s6 + $0x160] sm:$0xff]  ;;  %v2250_v26 = vld [vmem:[%s10251_s6 + $0x198] sm:$0xff] }
 0x2c6   : >> { %2560 = vmatmul.mubr.f32.gmra.mrb[10].mxu0 %v2465_v5  ;;  %2724 = vmatmul.mubr.f32.gmra.mrb[34].mxu1 %v2465_v5  ;;  %v2470_v5 = vsel %vm2455_vm5, %v2463_v39, %v2469_v52  ;;  %v6711_v31 = vpack.c.bf16 %v2220_v21, %v2217_v18  ;;  %v2230_v39 = vld [vmem:[%s10251_s6 + $0xf8] sm:$0xff]  ;;  %v2244_v14 = vld [vmem:[%s10251_s6 + $0x168] sm:$0xff]  ;;  %v2251_v21 = vld [vmem:[%s10251_s6 + $0x1a0] sm:$0xff] }
 0x2c7   : >> { %2630 = vmatprep.mubr.f32.mxu0 %v7385_v60  ;;  %6068 = vmatprep.mubr.msk.f32.mxu1 %vm7384_vm2, %v7385_v60  ;;  %v6717_v45 = vpack.c.bf16 %v2233_v40, %v2230_v39  ;;  %v2248_v18 = vld [vmem:[%s10251_s6 + $0x188] sm:$0xff]  ;;  %v6727_v22 = vpack.c.bf16 %v2244_v14, %v2241_v13  ;;  %v2297_v27 = vld [vmem:[%s10251_s6 + $0x310] sm:$0xff]  ;;  %v2263_v40 = vld [vmem:[%s10251_s6 + $0x200] sm:$0xff] }
 0x2c8   : >> { %6652 = vmatpush1.bf16.msra.mxu0 %v6651_v29  ;;  %6696 = vmatpush3.bf16.msra.mxu1 %v6695_v30  ;;  %v2273_v29 = vld [vmem:[%s10251_s6 + $0x250] sm:$0xff]  ;;  %v2276_v30 = vld [vmem:[%s10251_s6 + $0x268] sm:$0xff]  ;;  %v2266_v33 = vld [vmem:[%s10251_s6 + $0x218] sm:$0xff] }
 0x2c9   : >> { %6698 = vmatprep.subr.bf16.mxu0 %v6697_v35  ;;  %6778 = vmatprep.subr.bf16.mxu1 %v6777_v36  ;;  %v2223_v35 = vld [vmem:[%s10251_s6 + $0xc0] sm:$0xff]  ;;  %v2226_v36 = vld [vmem:[%s10251_s6 + $0xd8] sm:$0xff]  ;;  %v6793_v38 = vpack.c.bf16 %v2276_v30, %v2273_v29  ;;  %v2300_v29 = vld [vmem:[%s10251_s6 + $0x328] sm:$0xff] }
 0x2ca   : >> { %v6715_v43 = vpack.c.bf16 %v2226_v36, %v2223_v35  ;;  %v2254_v30 = vld [vmem:[%s10251_s6 + $0x1b8] sm:$0xff]  ;;  %v2253_v35 = vld [vmem:[%s10251_s6 + $0x1b0] sm:$0xff]  ;;  %v2256_v36 = vld [vmem:[%s10251_s6 + $0x1c8] sm:$0xff] }
 0x2cb   : >> { %5076 = vmatmul.mubr.msk.f32.vlgmr.msra.gmra.mrb[6].mxu0 %vm2181_vm3, %v2464_v51  ;;  %6069 = vmatmul.mubr.msk.f32.vlgmr.msra.gmra.mrb[36].mxu1 %vm2181_vm3, %v2464_v51  ;;  %v2239_v51 = vld [vmem:[%s10251_s6 + $0x140] sm:$0xff]  ;;  %v2260_v39 = vld [vmem:[%s10251_s6 + $0x1e8] sm:$0xff]  ;;  %v6735_v41 = vpack.c.bf16 %v2256_v36, %v2253_v35  ;;  %v9072_v50 = vld [vmem:[#allocation5 + $0x38] sm:$0x3] }
 0x2cc   : >> { %6700 = vmatpush1.bf16.msra.mxu0 %v6699_v46  ;;  %6780 = vmatpush3.bf16.msra.mxu1 %v6779_v47  ;;  %v2229_v46 = vld [vmem:[%s10251_s6 + $0xf0] sm:$0xff]  ;;  %v2232_v47 = vld [vmem:[%s10251_s6 + $0x108] sm:$0xff]  ;;  %v6721_v62 = vpack.c.bf16 %v2239_v51, %v2236_v48  ;;  %v2275_v0 = vld [vmem:[%s10251_s6 + $0x260] sm:$0xff] }
 0x2cd   : >> { %2636 = vmatprep.mubr.f32.mxu0 %v7385_v60  ;;  %6071 = vmatprep.mubr.msk.f32.mxu1 %vm7384_vm2, %v7385_v60  ;;  %v2272_v63 = vld [vmem:[%s10251_s6 + $0x248] sm:$0xff]  ;;  %v2278_v14 = vld [vmem:[%s10251_s6 + $0x278] sm:$0xff] }
 0x2ce   : >> { %6702 = vmatprep.subr.bf16.mxu0 %v6701_v53  ;;  %6782 = vmatprep.subr.bf16.mxu1 %v6781_v57  ;;  %v2288_v53 = vld [vmem:[%s10251_s6 + $0x2c8] sm:$0xff]  ;;  %v6719_v57 = vpack.c.bf16 %v2232_v47, %v2229_v46  ;;  %v6737_v46 = vpack.c.bf16 %v2263_v40, %v2260_v39 }
 0x2cf   : >> { %5077 = vmatmul.mubr.msk.f32.gmra.mrb[8].mxu0 %vm2181_vm3, %v2470_v5  ;;  %6072 = vmatmul.mubr.msk.f32.gmra.mrb[38].mxu1 %vm2181_vm3, %v2470_v5  ;;  %v2245_v5 = vld [vmem:[%s10251_s6 + $0x170] sm:$0xff]  ;;  %v2312_v47 = vld [vmem:[%s10251_s6 + $0x388] sm:$0xff] }
 0x2d0   : >> { %6704 = vmatpush1.bf16.msra.mxu0 %v6703_v1  ;;  %6784 = vmatpush3.bf16.msra.mxu1 %v6783_v2  ;;  %v2237_v1 = vld [vmem:[%s10251_s6 + $0x130] sm:$0xff]  ;;  %v6725_v12 = vpack.c.bf16 %v2245_v5, %v2242_v4  ;;  %v5093_v13 = vld [vmem:[%s10251_s6 + $0x7a8] sm:$0xff] }
 0x2d1   : >> { %2642 = vmatprep.mubr.f32.mxu0 %v7385_v60  ;;  %6074 = vmatprep.mubr.msk.f32.mxu1 %vm7384_vm2, %v7385_v60  ;;  %v6803_v11 = vpack.c.bf16 %v2240_v3, %v2237_v1  ;;  %v9094_v1 = vld [vmem:[#allocation5 + $0x30] sm:$0x3]  ;;  %v5141_v3 = vld [vmem:[%s10251_s6 + $0x928] sm:$0xff] }
 0x2d2   : >> { %6706 = vmatprep.subr.bf16.mxu0 %v6705_v6  ;;  %6786 = vmatprep.subr.bf16.mxu1 %v6785_v7  ;;  %v2291_v6 = vld [vmem:[%s10251_s6 + $0x2e0] sm:$0xff]  ;;  %v2294_v7 = vld [vmem:[%s10251_s6 + $0x2f8] sm:$0xff] }
 0x2d3   : >> { %5078 = vmatmul.mubr.msk.f32.gmra.mrb[10].mxu0 %vm2181_vm3, %v2469_v52  ;;  %6075 = vmatmul.mubr.msk.f32.gmra.mrb[40].mxu1 %vm2181_vm3, %v2469_v52  ;;  %v2285_v52 = vld [vmem:[%s10251_s6 + $0x2b0] sm:$0xff] }
 0x2d4   : >> { %6708 = vmatpush1.bf16.msra.mxu0 %v6707_v16  ;;  %2881 = vmatprep.mubr.f32.mxu0 %v8707_v9  ;;  %v6801_v2 = vpack.c.bf16 %v2288_v53, %v2285_v52  ;;  %v6805_v16 = vpack.c.bf16 %v2294_v7, %v2291_v6  ;;  %v2265_v53 = vld [vmem:[%s10251_s6 + $0x210] sm:$0xff]  ;;  %v6745_v6 = vpack.c.bf16 %v2275_v0, %v2272_v63  ;;  %v2271_v7 = vld [vmem:[%s10251_s6 + $0x240] sm:$0xff]  ;;  %v2296_v63 = vld [vmem:[%s10251_s6 + $0x308] sm:$0xff] }
 0x2d5   : >> { %6788 = vmatpush3.bf16.msra.mxu1 %v6787_v17  ;;  %3047 = vmatprep.mubr.f32.mxu1 %v8707_v9  ;;  %v2228_v9 = vld [vmem:[%s10251_s6 + $0xe8] sm:$0xff]  ;;  %v2246_v17 = vld [vmem:[%s10251_s6 + $0x178] sm:$0xff]  ;;  %v2299_v0 = vld [vmem:[%s10251_s6 + $0x320] sm:$0xff] }
 0x2d6   : >> { %6710 = vmatprep.subr.bf16.mxu0 %v6709_v23  ;;  %6790 = vmatprep.subr.bf16.mxu1 %v6789_v24  ;;  %v6795_v44 = vpack.c.bf16 %v2228_v9, %v2225_v37  ;;  %v6807_v23 = vpack.c.bf16 %v2246_v17, %v2243_v15  ;;  %v6729_v24 = vpack.c.bf16 %v2251_v21, %v2248_v18  ;;  %v2306_v9 = vld [vmem:[%s10251_s6 + $0x358] sm:$0xff]  ;;  %v2281_v15 = vld [vmem:[%s10251_s6 + $0x290] sm:$0xff] }
 0x2d7   : >> { %v5147_v17 = vld [vmem:[%s10251_s6 + $0x958] sm:$0xff] }
 0x2d8   : >> { %6712 = vmatpush1.bf16.msra.mxu0 %v6711_v31  ;;  %v2257_v31 = vld [vmem:[%s10251_s6 + $0x1d0] sm:$0xff] }
 0x2d9   : >> { %6792 = vmatpush3.bf16.msra.mxu1 %v6791_v32  ;;  %6714 = vmatprep.subr.bf16.mxu0 %v6713_v34  ;;  %v6731_v32 = vpack.c.bf16 %v2250_v26, %v2247_v25  ;;  %v6810_v34 = vpack.c.bf16 %v2300_v29, %v2297_v27  ;;  %v6733_v37 = vpack.c.bf16 %v2257_v31, %v2254_v30  ;;  %v5099_v27 = vld [vmem:[%s10251_s6 + $0x7d8] sm:$0xff]  ;;  %v2284_v29 = vld [vmem:[%s10251_s6 + $0x2a8] sm:$0xff]  ;;  %v2287_v30 = vld [vmem:[%s10251_s6 + $0x2c0] sm:$0xff] }
 0x2da   : >> { %6794 = vmatprep.subr.bf16.mxu1 %v6793_v38  ;;  %v2303_v38 = vld [vmem:[%s10251_s6 + $0x340] sm:$0xff]  ;;  %v6749_v25 = vpack.c.bf16 %v2281_v15, %v2278_v14  ;;  %v9148_v31 = vld [vmem:[#allocation5 + $0x10] sm:$0xff]  ;;  %v6753_v39 = vpack.c.bf16 %v2287_v30, %v2284_v29  ;;  %v5117_v15 = vld [vmem:[%s10251_s6 + $0x868] sm:$0xff] }
 0x2db   : >> { %v6813_v42 = vpack.c.bf16 %v2306_v9, %v2303_v38  ;;  %v2286_v38 = vld [vmem:[%s10251_s6 + $0x2b8] sm:$0xff]  ;;  %v3144_v9 = vld [vmem:[#allocation5 + $0x8] sm:$0xfc] }
 0x2dc   : >> { %6716 = vmatpush1.bf16.msra.mxu0 %v6715_v43  ;;  %v2259_v43 = vld [vmem:[%s10251_s6 + $0x1e0] sm:$0xff]  ;;  %v5123_v30 = vld [vmem:[%s10251_s6 + $0x898] sm:$0xff] }
 0x2dd   : >> { %6796 = vmatpush3.bf16.msra.mxu1 %v6795_v44  ;;  %6718 = vmatprep.subr.bf16.mxu0 %v6717_v45  ;;  %v2262_v44 = vld [vmem:[%s10251_s6 + $0x1f8] sm:$0xff]  ;;  %v2309_v45 = vld [vmem:[%s10251_s6 + $0x370] sm:$0xff] }
 0x2de   : >> { %6798 = vmatprep.subr.bf16.mxu1 %v6797_v49  ;;  %v2269_v49 = vld [vmem:[%s10251_s6 + $0x230] sm:$0xff]  ;;  %v6739_v48 = vpack.c.bf16 %v2262_v44, %v2259_v43  ;;  %v6816_v51 = vpack.c.bf16 %v2312_v47, %v2309_v45  ;;  %v2290_v43 = vld [vmem:[%s10251_s6 + $0x2d8] sm:$0xff]  ;;  %v5156_v45 = vld [vmem:[%s10251_s6 + $0x9a0] sm:$0xff] }
 0x2df   : >> { %v6741_v52 = vpack.c.bf16 %v2269_v49, %v2266_v33  ;;  %v2293_v44 = vld [vmem:[%s10251_s6 + $0x2f0] sm:$0xff]  ;;  %v3280_v33 = vrot.slane %v3144_v9, 2 }
 0x2e0   : >> { %6720 = vmatpush1.bf16.msra.mxu0 %v6719_v57  ;;  %v2268_v57 = vld [vmem:[%s10251_s6 + $0x228] sm:$0xff] }
 0x2e1   : >> { %6800 = vmatpush3.bf16.msra.mxu1 %v6799_v61  ;;  %6722 = vmatprep.subr.bf16.mxu0 %v6721_v62  ;;  %v2315_v61 = vld [vmem:[%s10251_s6 + $0x3a0] sm:$0xff]  ;;  %v2318_v62 = vld [vmem:[%s10251_s6 + $0x3b8] sm:$0xff]  ;;  %v6743_v4 = vpack.c.bf16 %v2268_v57, %v2265_v53  ;;  %v3281_v53 = vrot.slane %v8714_v20, 2  ;;  %v6757_v57 = vpack.c.bf16 %v2293_v44, %v2290_v43  ;;  %v2317_v44 = vld [vmem:[%s10251_s6 + $0x3b0] sm:$0xff] }
 0x2e2   : >> { %6802 = vmatprep.subr.bf16.mxu1 %v6801_v2  ;;  %v5138_v2 = vld [vmem:[%s10251_s6 + $0x910] sm:$0xff]  ;;  %v6819_v5 = vpack.c.bf16 %v2318_v62, %v2315_v61  ;;  %v5111_v62 = vld [vmem:[%s10251_s6 + $0x838] sm:$0xff] }
 0x2e3   : >> { %v2314_v43 = vld [vmem:[%s10251_s6 + $0x398] sm:$0xff] }
 0x2e4   : >> { %6724 = vmatpush1.bf16.msra.mxu0 %v6723_v10  ;;  %v2274_v10 = vld [vmem:[%s10251_s6 + $0x258] sm:$0xff] }
 0x2e5   : >> { %6804 = vmatpush3.bf16.msra.mxu1 %v6803_v11  ;;  %6726 = vmatprep.subr.bf16.mxu0 %v6725_v12  ;;  %v6901_v11 = vpack.c.bf16 %v5141_v3, %v5138_v2  ;;  %v5090_v12 = vld [vmem:[%s10251_s6 + $0x790] sm:$0xff]  ;;  %v6747_v18 = vpack.c.bf16 %v2274_v10, %v2271_v7  ;;  %v9207_v2 = vld [vmem:[#allocation5 + $0x40] sm:$0x3]  ;;  %v6761_v10 = vpack.c.bf16 %v2299_v0, %v2296_v63  ;;  %v3143_v0 = vld [vmem:[#allocation5] sm:$0xfc] }
 0x2e6   : >> { %6806 = vmatprep.subr.bf16.mxu1 %v6805_v16  ;;  %v5144_v16 = vld [vmem:[%s10251_s6 + $0x940] sm:$0xff]  ;;  %v6903_v21 = vpack.c.bf16 %v5093_v13, %v5090_v12  ;;  %v5162_v3 = vld [vmem:[%s10251_s6 + $0x9d0] sm:$0xff]  ;;  %v2298_v12 = vld [vmem:[%s10251_s6 + $0x318] sm:$0xff] }
 0x2e7   : >> { %v6905_v26 = vpack.c.bf16 %v5147_v17, %v5144_v16  ;;  %v5114_v13 = vld [vmem:[%s10251_s6 + $0x850] sm:$0xff]  ;;  %v2302_v16 = vld [vmem:[%s10251_s6 + $0x338] sm:$0xff] }
 0x2e8   : >> { %6728 = vmatpush1.bf16.msra.mxu0 %v6727_v22  ;;  %v2277_v22 = vld [vmem:[%s10251_s6 + $0x270] sm:$0xff] }
 0x2e9   : >> { %6808 = vmatpush3.bf16.msra.mxu1 %v6807_v23  ;;  %6730 = vmatprep.subr.bf16.mxu0 %v6729_v24  ;;  %v2280_v23 = vld [vmem:[%s10251_s6 + $0x288] sm:$0xff]  ;;  %v5096_v24 = vld [vmem:[%s10251_s6 + $0x7c0] sm:$0xff]  ;;  %v2305_v17 = vld [vmem:[%s10251_s6 + $0x350] sm:$0xff] }
 0x2ea   : >> { %6809 = vmatprep.subr.bf16.mxu1 %v7383_v55  ;;  %v6751_v35 = vpack.c.bf16 %v2280_v23, %v2277_v22  ;;  %v6907_v36 = vpack.c.bf16 %v5099_v27, %v5096_v24  ;;  %v6919_v23 = vpack.c.bf16 %v5117_v15, %v5114_v13  ;;  %v6765_v24 = vpack.c.bf16 %v2305_v17, %v2302_v16  ;;  %v5120_v27 = vld [vmem:[%s10251_s6 + $0x880] sm:$0xff]  ;;  %v5095_v13 = vld [vmem:[%s10251_s6 + $0x7b8] sm:$0xff]  ;;  %v3146_v17 = vld [vmem:[#allocation5 + $0x30] sm:$0xf] }
 0x2ec   : >> { %3048 = vmatmul.mubr.f32.vlgmr.msra.gmra.mrb[42].mxu1 %v8705_v8  ;;  %6732 = vmatpush1.bf16.msra.mxu0 %v6731_v32  ;;  %v5150_v32 = vld [vmem:[%s10251_s6 + $0x970] sm:$0xff] }
 0x2ed   : >> { %3052 = vmatprep.mubr.f32.mxu1 %v8714_v20  ;;  %6811 = vmatpush3.bf16.msra.mxu1 %v6810_v34  ;;  %v5153_v34 = vld [vmem:[%s10251_s6 + $0x988] sm:$0xff] }
 0x2ee   : >> { %6734 = vmatprep.subr.bf16.mxu0 %v6733_v37  ;;  %6812 = vmatprep.subr.bf16.mxu1 %v7383_v55  ;;  %v2283_v37 = vld [vmem:[%s10251_s6 + $0x2a0] sm:$0xff]  ;;  %v6909_v40 = vpack.c.bf16 %v5153_v34, %v5150_v32  ;;  %v2308_v32 = vld [vmem:[%s10251_s6 + $0x368] sm:$0xff] }
 0x2ef   : >> { %v6755_v47 = vpack.c.bf16 %v2286_v38, %v2283_v37  ;;  %v2311_v34 = vld [vmem:[%s10251_s6 + $0x380] sm:$0xff]  ;;  %v6923_v38 = vpack.c.bf16 %v5123_v30, %v5120_v27  ;;  %v9358_v27 = vrot.slane %v3146_v17, 2 }
 0x2f0   : >> { %3053 = vmatmul.mubr.f32.gmra.mrb[44].mxu1 %v8712_v19  ;;  %6736 = vmatpush1.bf16.msra.mxu0 %v6735_v41  ;;  %v5102_v41 = vld [vmem:[%s10251_s6 + $0x7f0] sm:$0xff]  ;;  %v6769_v9 = vpack.c.bf16 %v2311_v34, %v2308_v32  ;;  %v5104_v30 = vld [vmem:[%s10251_s6 + $0x800] sm:$0xff] }
 0x2f1   : >> { %3057 = vmatprep.mubr.f32.mxu1 %v9072_v50  ;;  %6814 = vmatpush3.bf16.msra.mxu1 %v6813_v42  ;;  %v5105_v42 = vld [vmem:[%s10251_s6 + $0x808] sm:$0xff] }
 0x2f2   : >> { %6738 = vmatprep.subr.bf16.mxu0 %v6737_v46  ;;  %6815 = vmatprep.subr.bf16.mxu1 %v7383_v55  ;;  %v5159_v46 = vld [vmem:[%s10251_s6 + $0x9b8] sm:$0xff]  ;;  %v6911_v49 = vpack.c.bf16 %v5105_v42, %v5102_v41  ;;  %v5129_v42 = vld [vmem:[%s10251_s6 + $0x8c8] sm:$0xff] }
 0x2f3   : >> { %v6913_v61 = vpack.c.bf16 %v5159_v46, %v5156_v45  ;;  %v5180_v45 = vld [vmem:[%s10251_s6 + $0xa60] sm:$0xff]  ;;  %v5183_v46 = vld [vmem:[%s10251_s6 + $0xa78] sm:$0xff] }
 0x2f4   : >> { %3058 = vmatmul.mubr.f32.gmra.mrb[46].mxu1 %v9094_v1  ;;  %6740 = vmatpush1.bf16.msra.mxu0 %v6739_v48  ;;  %v2289_v48 = vld [vmem:[%s10251_s6 + $0x2d0] sm:$0xff] }
 0x2f5   : >> { %6817 = vmatpush3.bf16.msra.mxu1 %v6816_v51  ;;  %6742 = vmatprep.subr.bf16.mxu0 %v6741_v52  ;;  %v2292_v51 = vld [vmem:[%s10251_s6 + $0x2e8] sm:$0xff]  ;;  %v5108_v52 = vld [vmem:[%s10251_s6 + $0x820] sm:$0xff] }
 0x2f6   : >> { %6818 = vmatprep.subr.bf16.mxu1 %v7383_v55  ;;  %6093 = vmatprep.mubr.msk.f32.mxu1 %vm7384_vm2, %v7385_v60  ;;  %v6915_v7 = vpack.c.bf16 %v5111_v62, %v5108_v52  ;;  %v5132_v52 = vld [vmem:[%s10251_s6 + $0x8e0] sm:$0xff] }
 0x2f7   : >> { %v5092_v62 = vld [vmem:[%s10251_s6 + $0x7a0] sm:$0xff] }
 0x2f8   : >> { %6744 = vmatpush1.bf16.msra.mxu0 %v6743_v4  ;;  %v5165_v4 = vld [vmem:[%s10251_s6 + $0x9e8] sm:$0xff] }
 0x2f9   : >> { %6820 = vmatpush3.bf16.msra.mxu1 %v6819_v5  ;;  %6746 = vmatprep.subr.bf16.mxu0 %v6745_v6  ;;  %v9220_v5 = vsel %vm3276_vm6, %v3280_v33, %v3281_v53  ;;  %v6759_v6 = vpack.c.bf16 %v2292_v51, %v2289_v48  ;;  %v6917_v14 = vpack.c.bf16 %v5165_v4, %v5162_v3  ;;  %v2313_v48 = vld [vmem:[%s10251_s6 + $0x390] sm:$0xff]  ;;  %v2316_v51 = vld [vmem:[%s10251_s6 + $0x3a8] sm:$0xff] }
 0x2fa   : >> { %6902 = vmatprep.subr.bf16.mxu1 %v6901_v11  ;;  %v2295_v11 = vld [vmem:[%s10251_s6 + $0x300] sm:$0xff]  ;;  %v6775_v63 = vpack.c.bf16 %v2316_v51, %v2313_v48 }
 0x2fb   : >> { %v6763_v22 = vpack.c.bf16 %v2298_v12, %v2295_v11  ;;  %v5189_v11 = vld [vmem:[%s10251_s6 + $0xaa8] sm:$0xff]  ;;  %v3277_v12 = vrot.slane %v3143_v0, 2  ;;  %v5112_v51 = vld [vmem:[%s10251_s6 + $0x840] sm:$0xff]  ;;  %v5118_v0 = vld [vmem:[%s10251_s6 + $0x870] sm:$0xff] }
 0x2fc   : >> { %6094 = vmatmul.mubr.msk.f32.vlgmr.msra.gmra.mrb[48].mxu1 %vm2181_vm3, %v9148_v31  ;;  %6748 = vmatpush1.bf16.msra.mxu0 %v6747_v18  ;;  %v5168_v18 = vld [vmem:[%s10251_s6 + $0xa00] sm:$0xff] }
 0x2fd   : >> { %6904 = vmatpush3.bf16.msra.mxu1 %v6903_v21  ;;  %6096 = vmatprep.mubr.msk.f32.mxu1 %vm7384_vm2, %v7385_v60  ;;  %v5171_v21 = vld [vmem:[%s10251_s6 + $0xa18] sm:$0xff] }
 0x2fe   : >> { %6750 = vmatprep.subr.bf16.mxu0 %v6749_v25  ;;  %6906 = vmatprep.subr.bf16.mxu1 %v6905_v26  ;;  %v2301_v25 = vld [vmem:[%s10251_s6 + $0x330] sm:$0xff]  ;;  %v2304_v26 = vld [vmem:[%s10251_s6 + $0x348] sm:$0xff]  ;;  %v6921_v29 = vpack.c.bf16 %v5171_v21, %v5168_v18  ;;  %v3278_v18 = vrot.slane %v8712_v19, 2 }
 0x2ff   : >> { %v6767_v37 = vpack.c.bf16 %v2304_v26, %v2301_v25  ;;  %v5192_v25 = vld [vmem:[%s10251_s6 + $0xac0] sm:$0xff] }
 0x300   : >> { %6097 = vmatmul.mubr.msk.f32.gmra.mrb[50].mxu1 %vm2181_vm3, %v8804_v28  ;;  %6752 = vmatpush1.bf16.msra.mxu0 %v6751_v35  ;;  %v5174_v35 = vld [vmem:[%s10251_s6 + $0xa30] sm:$0xff]  ;;  %v9356_v26 = vsel %vm3276_vm6, %v3277_v12, %v3278_v18  ;;  %v5127_v12 = vld [vmem:[%s10251_s6 + $0x8b8] sm:$0xff] }
 0x301   : >> { %6908 = vmatpush3.bf16.msra.mxu1 %v6907_v36  ;;  %6099 = vmatprep.mubr.msk.f32.mxu1 %vm7384_vm2, %v7385_v60  ;;  %v5177_v36 = vld [vmem:[%s10251_s6 + $0xa48] sm:$0xff] }
 0x302   : >> { %6754 = vmatprep.subr.bf16.mxu0 %v6753_v39  ;;  %6910 = vmatprep.subr.bf16.mxu1 %v6909_v40  ;;  %v2310_v39 = vld [vmem:[%s10251_s6 + $0x378] sm:$0xff]  ;;  %v5126_v40 = vld [vmem:[%s10251_s6 + $0x8b0] sm:$0xff]  ;;  %v6925_v41 = vpack.c.bf16 %v5177_v36, %v5174_v35  ;;  %v5100_v35 = vld [vmem:[%s10251_s6 + $0x7e0] sm:$0xff] }
 0x303   : >> { %v6927_v33 = vpack.c.bf16 %v5129_v42, %v5126_v40  ;;  %v5103_v36 = vld [vmem:[%s10251_s6 + $0x7f8] sm:$0xff]  ;;  %v5109_v42 = vld [vmem:[%s10251_s6 + $0x828] sm:$0xff] }
 0x304   : >> { %6100 = vmatmul.mubr.msk.f32.gmra.mrb[52].mxu1 %vm2181_vm3, %v9207_v2  ;;  %6756 = vmatpush1.bf16.msra.mxu0 %v6755_v47 }
 0x305   : >> { %6912 = vmatpush3.bf16.msra.mxu1 %v6911_v49  ;;  %3534 = vmatprep.mubr.f32.mxu1 %v9220_v5  ;;  %v6773_v49 = vpack.c.bf16 %v2317_v44, %v2314_v43  ;;  %v5204_v43 = vld [vmem:[%s10251_s6 + $0xb20] sm:$0xff] }
 0x306   : >> { %6758 = vmatprep.subr.bf16.mxu0 %v6757_v57  ;;  %6914 = vmatprep.subr.bf16.mxu1 %v6913_v61  ;;  %v5135_v57 = vld [vmem:[%s10251_s6 + $0x8f8] sm:$0xff]  ;;  %v5089_v61 = vld [vmem:[%s10251_s6 + $0x788] sm:$0xff] }
 0x307   : >> { %v6931_v3 = vpack.c.bf16 %v5135_v57, %v5132_v52  ;;  %v6821_v4 = vpack.c.bf16 %v5092_v62, %v5089_v61  ;;  %v5115_v52 = vld [vmem:[%s10251_s6 + $0x858] sm:$0xff]  ;;  %v3284_v57 = vrot.slane %v8804_v28, 2  ;;  %v3148_v62 = vld [vmem:[#allocation5 + $0x40] sm:$0xf] }
 0x308   : >> { %6760 = vmatpush1.bf16.msra.mxu0 %v6759_v6  ;;  %v5088_v6 = vld [vmem:[%s10251_s6 + $0x780] sm:$0xff]  ;;  %v6839_v61 = vpack.c.bf16 %v5115_v52, %v5112_v51 }
 0x309   : >> { %6916 = vmatpush3.bf16.msra.mxu1 %v6915_v7  ;;  %6762 = vmatprep.subr.bf16.mxu0 %v6761_v10  ;;  %v5091_v7 = vld [vmem:[%s10251_s6 + $0x798] sm:$0xff]  ;;  %v5160_v52 = vld [vmem:[%s10251_s6 + $0x9c0] sm:$0xff] }
 0x30a   : >> { %6918 = vmatprep.subr.bf16.mxu1 %v6917_v14  ;;  %v3147_v10 = vld [vmem:[#allocation5 + $0x38] sm:$0xf]  ;;  %v5098_v14 = vld [vmem:[%s10251_s6 + $0x7d0] sm:$0xff]  ;;  %v6823_v15 = vpack.c.bf16 %v5091_v7, %v5088_v6  ;;  %v9457_v7 = vrot.slane %v3148_v62, 2 }
 0x30b   : >> { %2882 = vmatmul.mubr.f32.vlgmr.msra.gmra.mrb[6].mxu0 %v8705_v8  ;;  %v2307_v8 = vld [vmem:[%s10251_s6 + $0x360] sm:$0xff]  ;;  %v9337_v16 = vrot.slane %v3147_v10, 2  ;;  %v5166_v62 = vld [vmem:[%s10251_s6 + $0x9f0] sm:$0xff] }
 0x30c   : >> { %2887 = vmatprep.mubr.f32.mxu0 %v8714_v20  ;;  %6764 = vmatpush1.bf16.msra.mxu0 %v6763_v22  ;;  %v6771_v47 = vpack.c.bf16 %v2310_v39, %v2307_v8  ;;  %v5094_v22 = vld [vmem:[%s10251_s6 + $0x7b0] sm:$0xff]  ;;  %v6831_v39 = vpack.c.bf16 %v5103_v36, %v5100_v35 }
 0x30d   : >> { %6920 = vmatpush3.bf16.msra.mxu1 %v6919_v23  ;;  %6766 = vmatprep.subr.bf16.mxu0 %v6765_v24  ;;  %v5097_v23 = vld [vmem:[%s10251_s6 + $0x7c8] sm:$0xff]  ;;  %v6825_v24 = vpack.c.bf16 %v5098_v14, %v5095_v13  ;;  %v5110_v8 = vld [vmem:[%s10251_s6 + $0x830] sm:$0xff]  ;;  %v5131_v13 = vld [vmem:[%s10251_s6 + $0x8d8] sm:$0xff] }
 0x30e   : >> { %6922 = vmatprep.subr.bf16.mxu1 %v6921_v29  ;;  %v5101_v29 = vld [vmem:[%s10251_s6 + $0x7e8] sm:$0xff]  ;;  %v6827_v32 = vpack.c.bf16 %v5097_v23, %v5094_v22  ;;  %v5134_v14 = vld [vmem:[%s10251_s6 + $0x8f0] sm:$0xff] }
 0x30f   : >> { %2888 = vmatmul.mubr.f32.gmra.mrb[8].mxu0 %v8712_v19  ;;  %v5195_v19 = vld [vmem:[%s10251_s6 + $0xad8] sm:$0xff]  ;;  %v6829_v20 = vpack.c.bf16 %v5104_v30, %v5101_v29  ;;  %v5133_v22 = vld [vmem:[%s10251_s6 + $0x8e8] sm:$0xff]  ;;  %v5136_v29 = vld [vmem:[%s10251_s6 + $0x900] sm:$0xff] }
 0x310   : >> { %2893 = vmatprep.mubr.f32.mxu0 %v9072_v50  ;;  %6768 = vmatpush1.bf16.msra.mxu0 %v6767_v37  ;;  %v6929_v50 = vpack.c.bf16 %v5183_v46, %v5180_v45  ;;  %v6937_v34 = vpack.c.bf16 %v5195_v19, %v5192_v25  ;;  %v5201_v37 = vld [vmem:[%s10251_s6 + $0xb08] sm:$0xff]  ;;  %v5207_v45 = vld [vmem:[%s10251_s6 + $0xb38] sm:$0xff] }
 0x311   : >> { %6924 = vmatpush3.bf16.msra.mxu1 %v6923_v38  ;;  %6770 = vmatprep.subr.bf16.mxu0 %v6769_v9  ;;  %v9391_v38 = vsel %vm3276_vm6, %v3278_v18, %v9358_v27  ;;  %v5107_v9 = vld [vmem:[%s10251_s6 + $0x818] sm:$0xff]  ;;  %v5113_v46 = vld [vmem:[%s10251_s6 + $0x848] sm:$0xff]  ;;  %v6849_v18 = vpack.c.bf16 %v5134_v14, %v5131_v13  ;;  %v5178_v14 = vld [vmem:[%s10251_s6 + $0xa50] sm:$0xff] }
 0x312   : >> { %6926 = vmatprep.subr.bf16.mxu1 %v6925_v41  ;;  %v5106_v41 = vld [vmem:[%s10251_s6 + $0x810] sm:$0xff]  ;;  %v6833_v44 = vpack.c.bf16 %v5110_v8, %v5107_v9  ;;  %v5137_v23 = vld [vmem:[%s10251_s6 + $0x908] sm:$0xff]  ;;  %v5139_v30 = vld [vmem:[%s10251_s6 + $0x918] sm:$0xff] }
 0x313   : >> { %2894 = vmatmul.mubr.f32.gmra.mrb[10].mxu0 %v9094_v1  ;;  %v5186_v1 = vld [vmem:[%s10251_s6 + $0xa90] sm:$0xff]  ;;  %v6855_v35 = vpack.c.bf16 %v5139_v30, %v5136_v29  ;;  %v5152_v9 = vld [vmem:[%s10251_s6 + $0x980] sm:$0xff] }
 0x314   : >> { %6772 = vmatpush1.bf16.msra.mxu0 %v6771_v47  ;;  %2964 = vmatprep.mubr.f32.mxu0 %v7385_v60  ;;  %v6934_v21 = vpack.c.bf16 %v5189_v11, %v5186_v1  ;;  %v5116_v47 = vld [vmem:[%s10251_s6 + $0x860] sm:$0xff]  ;;  %v5194_v29 = vld [vmem:[%s10251_s6 + $0xad0] sm:$0xff] }
 0x315   : >> { %6928 = vmatpush3.bf16.msra.mxu1 %v6927_v33  ;;  %6774 = vmatprep.subr.bf16.mxu0 %v6773_v49  ;;  %v6835_v33 = vpack.c.bf16 %v5109_v42, %v5106_v41  ;;  %v6943_v49 = vpack.c.bf16 %v5207_v45, %v5204_v43  ;;  %v6837_v48 = vpack.c.bf16 %v5116_v47, %v5113_v46  ;;  %v5124_v11 = vld [vmem:[%s10251_s6 + $0x8a0] sm:$0xff]  ;;  %v5151_v41 = vld [vmem:[%s10251_s6 + $0x978] sm:$0xff]  ;;  %v5158_v43 = vld [vmem:[%s10251_s6 + $0x9b0] sm:$0xff] }
 0x316   : >> { %6930 = vmatprep.subr.bf16.mxu1 %v6929_v50  ;;  %v5119_v50 = vld [vmem:[%s10251_s6 + $0x878] sm:$0xff]  ;;  %v6847_v17 = vpack.c.bf16 %v5127_v12, %v5124_v11  ;;  %v5154_v46 = vld [vmem:[%s10251_s6 + $0x990] sm:$0xff]  ;;  %v5157_v47 = vld [vmem:[%s10251_s6 + $0x9a8] sm:$0xff] }
 0x317   : >> { %v5155_v42 = vld [vmem:[%s10251_s6 + $0x998] sm:$0xff]  ;;  %v5182_v11 = vld [vmem:[%s10251_s6 + $0xa70] sm:$0xff] }
 0x318   : >> { %6776 = vmatpush1.bf16.msra.mxu0 %v6775_v63  ;;  %v6865_v45 = vpack.c.bf16 %v5158_v43, %v5155_v42  ;;  %v5205_v42 = vld [vmem:[%s10251_s6 + $0xb28] sm:$0xff] }
 0x319   : >> { %6932 = vmatpush3.bf16.msra.mxu1 %v6931_v3  ;;  %6822 = vmatprep.subr.bf16.mxu0 %v6821_v4  ;;  %v5121_v3 = vld [vmem:[%s10251_s6 + $0x888] sm:$0xff] }
 0x31a   : >> { %6933 = vmatprep.subr.bf16.mxu1 %v7383_v55  ;;  %v5125_v4 = vld [vmem:[%s10251_s6 + $0x8a8] sm:$0xff]  ;;  %v6843_v10 = vpack.c.bf16 %v5121_v3, %v5118_v0  ;;  %v5176_v0 = vld [vmem:[%s10251_s6 + $0xa40] sm:$0xff] }
 0x31b   : >> { %5082 = vmatmul.mubr.msk.f32.vlgmr.msra.gmra.mrb[6].mxu0 %vm2181_vm3, %v9148_v31  ;;  %v9371_v31 = vsel %vm3276_vm6, %v3281_v53, %v9337_v16  ;;  %v5198_v53 = vld [vmem:[%s10251_s6 + $0xaf0] sm:$0xff] }
 0x31c   : >> { %3535 = vmatmul.mubr.f32.vlgmr.msra.gmra.mrb[54].mxu1 %v9356_v26  ;;  %6824 = vmatpush1.bf16.msra.mxu0 %v6823_v15  ;;  %v6940_v40 = vpack.c.bf16 %v5201_v37, %v5198_v53  ;;  %v9477_v15 = vsel %vm3276_vm6, %v3284_v57, %v9457_v7  ;;  %v5145_v53 = vld [vmem:[%s10251_s6 + $0x948] sm:$0xff] }
 0x31d   : >> { %3539 = vmatprep.mubr.f32.mxu1 %v9371_v31  ;;  %6935 = vmatpush3.bf16.msra.mxu1 %v6934_v21  ;;  %v5130_v21 = vld [vmem:[%s10251_s6 + $0x8d0] sm:$0xff]  ;;  %v5149_v37 = vld [vmem:[%s10251_s6 + $0x968] sm:$0xff] }
 0x31e   : >> { %2970 = vmatprep.mubr.f32.mxu0 %v7385_v60  ;;  %6826 = vmatprep.subr.bf16.mxu0 %v6825_v24  ;;  %v5140_v24 = vld [vmem:[%s10251_s6 + $0x920] sm:$0xff]  ;;  %v6851_v25 = vpack.c.bf16 %v5133_v22, %v5130_v21 }
 0x31f   : >> { %5083 = vmatmul.mubr.msk.f32.gmra.mrb[8].mxu0 %vm2181_vm3, %v8804_v28  ;;  %6936 = vmatprep.subr.bf16.mxu1 %v7383_v55  ;;  %v5128_v28 = vld [vmem:[%s10251_s6 + $0x8c0] sm:$0xff]  ;;  %v6853_v19 = vpack.c.bf16 %v5140_v24, %v5137_v23 }
 0x320   : >> { %3540 = vmatmul.mubr.f32.gmra.mrb[56].mxu1 %v9391_v38  ;;  %6828 = vmatpush1.bf16.msra.mxu0 %v6827_v32  ;;  %v6845_v1 = vpack.c.bf16 %v5128_v28, %v5125_v4  ;;  %v5143_v32 = vld [vmem:[%s10251_s6 + $0x938] sm:$0xff]  ;;  %v5172_v28 = vld [vmem:[%s10251_s6 + $0xa20] sm:$0xff] }
 0x321   : >> { %3544 = vmatprep.mubr.f32.mxu1 %v9337_v16  ;;  %6938 = vmatpush3.bf16.msra.mxu1 %v6937_v34  ;;  %v5146_v34 = vld [vmem:[%s10251_s6 + $0x950] sm:$0xff]  ;;  %v5188_v21 = vld [vmem:[%s10251_s6 + $0xaa0] sm:$0xff] }
 0x322   : >> { %2976 = vmatprep.mubr.f32.mxu0 %v7385_v60  ;;  %6830 = vmatprep.subr.bf16.mxu0 %v6829_v20  ;;  %v6857_v36 = vpack.c.bf16 %v5146_v34, %v5143_v32  ;;  %v5142_v20 = vld [vmem:[%s10251_s6 + $0x930] sm:$0xff]  ;;  %v5184_v24 = vld [vmem:[%s10251_s6 + $0xa80] sm:$0xff] }
 0x323   : >> { %5084 = vmatmul.mubr.msk.f32.gmra.mrb[10].mxu0 %vm2181_vm3, %v9207_v2  ;;  %6939 = vmatprep.subr.bf16.mxu1 %v7383_v55  ;;  %v3145_v2 = vld [vmem:[#allocation5 + $0x10] sm:$0xfc]  ;;  %v6859_v8 = vpack.c.bf16 %v5145_v53, %v5142_v20  ;;  %v5200_v20 = vld [vmem:[%s10251_s6 + $0xb00] sm:$0xff] }
 0x324   : >> { %3545 = vmatmul.mubr.f32.gmra.mrb[58].mxu1 %v9358_v27  ;;  %6832 = vmatpush1.bf16.msra.mxu0 %v6831_v39  ;;  %v6861_v39 = vpack.c.bf16 %v5152_v9, %v5149_v37  ;;  %v5190_v34 = vld [vmem:[%s10251_s6 + $0xab0] sm:$0xff]  ;;  %v5196_v9 = vld [vmem:[%s10251_s6 + $0xae0] sm:$0xff] }
 0x325   : >> { %3368 = vmatprep.mubr.f32.mxu0 %v9220_v5  ;;  %6941 = vmatpush3.bf16.msra.mxu1 %v6940_v40  ;;  %v5122_v5 = vld [vmem:[%s10251_s6 + $0x890] sm:$0xff]  ;;  %v5148_v40 = vld [vmem:[%s10251_s6 + $0x960] sm:$0xff] }
 0x326   : >> { %6834 = vmatprep.subr.bf16.mxu0 %v6833_v44  ;;  %6942 = vmatprep.subr.bf16.mxu1 %v7383_v55  ;;  %v3283_v55 = vrot.slane %v3145_v2, 2  ;;  %v6841_v63 = vpack.c.bf16 %v5122_v5, %v5119_v50  ;;  %v6863_v44 = vpack.c.bf16 %v5151_v41, %v5148_v40  ;;  %v5163_v2 = vld [vmem:[%s10251_s6 + $0x9d8] sm:$0xff]  ;;  %v5170_v5 = vld [vmem:[%s10251_s6 + $0xa10] sm:$0xff] }
 0x327   : >> { %6118 = vmatprep.mubr.msk.f32.mxu1 %vm7384_vm2, %v7385_v60  ;;  %v5167_v50 = vld [vmem:[%s10251_s6 + $0x9f8] sm:$0xff]  ;;  %v5202_v41 = vld [vmem:[%s10251_s6 + $0xb10] sm:$0xff] }
 0x328   : >> { %6836 = vmatpush1.bf16.msra.mxu0 %v6835_v33  ;;  %v9455_v6 = vsel %vm3276_vm6, %v3283_v55, %v3284_v57  ;;  %v5161_v33 = vld [vmem:[%s10251_s6 + $0x9c8] sm:$0xff]  ;;  %v6871_v57 = vpack.c.bf16 %v5163_v2, %v5160_v52  ;;  %v6899_v43 = vpack.c.bf16 %v5205_v42, %v5202_v41  ;;  %v5230_v52 = vld [vmem:[%s10253_s8 + $0x1a0] sm:$0xff]  ;;  %v5240_v41 = vld [vmem:[%s10253_s8 + $0x1f0] sm:$0xff] }
 0x329   : >> { %6944 = vmatpush3.bf16.msra.mxu1 %v6943_v49  ;;  %6838 = vmatprep.subr.bf16.mxu0 %v6837_v48  ;;  %v5164_v49 = vld [vmem:[%s10251_s6 + $0x9e0] sm:$0xff]  ;;  %v6867_v48 = vpack.c.bf16 %v5157_v47, %v5154_v46  ;;  %v5169_v55 = vld [vmem:[%s10251_s6 + $0xa08] sm:$0xff]  ;;  %v5241_v42 = vld [vmem:[%s10253_s8 + $0x1f8] sm:$0xff] }
 0x32a   : >> { %v6869_v51 = vpack.c.bf16 %v5164_v49, %v5161_v33  ;;  %v6875_v3 = vpack.c.bf16 %v5169_v55, %v5166_v62  ;;  %v5231_v2 = vld [vmem:[%s10253_s8 + $0x1a8] sm:$0xff]  ;;  %v5233_v62 = vld [vmem:[%s10253_s8 + $0x1b8] sm:$0xff] }
 0x32c   : >> { %6119 = vmatmul.mubr.msk.f32.vlgmr.msra.gmra.mrb[60].mxu1 %vm2181_vm3, %v9455_v6  ;;  %6840 = vmatpush1.bf16.msra.mxu0 %v6839_v61  ;;  %v6873_v61 = vpack.c.bf16 %v5170_v5, %v5167_v50  ;;  %v5214_v50 = vld [vmem:[%s10253_s8 + $0x120] sm:$0xff]  ;;  %v6945_v5 = vpack.c.bf16 %v5231_v2, %v5230_v52 }
 0x32d   : >> { %6121 = vmatprep.mubr.msk.f32.mxu1 %vm7384_vm2, %v7385_v60  ;;  %6842 = vmatprep.subr.bf16.mxu0 %v6841_v63  ;;  %v5173_v63 = vld [vmem:[%s10251_s6 + $0xa28] sm:$0xff] }
 0x32e   : >> { %v6877_v4 = vpack.c.bf16 %v5176_v0, %v5173_v63  ;;  %v5216_v0 = vld [vmem:[%s10253_s8 + $0x130] sm:$0xff]  ;;  %6946 = vmatprep.subr.bf16.mxu1 %v6945_v5  ;;  %v5245_v5 = vld [vmem:[%s10253_s8 + $0x218] sm:$0xff] }
 0x330   : >> { %6122 = vmatmul.mubr.msk.f32.gmra.mrb[62].mxu1 %vm2181_vm3, %v9477_v15  ;;  %6844 = vmatpush1.bf16.msra.mxu0 %v6843_v10  ;;  %v5175_v10 = vld [vmem:[%s10251_s6 + $0xa38] sm:$0xff] }
 0x331   : >> { %6124 = vmatprep.mubr.msk.f32.mxu1 %vm7384_vm2, %v7385_v60  ;;  %6846 = vmatprep.subr.bf16.mxu0 %v6845_v1  ;;  %v5179_v1 = vld [vmem:[%s10251_s6 + $0xa58] sm:$0xff]  ;;  %v6879_v12 = vpack.c.bf16 %v5175_v10, %v5172_v28  ;;  %v5235_v10 = vld [vmem:[%s10253_s8 + $0x1c8] sm:$0xff] }
 0x332   : >> { %v6881_v13 = vpack.c.bf16 %v5182_v11, %v5179_v1 }
 0x334   : >> { %6125 = vmatmul.mubr.msk.f32.gmra.mrb[64].mxu1 %vm2181_vm3, %v9457_v7  ;;  %6848 = vmatpush1.bf16.msra.mxu0 %v6847_v17  ;;  %v5181_v17 = vld [vmem:[%s10251_s6 + $0xa68] sm:$0xff] }
 0x335   : >> { %6850 = vmatprep.subr.bf16.mxu0 %v6849_v18  ;;  %v5185_v18 = vld [vmem:[%s10251_s6 + $0xa88] sm:$0xff]  ;;  %v6883_v22 = vpack.c.bf16 %v5181_v17, %v5178_v14  ;;  %v5218_v14 = vld [vmem:[%s10253_s8 + $0x140] sm:$0xff] }
 0x336   : >> { %v6885_v23 = vpack.c.bf16 %v5188_v21, %v5185_v18  ;;  %v5219_v17 = vld [vmem:[%s10253_s8 + $0x148] sm:$0xff] }
 0x338   : >> { %6852 = vmatpush1.bf16.msra.mxu0 %v6851_v25  ;;  %v5187_v25 = vld [vmem:[%s10251_s6 + $0xa98] sm:$0xff] }
 0x339   : >> { %6854 = vmatprep.subr.bf16.mxu0 %v6853_v19  ;;  %v5191_v19 = vld [vmem:[%s10251_s6 + $0xab8] sm:$0xff]  ;;  %v6887_v30 = vpack.c.bf16 %v5187_v25, %v5184_v24 }
 0x33a   : >> { %v6889_v32 = vpack.c.bf16 %v5194_v29, %v5191_v19  ;;  %v5236_v29 = vld [vmem:[%s10253_s8 + $0x1d0] sm:$0xff] }
 0x33c   : >> { %6856 = vmatpush1.bf16.msra.mxu0 %v6855_v35  ;;  %v5193_v35 = vld [vmem:[%s10251_s6 + $0xac8] sm:$0xff] }
 0x33d   : >> { %6858 = vmatprep.subr.bf16.mxu0 %v6857_v36  ;;  %v5197_v36 = vld [vmem:[%s10251_s6 + $0xae8] sm:$0xff]  ;;  %v6891_v53 = vpack.c.bf16 %v5193_v35, %v5190_v34  ;;  %v5220_v34 = vld [vmem:[%s10253_s8 + $0x150] sm:$0xff]  ;;  %v5221_v35 = vld [vmem:[%s10253_s8 + $0x158] sm:$0xff] }
 0x33e   : >> { %v6893_v37 = vpack.c.bf16 %v5200_v20, %v5197_v36  ;;  %v6959_v36 = vpack.c.bf16 %v5221_v35, %v5220_v34  ;;  %v5238_v20 = vld [vmem:[%s10253_s8 + $0x1e0] sm:$0xff] }
 0x33f   : >> { %v3639_v34 = vld [vmem:[%s10252_s7] sm:$0x7] }
 0x340   : >> { %6860 = vmatpush1.bf16.msra.mxu0 %v6859_v8  ;;  %v5199_v8 = vld [vmem:[%s10251_s6 + $0xaf8] sm:$0xff] }
 0x341   : >> { %6862 = vmatprep.subr.bf16.mxu0 %v6861_v39  ;;  %v5203_v39 = vld [vmem:[%s10251_s6 + $0xb18] sm:$0xff] }
 0x344   : >> { %6864 = vmatpush1.bf16.msra.mxu0 %v6863_v44  ;;  %v5246_v44 = vld [vmem:[%s10253_s8 + $0x220] sm:$0xff] }
 0x345   : >> { %6866 = vmatprep.subr.bf16.mxu0 %v6865_v45 }
 0x348   : >> { %6868 = vmatpush1.bf16.msra.mxu0 %v6867_v48 }
 0x349   : >> { %6870 = vmatprep.subr.bf16.mxu0 %v6869_v51 }
 0x34c   : >> { %6872 = vmatpush1.bf16.msra.mxu0 %v6871_v57  ;;  %v5215_v57 = vld [vmem:[%s10253_s8 + $0x128] sm:$0xff] }
 0x34d   : >> { %6874 = vmatprep.subr.bf16.mxu0 %v6873_v61  ;;  %v5232_v61 = vld [vmem:[%s10253_s8 + $0x1b0] sm:$0xff]  ;;  %v6947_v55 = vpack.c.bf16 %v5215_v57, %v5214_v50 }
 0x34e   : >> { %v6949_v63 = vpack.c.bf16 %v5233_v62, %v5232_v61  ;;  %v5244_v50 = vld [vmem:[%s10253_s8 + $0x210] sm:$0xff]  ;;  %v5229_v62 = vld [vmem:[%s10253_s8 + $0x198] sm:$0xff] }
 0x34f   : >> { %6948 = vmatpush3.bf16.msra.mxu1 %v6947_v55  ;;  %v6973_v57 = vpack.c.bf16 %v5245_v5, %v5244_v50  ;;  %v5228_v61 = vld [vmem:[%s10253_s8 + $0x190] sm:$0xff] }
 0x350   : >> { %6876 = vmatpush1.bf16.msra.mxu0 %v6875_v3  ;;  %v5217_v3 = vld [vmem:[%s10253_s8 + $0x138] sm:$0xff]  ;;  %6950 = vmatprep.subr.bf16.mxu1 %v6949_v63  ;;  %v6975_v63 = vpack.c.bf16 %v5229_v62, %v5228_v61 }
 0x351   : >> { %6878 = vmatprep.subr.bf16.mxu0 %v6877_v4  ;;  %v5234_v4 = vld [vmem:[%s10253_s8 + $0x1c0] sm:$0xff] }
 0x354   : >> { %6880 = vmatpush1.bf16.msra.mxu0 %v6879_v12  ;;  %v6951_v12 = vpack.c.bf16 %v5217_v3, %v5216_v0  ;;  %v3707_v0 = vld [vmem:[%s10253_s8 + $0x80] sm:$0xff]  ;;  %v3708_v3 = vld [vmem:[%s10253_s8 + $0x88] sm:$0xff] }
 0x355   : >> { %6882 = vmatprep.subr.bf16.mxu0 %v6881_v13  ;;  %v6953_v13 = vpack.c.bf16 %v5235_v10, %v5234_v4  ;;  %v6985_v4 = vpack.c.bf16 %v3708_v3, %v3707_v0 }
 0x356   : >> { %6952 = vmatpush3.bf16.msra.mxu1 %v6951_v12 }
 0x357   : >> { %6954 = vmatprep.subr.bf16.mxu1 %v6953_v13 }
 0x358   : >> { %6884 = vmatpush1.bf16.msra.mxu0 %v6883_v22 }
 0x359   : >> { %6886 = vmatprep.subr.bf16.mxu0 %v6885_v23  ;;  %v6955_v23 = vpack.c.bf16 %v5219_v17, %v5218_v14 }
 0x35b   : >> { %3369 = vmatmul.mubr.f32.vlgmr.msra.gmra.mrb[6].mxu0 %v9356_v26  ;;  %v5206_v26 = vld [vmem:[%s10251_s6 + $0xb30] sm:$0xff]  ;;  %6956 = vmatpush3.bf16.msra.mxu1 %v6955_v23 }
 0x35c   : >> { %3374 = vmatprep.mubr.f32.mxu0 %v9371_v31  ;;  %6888 = vmatpush1.bf16.msra.mxu0 %v6887_v30  ;;  %v6895_v31 = vpack.c.bf16 %v5199_v8, %v5196_v9  ;;  %v6897_v40 = vpack.c.bf16 %v5206_v26, %v5203_v39  ;;  %v5237_v30 = vld [vmem:[%s10253_s8 + $0x1d8] sm:$0xff]  ;;  %v5222_v9 = vld [vmem:[%s10253_s8 + $0x160] sm:$0xff]  ;;  %v5223_v8 = vld [vmem:[%s10253_s8 + $0x168] sm:$0xff] }
 0x35d   : >> { %6890 = vmatprep.subr.bf16.mxu0 %v6889_v32  ;;  %v6957_v32 = vpack.c.bf16 %v5237_v30, %v5236_v29  ;;  %v6963_v26 = vpack.c.bf16 %v5223_v8, %v5222_v9 }
 0x35f   : >> { %3375 = vmatmul.mubr.f32.gmra.mrb[8].mxu0 %v9391_v38  ;;  %6958 = vmatprep.subr.bf16.mxu1 %v6957_v32 }
 0x360   : >> { %3380 = vmatprep.mubr.f32.mxu0 %v9337_v16  ;;  %6892 = vmatpush1.bf16.msra.mxu0 %v6891_v53  ;;  %v5239_v53 = vld [vmem:[%s10253_s8 + $0x1e8] sm:$0xff] }
 0x361   : >> { %6894 = vmatprep.subr.bf16.mxu0 %v6893_v37  ;;  %6960 = vmatpush3.bf16.msra.mxu1 %v6959_v36  ;;  %v6961_v37 = vpack.c.bf16 %v5239_v53, %v5238_v20  ;;  %v3652_v20 = vrot.slane %v3639_v34, %v2156_v59 }
 0x363   : >> { %3381 = vmatmul.mubr.f32.gmra.mrb[10].mxu0 %v9358_v27  ;;  %6962 = vmatprep.subr.bf16.mxu1 %v6961_v37 }
 0x364   : >> { %6896 = vmatpush1.bf16.msra.mxu0 %v6895_v31  ;;  %3451 = vmatprep.mubr.f32.mxu0 %v7385_v60 }
 0x365   : >> { %6898 = vmatprep.subr.bf16.mxu0 %v6897_v40  ;;  %6964 = vmatpush3.bf16.msra.mxu1 %v6963_v26 }
 0x368   : >> { %6900 = vmatpush1.bf16.msra.mxu0 %v6899_v43  ;;  %v6965_v43 = vpack.c.bf16 %v5241_v42, %v5240_v41 }
 0x36a   : >> { %6966 = vmatprep.subr.bf16.mxu1 %v6965_v43 }
 0x36b   : >> { %5208 = vmatmul.mubr.msk.f32.vlgmr.msra.gmra.mrb[6].mxu0 %vm2181_vm3, %v9455_v6  ;;  %v5247_v6 = vld [vmem:[%s10253_s8 + $0x228] sm:$0xff] }
 0x36c   : >> { %3457 = vmatprep.mubr.f32.mxu0 %v7385_v60  ;;  %v6977_v45 = vpack.c.bf16 %v5247_v6, %v5246_v44 }
 0x36e   : >> { %6978 = vmatprep.subr.bf16.mxu0 %v6977_v45 }
 0x36f   : >> { %5209 = vmatmul.mubr.msk.f32.gmra.mrb[8].mxu0 %vm2181_vm3, %v9477_v15  ;;  %v5248_v15 = vld [vmem:[%s10253_s8 + $0x230] sm:$0xff] }
 0x370   : >> { %3463 = vmatprep.mubr.f32.mxu0 %v7385_v60  ;;  %v5249_v60 = vld [vmem:[%s10253_s8 + $0x238] sm:$0xff]  ;;  %6980 = vmatpush3.bf16.msra.mxu0 %v6977_v45 }
 0x373   : >> { %5210 = vmatmul.mubr.msk.f32.gmra.mrb[10].mxu0 %vm2181_vm3, %v9457_v7  ;;  %v6981_v7 = vpack.c.bf16 %v5249_v60, %v5248_v15  ;;  %v5242_v60 = vld [vmem:[%s10253_s8 + $0x200] sm:$0xff] }
 0x375   : >> { %6982 = vmatprep.subr.bf16.mxu0 %v6981_v7 }
 0x376   : >> { %6984 = vmatpush3.bf16.msra.mxu0 %v6981_v7  ;;  %v5243_v7 = vld [vmem:[%s10253_s8 + $0x208] sm:$0xff] }
 0x38d   : >> { %v5488_v16 = vpop.f32.mrb[30].mxu1 }
 0x38e   : >> { %v5489_v27 = vpop.f32.mrb[31].mxu1 }
 0x38f   : >> { %v5490_v38 = vadd.f32 %v5489_v27, %v5488_v16  ;;  %v5224_v16 = vld [vmem:[%s10253_s8 + $0x170] sm:$0xff]  ;;  %v5225_v27 = vld [vmem:[%s10253_s8 + $0x178] sm:$0xff] }
 0x390   : >> { %v6967_v6 = vpack.c.bf16 %v5225_v27, %v5224_v16 }
 0x392   : >> { %6968 = vmatpush3.bf16.msra.mxu1 %v6967_v6 }
 0x395   : >> { %v5491_v46 = vpop.f32.mrb[32].mxu1 }
 0x396   : >> { %v5492_v47 = vpop.f32.mrb[33].mxu1 }
 0x397   : >> { %v5493_v33 = vadd.f32 %v5492_v47, %v5491_v46  ;;  %v6969_v46 = vpack.c.bf16 %v5243_v7, %v5242_v60  ;;  %v5226_v47 = vld [vmem:[%s10253_s8 + $0x180] sm:$0xff] }
 0x399   : >> { %v5494_v49 = vpop.f32.mrb[34].mxu1  ;;  %6970 = vmatprep.subr.bf16.mxu1 %v6969_v46 }
 0x39a   : >> { %v5495_v48 = vpop.f32.mrb[35].mxu1 }
 0x39b   : >> { %v5496_v51 = vadd.f32 %v5495_v48, %v5494_v49 }
 0x39e   : >> { %v2795_v28 = vpop.f32.mrb[36].mxu1 }
 0x39f   : >> { %v2796_v1 = vadd.f32 %v5490_v38, %v2795_v28  ;;  %v6070_v11 = vpop.f32.mrb[37].mxu1 }
 0x3a2   : >> { %v2800_v18 = vpop.f32.mrb[38].mxu1 }
 0x3a3   : >> { %v2801_v21 = vadd.f32 %v5493_v33, %v2800_v18  ;;  %v6073_v22 = vpop.f32.mrb[39].mxu1  ;;  %v5227_v33 = vld [vmem:[%s10253_s8 + $0x188] sm:$0xff] }
 0x3a6   : >> { %v2805_v24 = vpop.f32.mrb[40].mxu1 }
 0x3a7   : >> { %v2806_v25 = vadd.f32 %v5496_v51, %v2805_v24  ;;  %v6076_v19 = vpop.f32.mrb[41].mxu1  ;;  %v6971_v51 = vpack.c.bf16 %v5227_v33, %v5226_v47 }
 0x3a9   : >> { %6972 = vmatpush3.bf16.msra.mxu1 %v6971_v51 }
 0x3aa   : >> { %6974 = vmatprep.subr.bf16.mxu1 %v6973_v57 }
 0x3ad   : >> { %6976 = vmatpush3.bf16.msra.mxu1 %v6975_v63 }
 0x3ae   : >> { %6986 = vmatprep.subr.bf16.mxu1 %v6985_v4 }
 0x3bf   : >> { %v5540_v39 = vpop.f32.mrb[42].mxu1 }
 0x3c0   : >> { %v5541_v31 = vpop.f32.mrb[43].mxu1 }
 0x3c1   : >> { %v5542_v40 = vadd.f32 %v5541_v31, %v5540_v39 }
 0x3c3   : >> { %v5543_v38 = vpop.f32.mrb[44].mxu1  ;;  %v3050_v44 = vadd.f32 %v5542_v40, %v2796_v1 }
 0x3c4   : >> { %v5544_v15 = vpop.f32.mrb[45].mxu1 }
 0x3c5   : >> { %v5545_v45 = vadd.f32 %v5544_v15, %v5543_v38 }
 0x3c7   : >> { %v5546_v49 = vpop.f32.mrb[46].mxu1  ;;  %v3055_v48 = vadd.f32 %v5545_v45, %v2801_v21 }
 0x3c8   : >> { %v5547_v52 = vpop.f32.mrb[47].mxu1 }
 0x3c9   : >> { %v5548_v2 = vadd.f32 %v5547_v52, %v5546_v49  ;;  %v3644_v49 = vrot.slane %v3639_v34, %v2148_v56 }
 0x3cb   : >> { %v3060_v55 = vadd.f32 %v5548_v2, %v2806_v25 }
 0x3cf   : >> { %v3129_v28 = vpop.f32.mrb[48].mxu1 }
 0x3d0   : >> { %v3130_v10 = vadd.f32 %v3129_v28, %v3050_v44  ;;  %v6095_v1 = vpop.f32.mrb[49].mxu1 }
 0x3d3   : >> { %v3134_v11 = vpop.f32.mrb[50].mxu1 }
 0x3d4   : >> { %v3135_v12 = vadd.f32 %v3134_v11, %v3055_v48  ;;  %v6098_v13 = vpop.f32.mrb[51].mxu1  ;;  %v3648_v48 = vrot.slane %v3639_v34, %v2152_v58  ;;  %v3691_v11 = vld [vmem:[%s10253_s8] sm:$0xff] }
 0x3d5   : >> { %v3711_v34 = vld [vmem:[%s10253_s8 + $0xa0] sm:$0xff] }
 0x3d7   : >> { %v3139_v14 = vpop.f32.mrb[52].mxu1 }
 0x3d8   : >> { %v3140_v17 = vadd.f32 %v3139_v14, %v3060_v55  ;;  %v6101_v18 = vpop.f32.mrb[53].mxu1 }
 0x3d9   : >> { %v3710_v18 = vld [vmem:[%s10253_s8 + $0x98] sm:$0xff] }
 0x3ef   : >> { %v5592_v21 = vpop.f32.mrb[54].mxu1 }
 0x3f0   : >> { %v5593_v22 = vpop.f32.mrb[55].mxu1 }
 0x3f1   : >> { %v5594_v23 = vadd.f32 %v5593_v22, %v5592_v21 }
 0x3f3   : >> { %v5595_v24 = vpop.f32.mrb[56].mxu1 }
 0x3f4   : >> { %v5596_v25 = vpop.f32.mrb[57].mxu1 }
 0x3f5   : >> { %v5597_v19 = vadd.f32 %v5596_v25, %v5595_v24 }
 0x3f7   : >> { %v5598_v29 = vpop.f32.mrb[58].mxu1 }
 0x3f8   : >> { %v5599_v30 = vpop.f32.mrb[59].mxu1 }
 0x3f9   : >> { %v5600_v32 = vadd.f32 %v5599_v30, %v5598_v29  ;;  %v3693_v29 = vld [vmem:[%s10253_s8 + $0x10] sm:$0xff]  ;;  %v3694_v30 = vld [vmem:[%s10253_s8 + $0x18] sm:$0xff] }
 0x3ff   : >> { %v3616_v35 = vpop.f32.mrb[60].mxu1 }
 0x400   : >> { %v3617_v36 = vadd.f32 %v5594_v23, %v3616_v35  ;;  %v6120_v53 = vpop.f32.mrb[61].mxu1  ;;  %v3712_v35 = vld [vmem:[%s10253_s8 + $0xa8] sm:$0xff] }
 0x401   : >> { %v6993_v53 = vpack.c.bf16 %v3712_v35, %v3711_v34  ;;  %v5256_v35 = vld [vmem:[%s10253_s8 + $0x250] sm:$0xff] }
 0x402   : >> { %v3632_v37 = vadd.f32 %v3617_v36, %v3130_v10  ;;  %v6991_v36 = vpack.c.bf16 %v3694_v30, %v3693_v29 }
 0x403   : >> { %v3621_v9 = vpop.f32.mrb[62].mxu1 }
 0x404   : >> { %v3658_v8 = vadd.f32 %v3652_v20, %v3632_v37  ;;  %v3622_v39 = vadd.f32 %v5597_v19, %v3621_v9  ;;  %v6123_v26 = vpop.f32.mrb[63].mxu1  ;;  %v3695_v37 = vld [vmem:[%s10253_s8 + $0x20] sm:$0xff]  ;;  %v3696_v9 = vld [vmem:[%s10253_s8 + $0x28] sm:$0xff] }
 0x405   : >> { %v3713_v26 = vld [vmem:[%s10253_s8 + $0xb0] sm:$0xff] }
 0x406   : >> { %v3667_v31 = vmax.f32 %v3658_v8, 0.0  ;;  %v3635_v40 = vadd.f32 %v3622_v39, %v3135_v12  ;;  %v3692_v12 = vld [vmem:[%s10253_s8 + $0x8] sm:$0xff] }
 0x407   : >> { %v3626_v41 = vpop.f32.mrb[64].mxu1  ;;  %v6987_v24 = vpack.c.bf16 %v3692_v12, %v3691_v11 }
 0x408   : >> { %3677 = vst.msk [vmem:[#allocation6 + $0x10] sm:$0xff] %vm3676_vm7, %v3667_v31  ;;  %v3661_v42 = vadd.f32 %v3652_v20, %v3635_v40  ;;  %v3627_v43 = vadd.f32 %v5600_v32, %v3626_v41  ;;  %v6126_v16 = vpop.f32.mrb[65].mxu1  ;;  %v3714_v31 = vld [vmem:[%s10253_s8 + $0xb8] sm:$0xff]  ;;  %v6995_v41 = vpack.c.bf16 %v3696_v9, %v3695_v37 }
 0x409   : >> { %v3697_v16 = vld [vmem:[%s10253_s8 + $0x30] sm:$0xff] }
 0x40a   : >> { %v3670_v27 = vmax.f32 %v3661_v42, 0.0  ;;  %v3638_v38 = vadd.f32 %v3627_v43, %v3140_v17  ;;  %v3709_v17 = vld [vmem:[%s10253_s8 + $0x90] sm:$0xff]  ;;  %v6997_v43 = vpack.c.bf16 %v3714_v31, %v3713_v26  ;;  %v5259_v26 = vld [vmem:[%s10253_s8 + $0x268] sm:$0xff] }
 0x40b   : >> { %v6989_v19 = vpack.c.bf16 %v3710_v18, %v3709_v17  ;;  %v5270_v18 = vld [vmem:[%s10253_s8 + $0x2c0] sm:$0xff]  ;;  %v5276_v31 = vld [vmem:[%s10253_s8 + $0x2f0] sm:$0xff] }
 0x40c   : >> { %3680 = vst.msk [vmem:[#allocation6 + $0x28] sm:$0xff] %vm3676_vm7, %v3670_v27  ;;  %v3664_v59 = vadd.f32 %v3652_v20, %v3638_v38  ;;  %v3698_v27 = vld [vmem:[%s10253_s8 + $0x38] sm:$0xff] }
 0x40e   : >> { %v3673_v44 = vmax.f32 %v3664_v59, 0.0  ;;  %v3715_v59 = vld [vmem:[%s10253_s8 + $0xc0] sm:$0xff] }
 0x40f   : >> { %v3729_v6 = vld [vmem:[#allocation6 + $0x10] sm:$0xfe] }
 0x410   : >> { %3684 = vst.msk [vmem:[#allocation6 + $0x40] sm:$0x3] %vm3683_vm8, %v3673_v44  ;;  %v3785_v45 = vrot.slane %v3729_v6, 1  ;;  %v3716_v44 = vld [vmem:[%s10253_s8 + $0xc8] sm:$0xff]  ;;  %v6999_v6 = vpack.c.bf16 %v3698_v27, %v3697_v16  ;;  %v5261_v16 = vld [vmem:[%s10253_s8 + $0x278] sm:$0xff]  ;;  %v5278_v27 = vld [vmem:[%s10253_s8 + $0x300] sm:$0xff] }
 0x413   : >> { %v9770_v15 = vld [vmem:[#allocation6 + $0x28] sm:$0xff] }
 0x414   : >> { %v3786_v60 = vrot.slane %v9770_v15, 1 }
 0x416   : >> { %v3787_v7 = vsel %vm2455_vm5, %v3785_v45, %v3786_v60  ;;  %v7001_v45 = vpack.c.bf16 %v3716_v44, %v3715_v59 }
 0x417   : >> { %6135 = vmatprep.mubr.msk.f32.mxu0 %vm3676_vm7, %v3787_v7  ;;  %v3732_v46 = vld [vmem:[#allocation6 + $0x40] sm:$0x1] }
 0x418   : >> { %v3792_v47 = vrot.slane %v3732_v46, 1  ;;  %v3700_v7 = vld [vmem:[%s10253_s8 + $0x48] sm:$0xff]  ;;  %v3717_v46 = vld [vmem:[%s10253_s8 + $0xd0] sm:$0xff] }
 0x41a   : >> { %v3793_v33 = vsel %vm2455_vm5, %v3786_v60, %v3792_v47  ;;  %v3699_v60 = vld [vmem:[%s10253_s8 + $0x40] sm:$0xff]  ;;  %v3718_v47 = vld [vmem:[%s10253_s8 + $0xd8] sm:$0xff] }
 0x41b   : >> { %6136 = vmatmul.mubr.msk.f32.vlgmr.msra.gmra.mrb[12].mxu0 %vm3676_vm7, %v3793_v33  ;;  %v7003_v33 = vpack.c.bf16 %v3700_v7, %v3699_v60  ;;  %v5280_v60 = vld [vmem:[%s10253_s8 + $0x310] sm:$0xff]  ;;  %v5281_v7 = vld [vmem:[%s10253_s8 + $0x318] sm:$0xff] }
 0x43e   : >> { %v3453_v51 = vpop.f32.mrb[6].mxu0 }
 0x43f   : >> { %v9781_v52 = vadd.f32 %v3644_v49, %v3453_v51  ;;  %v3455_v2 = vpop.f32.mrb[7].mxu0  ;;  %v3702_v51 = vld [vmem:[%s10253_s8 + $0x58] sm:$0xff] }
 0x440   : >> { %v9783_v50 = vadd.f32 %v3648_v48, %v3455_v2  ;;  %v3719_v2 = vld [vmem:[%s10253_s8 + $0xe0] sm:$0xff] }
 0x441   : >> { %v3665_v5 = vmax.f32 %v9781_v52, 0.0  ;;  %v5273_v52 = vld [vmem:[%s10253_s8 + $0x2d8] sm:$0xff] }
 0x442   : >> { %v3666_v57 = vmax.f32 %v9783_v50, 0.0  ;;  %v3459_v61 = vpop.f32.mrb[8].mxu0  ;;  %v3720_v50 = vld [vmem:[%s10253_s8 + $0xe8] sm:$0xff] }
 0x443   : >> { %3674 = vst [vmem:[#allocation6] sm:$0xff] %v3665_v5  ;;  %v3659_v62 = vadd.f32 %v3644_v49, %v3459_v61  ;;  %v3461_v55 = vpop.f32.mrb[9].mxu0  ;;  %v7009_v61 = vpack.c.bf16 %v3720_v50, %v3719_v2 }
 0x444   : >> { %3675 = vst [vmem:[#allocation6 + $0x8] sm:$0xff] %v3666_v57  ;;  %v3660_v56 = vadd.f32 %v3648_v48, %v3461_v55  ;;  %v3704_v55 = vld [vmem:[%s10253_s8 + $0x68] sm:$0xff] }
 0x445   : >> { %v9789_v54 = vmax.f32 %v3659_v62, 0.0  ;;  %v3703_v62 = vld [vmem:[%s10253_s8 + $0x60] sm:$0xff] }
 0x446   : >> { %v9791_v58 = vmax.f32 %v3660_v56, 0.0  ;;  %v3465_v63 = vpop.f32.mrb[10].mxu0  ;;  %v3721_v56 = vld [vmem:[%s10253_s8 + $0xf0] sm:$0xff] }
 0x447   : >> { %v3662_v0 = vadd.f32 %v3644_v49, %v3465_v63  ;;  %v3467_v3 = vpop.f32.mrb[11].mxu0  ;;  %v3780_v23 = vrot.slane %v9789_v54, 1  ;;  %v7005_v49 = vpack.c.bf16 %v3718_v47, %v3717_v46  ;;  %v3722_v63 = vld [vmem:[%s10253_s8 + $0xf8] sm:$0xff]  ;;  %v7045_v47 = vpack.c.bf16 %v5281_v7, %v5280_v60 }
 0x448   : >> { %v3663_v4 = vadd.f32 %v3648_v48, %v3467_v3  ;;  %v3783_v22 = vrot.slane %v9791_v58, 1  ;;  %v3701_v48 = vld [vmem:[%s10253_s8 + $0x50] sm:$0xff]  ;;  %v7013_v3 = vpack.c.bf16 %v3722_v63, %v3721_v56 }
 0x449   : >> { %v3671_v28 = vmax.f32 %v3662_v0, 0.0  ;;  %v7011_v0 = vpack.c.bf16 %v3704_v55, %v3703_v62  ;;  %v5284_v62 = vld [vmem:[%s10253_s8 + $0x330] sm:$0xff]  ;;  %v5285_v55 = vld [vmem:[%s10253_s8 + $0x338] sm:$0xff] }
 0x44a   : >> { %v3672_v10 = vmax.f32 %v3663_v4, 0.0  ;;  %v3727_v1 = vld [vmem:[#allocation6] sm:$0xfe]  ;;  %v3705_v4 = vld [vmem:[%s10253_s8 + $0x70] sm:$0xff]  ;;  %v7053_v63 = vpack.c.bf16 %v5285_v55, %v5284_v62 }
 0x44b   : >> { %3681 = vst [vmem:[#allocation6 + $0x30] sm:$0x3] %v3671_v28  ;;  %v3728_v13 = vld [vmem:[#allocation6 + $0x8] sm:$0xfe]  ;;  %v3779_v14 = vrot.slane %v3727_v1, 1  ;;  %v3706_v28 = vld [vmem:[%s10253_s8 + $0x78] sm:$0xff] }
 0x44c   : >> { %3682 = vst [vmem:[#allocation6 + $0x38] sm:$0x3] %v3672_v10  ;;  %v3782_v21 = vrot.slane %v3728_v13, 1  ;;  %v3723_v10 = vld [vmem:[%s10253_s8 + $0x100] sm:$0xff]  ;;  %v3724_v1 = vld [vmem:[%s10253_s8 + $0x108] sm:$0xff]  ;;  %v7015_v11 = vpack.c.bf16 %v3706_v28, %v3705_v4  ;;  %v3725_v13 = vld [vmem:[%s10253_s8 + $0x110] sm:$0xff] }
 0x44d   : >> { %v3781_v32 = vsel %vm2455_vm5, %v3779_v14, %v3780_v23  ;;  %v7017_v12 = vpack.c.bf16 %v3724_v1, %v3723_v10  ;;  %v3726_v14 = vld [vmem:[%s10253_s8 + $0x118] sm:$0xff]  ;;  %v5286_v4 = vld [vmem:[%s10253_s8 + $0x340] sm:$0xff]  ;;  %v5287_v28 = vld [vmem:[%s10253_s8 + $0x348] sm:$0xff] }
 0x44e   : >> { %v3784_v25 = vsel %vm2455_vm5, %v3782_v21, %v3783_v22  ;;  %v7021_v17 = vpack.c.bf16 %v3726_v14, %v3725_v13  ;;  %v5271_v21 = vld [vmem:[%s10253_s8 + $0x2c8] sm:$0xff]  ;;  %v5288_v14 = vld [vmem:[%s10253_s8 + $0x350] sm:$0xff] }
 0x44f   : >> { %3866 = vmatprep.mubr.f32.mxu1 %v3784_v25  ;;  %v5255_v25 = vld [vmem:[%s10253_s8 + $0x248] sm:$0xff] }
 0x450   : >> { %3867 = vmatmul.mubr.f32.vlgmr.msra.gmra.mrb[66].mxu1 %v3781_v32  ;;  %v4160_v32 = vrot.slane %v9791_v58, 2  ;;  %v4107_v10 = vld [vmem:[#allocation6] sm:$0xfc] }
 0x451   : >> { %6988 = vmatpush3.bf16.msra.mxu1 %v6987_v24  ;;  %v5254_v24 = vld [vmem:[%s10253_s8 + $0x240] sm:$0xff]  ;;  %v4156_v13 = vrot.slane %v4107_v10, 2 }
 0x452   : >> { %6990 = vmatprep.subr.bf16.mxu1 %v6989_v19  ;;  %v3730_v20 = vld [vmem:[#allocation6 + $0x30] sm:$0x1]  ;;  %v5272_v19 = vld [vmem:[%s10253_s8 + $0x2d0] sm:$0xff]  ;;  %v7027_v30 = vpack.c.bf16 %v5255_v25, %v5254_v24 }
 0x453   : >> { %v3731_v8 = vld [vmem:[#allocation6 + $0x38] sm:$0x1]  ;;  %v3788_v39 = vrot.slane %v3730_v20, 1  ;;  %v7029_v34 = vpack.c.bf16 %v5273_v52, %v5272_v19  ;;  %v4109_v19 = vld [vmem:[#allocation6 + $0x10] sm:$0xfc] }
 0x454   : >> { %v3790_v40 = vrot.slane %v3731_v8, 1  ;;  %v5274_v20 = vld [vmem:[%s10253_s8 + $0x2e0] sm:$0xff] }
 0x455   : >> { %6992 = vmatpush3.bf16.msra.mxu1 %v6991_v36  ;;  %v3789_v38 = vsel %vm2455_vm5, %v3780_v23, %v3788_v39  ;;  %v7025_v23 = vpack.c.bf16 %v5271_v21, %v5270_v18  ;;  %v5257_v36 = vld [vmem:[%s10253_s8 + $0x258] sm:$0xff]  ;;  %v5258_v39 = vld [vmem:[%s10253_s8 + $0x260] sm:$0xff] }
 0x456   : >> { %v3791_v42 = vsel %vm2455_vm5, %v3783_v22, %v3790_v40  ;;  %6994 = vmatprep.subr.bf16.mxu1 %v6993_v53  ;;  %v4108_v22 = vld [vmem:[#allocation6 + $0x8] sm:$0xfc]  ;;  %v5275_v53 = vld [vmem:[%s10253_s8 + $0x2e8] sm:$0xff]  ;;  %v7031_v9 = vpack.c.bf16 %v5257_v36, %v5256_v35  ;;  %v5277_v40 = vld [vmem:[%s10253_s8 + $0x2f8] sm:$0xff] }
 0x457   : >> { %3871 = vmatprep.mubr.f32.mxu1 %v3791_v42  ;;  %v4159_v29 = vrot.slane %v4108_v22, 2  ;;  %v7033_v8 = vpack.c.bf16 %v5275_v53, %v5274_v20  ;;  %v7037_v42 = vpack.c.bf16 %v5277_v40, %v5276_v31  ;;  %v4110_v21 = vld [vmem:[#allocation6 + $0x30] sm:$0x3]  ;;  %v4157_v22 = vrot.slane %v9789_v54, 2 }
 0x458   : >> { %3872 = vmatmul.mubr.f32.gmra.mrb[68].mxu1 %v3789_v38  ;;  %v5279_v38 = vld [vmem:[%s10253_s8 + $0x308] sm:$0xff]  ;;  %v4165_v25 = vrot.slane %v4110_v21, 2 }
 0x459   : >> { %4021 = vmatprep.mubr.f32.mxu1 %v3666_v57  ;;  %6996 = vmatpush3.bf16.msra.mxu1 %v6995_v41  ;;  %v7007_v57 = vpack.c.bf16 %v3702_v51, %v3701_v48  ;;  %v4161_v37 = vsel %vm3276_vm6, %v4159_v29, %v4160_v32  ;;  %v7035_v41 = vpack.c.bf16 %v5259_v26, %v5258_v39  ;;  %v5282_v48 = vld [vmem:[%s10253_s8 + $0x320] sm:$0xff]  ;;  %v5283_v51 = vld [vmem:[%s10253_s8 + $0x328] sm:$0xff] }
 0x45a   : >> { %6998 = vmatprep.subr.bf16.mxu1 %v6997_v43  ;;  %v5260_v43 = vld [vmem:[%s10253_s8 + $0x270] sm:$0xff]  ;;  %v7041_v44 = vpack.c.bf16 %v5279_v38, %v5278_v27  ;;  %v7049_v50 = vpack.c.bf16 %v5283_v51, %v5282_v48  ;;  %v4158_v24 = vsel %vm3276_vm6, %v4156_v13, %v4157_v22  ;;  %v4112_v29 = vld [vmem:[#allocation6 + $0x40] sm:$0x3] }
 0x45b   : >> { %v7039_v59 = vpack.c.bf16 %v5261_v16, %v5260_v43 }
 0x45d   : >> { %7000 = vmatpush3.bf16.msra.mxu1 %v6999_v6  ;;  %v5262_v6 = vld [vmem:[%s10253_s8 + $0x280] sm:$0xff] }
 0x45e   : >> { %7002 = vmatprep.subr.bf16.mxu1 %v7001_v45  ;;  %v5263_v45 = vld [vmem:[%s10253_s8 + $0x288] sm:$0xff] }
 0x45f   : >> { %v7043_v46 = vpack.c.bf16 %v5263_v45, %v5262_v6 }
 0x461   : >> { %7004 = vmatpush3.bf16.msra.mxu1 %v7003_v33  ;;  %v5264_v33 = vld [vmem:[%s10253_s8 + $0x290] sm:$0xff] }
 0x462   : >> { %7006 = vmatprep.subr.bf16.mxu1 %v7005_v49  ;;  %v5265_v49 = vld [vmem:[%s10253_s8 + $0x298] sm:$0xff] }
 0x463   : >> { %v7047_v2 = vpack.c.bf16 %v5265_v49, %v5264_v33  ;;  %v5292_v49 = vld [vmem:[%s10254_s9] ss:$0 sm:$0xff] }
 0x465   : >> { %7008 = vmatpush3.bf16.msra.mxu1 %v7007_v57  ;;  %v5266_v57 = vld [vmem:[%s10253_s8 + $0x2a0] sm:$0xff] }
 0x466   : >> { %7010 = vmatprep.subr.bf16.mxu1 %v7009_v61  ;;  %v5267_v61 = vld [vmem:[%s10253_s8 + $0x2a8] sm:$0xff] }
 0x467   : >> { %v7051_v56 = vpack.c.bf16 %v5267_v61, %v5266_v57 }
 0x469   : >> { %7012 = vmatpush3.bf16.msra.mxu1 %v7011_v0  ;;  %v5268_v0 = vld [vmem:[%s10253_s8 + $0x2b0] sm:$0xff] }
 0x46a   : >> { %7014 = vmatprep.subr.bf16.mxu1 %v7013_v3  ;;  %v5269_v3 = vld [vmem:[%s10253_s8 + $0x2b8] sm:$0xff] }
 0x46b   : >> { %v7055_v1 = vpack.c.bf16 %v5269_v3, %v5268_v0 }
 0x46d   : >> { %7016 = vmatpush3.bf16.msra.mxu1 %v7015_v11  ;;  %v4111_v11 = vld [vmem:[#allocation6 + $0x38] sm:$0x3] }
 0x46e   : >> { %7018 = vmatprep.subr.bf16.mxu1 %v7017_v12  ;;  %v4167_v18 = vrot.slane %v4111_v11, 2 }
 0x470   : >> { %4022 = vmatmul.mubr.f32.vlgmr.msra.gmra.mrb[70].mxu1 %v3665_v5  ;;  %v3687_v5 = vld [vmem:[#allocation6 + $0x10] sm:$0xff]  ;;  %v4168_v52 = vsel %vm3276_vm6, %v4160_v32, %v4167_v18 }
 0x471   : >> { %4026 = vmatprep.mubr.f32.mxu1 %v9791_v58  ;;  %7020 = vmatpush3.bf16.msra.mxu1 %v7017_v12  ;;  %v7057_v12 = vpack.c.bf16 %v5287_v28, %v5286_v4 }
 0x472   : >> { %7022 = vmatprep.subr.bf16.mxu1 %v7021_v17 }
 0x474   : >> { %4027 = vmatmul.mubr.f32.gmra.mrb[72].mxu1 %v9789_v54  ;;  %v4166_v54 = vsel %vm3276_vm6, %v4157_v22, %v4165_v25 }
 0x475   : >> { %7024 = vmatpush3.bf16.msra.mxu1 %v7021_v17  ;;  %6146 = vmatprep.mubr.msk.f32.mxu1 %vm3676_vm7, %v3687_v5  ;;  %v5289_v17 = vld [vmem:[%s10253_s8 + $0x358] sm:$0xff]  ;;  %v4163_v5 = vrot.slane %v9770_v15, 2 }
 0x476   : >> { %7026 = vmatprep.subr.bf16.mxu1 %v7025_v23  ;;  %v7061_v23 = vpack.c.bf16 %v5289_v17, %v5288_v14 }
 0x478   : >> { %6147 = vmatmul.mubr.msk.f32.vlgmr.msra.gmra.mrb[74].mxu1 %vm3676_vm7, %v9770_v15 }
 0x479   : >> { %7028 = vmatpush3.bf16.msra.mxu1 %v7027_v30  ;;  %4243 = vmatprep.mubr.f32.mxu1 %v4161_v37  ;;  %v4162_v30 = vrot.slane %v4109_v19, 2 }
 0x47a   : >> { %7030 = vmatprep.subr.bf16.mxu1 %v7029_v34  ;;  %v4169_v34 = vrot.slane %v4112_v29, 2 }
 0x47b   : >> { %v4164_v35 = vsel %vm3276_vm6, %v4162_v30, %v4163_v5 }
 0x47c   : >> { %v4170_v58 = vsel %vm3276_vm6, %v4163_v5, %v4169_v34 }
 0x47d   : >> { %7032 = vmatpush3.bf16.msra.mxu1 %v7031_v9 }
 0x47e   : >> { %7034 = vmatprep.subr.bf16.mxu1 %v7033_v8 }
 0x481   : >> { %7036 = vmatpush3.bf16.msra.mxu1 %v7035_v41 }
 0x482   : >> { %7038 = vmatprep.subr.bf16.mxu1 %v7037_v42 }
 0x485   : >> { %7040 = vmatpush3.bf16.msra.mxu1 %v7039_v59 }
 0x486   : >> { %7042 = vmatprep.subr.bf16.mxu1 %v7041_v44 }
 0x489   : >> { %7044 = vmatpush3.bf16.msra.mxu1 %v7043_v46 }
 0x48a   : >> { %7046 = vmatprep.subr.bf16.mxu1 %v7045_v47 }
 0x48d   : >> { %7048 = vmatpush3.bf16.msra.mxu1 %v7047_v2 }
 0x48e   : >> { %7050 = vmatprep.subr.bf16.mxu1 %v7049_v50 }
 0x491   : >> { %7052 = vmatpush3.bf16.msra.mxu1 %v7051_v56 }
 0x492   : >> { %7054 = vmatprep.subr.bf16.mxu1 %v7053_v63 }
 0x495   : >> { %7056 = vmatpush3.bf16.msra.mxu1 %v7055_v1 }
 0x496   : >> { %7058 = vmatprep.subr.bf16.mxu1 %v7057_v12 }
 0x498   : >> { %4244 = vmatmul.mubr.f32.vlgmr.msra.gmra.mrb[76].mxu1 %v4158_v24 }
 0x499   : >> { %4248 = vmatprep.mubr.f32.mxu1 %v4168_v52  ;;  %7060 = vmatpush3.bf16.msra.mxu1 %v7057_v12 }
 0x49a   : >> { %7062 = vmatprep.subr.bf16.mxu1 %v7061_v23 }
 0x49c   : >> { %4249 = vmatmul.mubr.f32.gmra.mrb[78].mxu1 %v4166_v54 }
 0x49d   : >> { %7064 = vmatpush3.bf16.msra.mxu1 %v7061_v23  ;;  %6157 = vmatprep.mubr.msk.f32.mxu1 %vm3676_vm7, %v4164_v35 }
 0x4a0   : >> { %6158 = vmatmul.mubr.msk.f32.vlgmr.msra.gmra.mrb[74].mxu1 %vm3676_vm7, %v4170_v58 }
 0x4ee   : >> { %v6137_v32 = vpop.f32.mrb[12].mxu0 }
 0x4ef   : >> { %v3943_v15 = vpop.f32.mrb[13].mxu0 }
 0x523   : >> { %v5644_v36 = vpop.f32.mrb[66].mxu1 }
 0x524   : >> { %v5645_v20 = vpop.f32.mrb[67].mxu1 }
 0x525   : >> { %v5646_v53 = vadd.f32 %v5645_v20, %v5644_v36 }
 0x527   : >> { %v3944_v37 = vadd.f32 %v5646_v53, %v3943_v15 }
 0x52b   : >> { %v5647_v9 = vpop.f32.mrb[68].mxu1 }
 0x52c   : >> { %v5648_v8 = vpop.f32.mrb[69].mxu1 }
 0x52d   : >> { %v5649_v39 = vadd.f32 %v5648_v8, %v5647_v9 }
 0x52f   : >> { %v3949_v26 = vadd.f32 %v6137_v32, %v5649_v39 }
 0x543   : >> { %v5688_v31 = vpop.f32.mrb[70].mxu1 }
 0x544   : >> { %v5689_v40 = vpop.f32.mrb[71].mxu1 }
 0x545   : >> { %v5690_v41 = vadd.f32 %v5689_v40, %v5688_v31 }
 0x547   : >> { %v4024_v42 = vadd.f32 %v5690_v41, %v3944_v37  ;;  %v5691_v43 = vpop.f32.mrb[72].mxu1 }
 0x548   : >> { %v5692_v16 = vpop.f32.mrb[73].mxu1 }
 0x549   : >> { %v5693_v27 = vadd.f32 %v5692_v16, %v5691_v43 }
 0x54b   : >> { %v4029_v38 = vadd.f32 %v5693_v27, %v3949_v26 }
 0x56b   : >> { %v5732_v59 = vpop.f32.mrb[76].mxu1 }
 0x56c   : >> { %v5733_v44 = vpop.f32.mrb[77].mxu1 }
 0x56d   : >> { %v5734_v6 = vadd.f32 %v5733_v44, %v5732_v59 }
 0x56f   : >> { %v5735_v45 = vpop.f32.mrb[78].mxu1  ;;  %v7179_v60 = vadd.f32 %v5734_v6, %v4024_v42 }
 0x570   : >> { %v5736_v7 = vpop.f32.mrb[79].mxu1 }
 0x571   : >> { %v5737_v46 = vadd.f32 %v5736_v7, %v5735_v45 }
 0x573   : >> { %v6159_v47 = vpop.f32.mrb[74].mxu1  ;;  %v7175_v33 = vadd.f32 %v5737_v46, %v4029_v38 }
 0x574   : >> { %v4320_v48 = vpop.f32.mrb[75].mxu1 }
 0x575   : >> { %v7176_v51 = vadd.f32 %v7175_v33, %v6159_v47  ;;  %v7180_v2 = vadd.f32 %v7179_v60, %v4320_v48  ;;  %1034 = sbr.rel (!%p1031_p3) target bundleno = 300 (0x12c), region = 122 }
 0x577   : >> { %v4339_v50 = vadd.f32 %v7176_v51, %v5292_v49  ;;  %v4338_v57 = vadd.f32 %v7180_v2, %v5292_v49 }
 0x579   : >> { %v4341_v61 = vmax.f32 %v4339_v50, 0.0  ;;  %v4340_v62 = vmax.f32 %v4338_v57, 0.0 }
 0x57b   : >> { %4343 = vst [vmem:[#allocation2 + $0x8] sm:$0xff] %v4341_v61  ;;  %4342 = vst [vmem:[#allocation2] sm:$0xff] %v4340_v62 }
 0x57c PF: > { %v4354_v55 = vld [vmem:[%s10255_s10] sm:$0xff]  ;;  %v4355_v56 = vld [vmem:[%s10255_s10 + $0x8] sm:$0xff]  ;;  %v4356_v63 = vld [vmem:[%s10255_s10 + $0x10] sm:$0xff]  ;;  %s5332_s24 = sshll.u32 %s7478_s29, 8  ;;  %s4660_s3 = sshll.u32 %s7580_s30, 4  ;;  %s10196_s3 = int_to_ptr.vmem [resolvable:$true] %s4660_s3 }
 0x57d   : > { %v7097_v0 = vpack.c.bf16 %v4355_v56, %v4354_v55  ;;  %v4357_v3 = vld [vmem:[%s10255_s10 + $0x18] sm:$0xff]  ;;  %v4358_v28 = vld [vmem:[%s10255_s10 + $0x20] sm:$0xff]  ;;  %v4359_v10 = vld [vmem:[%s10255_s10 + $0x28] sm:$0xff]  ;;  %s10194_s20 = scalar_lea.hbm %s10257_s12, %s5332_s24  ;;  %s10270_s29 = sand.u32 1, %s7368_s27  }
 0x57e   : > { %v7101_v4 = vpack.c.bf16 %v4357_v3, %v4356_v63  ;;  %v7105_v1 = vpack.c.bf16 %v4359_v10, %v4358_v28  ;;  %v4360_v11 = vld [vmem:[%s10255_s10 + $0x30] sm:$0xff]  ;;  %v5293_v12 = vld [vmem:[%s10255_s10 + $0x80] sm:$0xff]  ;;  %v5294_v13 = vld [vmem:[%s10255_s10 + $0x88] sm:$0xff]  ;;  %s10204_s21 = scalar_lea.sflag [#allocation11], %s10270_s29  ;;  %s7308_s22 = scalar_lea.vmem %s10196_s3, 256 }
 0x57f   : > { %7098 = vmatprep.subr.bf16.mxu0 %v7097_v0  ;;  %v4361_v14 = vld [vmem:[%s10255_s10 + $0x38] sm:$0xff]  ;;  %v7065_v17 = vpack.c.bf16 %v5294_v13, %v5293_v12  ;;  %v5295_v22 = vld [vmem:[%s10255_s10 + $0x90] sm:$0xff]  ;;  %v5297_v25 = vld [vmem:[%s10255_s10 + $0xa0] sm:$0xff]  ;;  %p7309_p4 = scmp.ne.s32.totalorder %s10196_s3, %s7308_s22  ;;  %s7386_s15 = smov [#allocation10]  }
 0x580   : > { %7100 = vmatpush3.bf16.msra.mxu0 %v7097_v0  ;;  %v5296_v23 = vld [vmem:[%s10255_s10 + $0x98] sm:$0xff]  ;;  %v7109_v19 = vpack.c.bf16 %v4361_v14, %v4360_v11  ;;  %v5298_v52 = vld [vmem:[%s10255_s10 + $0xa8] sm:$0xff]  ;;  %v4362_v5 = vld [vmem:[%s10255_s10 + $0x40] sm:$0xff]  ;;  %s7312_s14 = sshll.u32 %s7386_s15, 4  ;;  %s7313_s14 = int_to_ptr.vmem [resolvable:$false] %s7312_s14 }
 0x581   : > { %7102 = vmatprep.subr.bf16.mxu0 %v7101_v4  ;;  %7066 = vmatprep.subr.bf16.mxu1 %v7065_v17  ;;  %v7069_v24 = vpack.c.bf16 %v5296_v23, %v5295_v22  ;;  %v4363_v29 = vld [vmem:[%s10255_s10 + $0x48] sm:$0xff]  ;;  %v7073_v30 = vpack.c.bf16 %v5298_v52, %v5297_v25  ;;  %v5299_v54 = vld [vmem:[%s10255_s10 + $0xb0] sm:$0xff]  ;;  %v5300_v34 = vld [vmem:[%s10255_s10 + $0xb8] sm:$0xff]  ;;  %p7310_p5 = pnand %p7309_p4, %p7495_p10  ;;  %s7314_s16 = scalar_lea.vmem %s7313_s14, 512 }
 0x582   : > { %v4344_v18 = vld [vmem:[#allocation2] sm:$0xff]  ;;  %v10068_v21 = vld [vmem:[#allocation2 + $0x8] sm:$0xff]  ;;  %7068 = vmatpush3.bf16.msra.mxu1 %v7065_v17  ;;  %v7113_v35 = vpack.c.bf16 %v4363_v29, %v4362_v5  ;;  %v4364_v58 = vld [vmem:[%s10255_s10 + $0x50] sm:$0xff]  ;;  %v7077_v36 = vpack.c.bf16 %v5300_v34, %v5299_v54  ;;  %p7315_p7 = scmp.lt.s32.totalorder %s10196_s3, %s7313_s14  ;;  %p7316_p8 = scmp.lt.s32.totalorder %s7314_s16, %s7308_s22 }
 0x583   : > { %4346 = vst [vmem:[#allocation7 + $0x1] sm:$0xff] %v4344_v18  ;;  %4347 = vst [vmem:[#allocation7 + $0x9] sm:$0xff] %v10068_v21  ;;  %6192 = vmatprep.mubr.f32.mxu1 %v4344_v18  ;;  %7070 = vmatprep.subr.bf16.mxu1 %v7069_v24  ;;  %v4365_v32 = vld [vmem:[%s10255_s10 + $0x58] sm:$0xff]  ;;  %v5301_v20 = vld [vmem:[%s10255_s10 + $0xc0] sm:$0xff]  ;;  %p7311_p6 = pneg %p7310_p5 }
 0x584   : > { %7104 = vmatpush3.bf16.msra.mxu0 %v7101_v4  ;;  %v5302_v53 = vld [vmem:[%s10255_s10 + $0xc8] sm:$0xff]  ;;  %v7117_v37 = vpack.c.bf16 %v4365_v32, %v4364_v58  ;;  %v4366_v8 = vld [vmem:[%s10255_s10 + $0x60] sm:$0xff]  ;;  %v5303_v31 = vld [vmem:[%s10255_s10 + $0xd0] sm:$0xff]  ;;  %p7317_p9 = por %p7316_p8, %p7315_p7 }
 0x585   : > { %7106 = vmatprep.subr.bf16.mxu0 %v7105_v1  ;;  %v4367_v39 = vld [vmem:[%s10255_s10 + $0x68] sm:$0xff]  ;;  %v7081_v26 = vpack.c.bf16 %v5302_v53, %v5301_v20  ;;  %v5304_v40 = vld [vmem:[%s10255_s10 + $0xd8] sm:$0xff]  ;;  %v4368_v42 = vld [vmem:[%s10255_s10 + $0x70] sm:$0xff] }
 0x586   : > { %7072 = vmatpush3.bf16.msra.mxu1 %v7069_v24  ;;  %v7121_v41 = vpack.c.bf16 %v4367_v39, %v4366_v8  ;;  %v4369_v43 = vld [vmem:[%s10255_s10 + $0x78] sm:$0xff]  ;;  %v7085_v27 = vpack.c.bf16 %v5304_v40, %v5303_v31  ;;  %v5305_v38 = vld [vmem:[%s10255_s10 + $0xe0] sm:$0xff]  ;;  %v5306_v59 = vld [vmem:[%s10255_s10 + $0xe8] sm:$0xff]  ;;  %p7318_p12 = pnand %p7317_p9, %p7311_p6 }
 0x587   : > { %7074 = vmatprep.subr.bf16.mxu1 %v7073_v30  ;;  %v7125_v44 = vpack.c.bf16 %v4369_v43, %v4368_v42  ;;  %v5309_v6 = vld [vmem:[%s10255_s10 + $0x100] sm:$0xff]  ;;  %v5310_v45 = vld [vmem:[%s10255_s10 + $0x108] sm:$0xff]  ;;  %v7089_v60 = vpack.c.bf16 %v5306_v59, %v5305_v38  ;;  %v5307_v7 = vld [vmem:[%s10255_s10 + $0xf0] sm:$0xff] }
 0x588   : > { %7108 = vmatpush3.bf16.msra.mxu0 %v7105_v1  ;;  %v5308_v46 = vld [vmem:[%s10255_s10 + $0xf8] sm:$0xff]  ;;  %v7129_v47 = vpack.c.bf16 %v5310_v45, %v5309_v6  ;;  %v5311_v33 = vld [vmem:[%s10255_s10 + $0x110] sm:$0xff]  ;;  %v5313_v57 = vld [vmem:[%s10255_s10 + $0x120] sm:$0xff] }
 0x589   : > { %7110 = vmatprep.subr.bf16.mxu0 %v7109_v19  ;;  %v5312_v49 = vld [vmem:[%s10255_s10 + $0x118] sm:$0xff]  ;;  %v7093_v48 = vpack.c.bf16 %v5308_v46, %v5307_v7  ;;  %v5314_v61 = vld [vmem:[%s10255_s10 + $0x128] sm:$0xff]  ;;  %v5315_v55 = vld [vmem:[%s10255_s10 + $0x130] sm:$0xff] }
 0x58a   : > { %v4348_v15 = vld [vmem:[#allocation7 + $0x10] sm:$0x1]  ;;  %7076 = vmatpush3.bf16.msra.mxu1 %v7073_v30  ;;  %v4350_v9 = vld [vmem:[#allocation7 + $0x1] sm:$0x1]  ;;  %v4353_v51 = vld [vmem:[#allocation7 + $0x8] sm:$0xff]  ;;  %v7133_v2 = vpack.c.bf16 %v5312_v49, %v5311_v33  ;;  %v7137_v62 = vpack.c.bf16 %v5314_v61, %v5313_v57 }
 0x58b   : > { %4349 = vst [vmem:[#allocation7] sm:$0x1] %v4348_v15  ;;  %7078 = vmatprep.subr.bf16.mxu1 %v7077_v36  ;;  %4351 = vst [vmem:[#allocation7 + $0x11] sm:$0x1] %v4350_v9  ;;  %v4539_v50 = vld [vmem:[#allocation7 + $0x2] sm:$0xff]  ;;  %v5317_v0 = vld [vmem:[%s10255_s10 + $0x140] sm:$0xff] }
 0x58c   : > { %7112 = vmatpush3.bf16.msra.mxu0 %v7109_v19  ;;  %v5316_v56 = vld [vmem:[%s10255_s10 + $0x138] sm:$0xff]  ;;  %v5318_v3 = vld [vmem:[%s10255_s10 + $0x148] sm:$0xff]  ;;  %v5319_v28 = vld [vmem:[%s10255_s10 + $0x150] sm:$0xff] }
 0x58d   : > { %7114 = vmatprep.subr.bf16.mxu0 %v7113_v35  ;;  %v7141_v63 = vpack.c.bf16 %v5316_v56, %v5315_v55  ;;  %v7145_v4 = vpack.c.bf16 %v5318_v3, %v5317_v0  ;;  %v5320_v10 = vld [vmem:[%s10255_s10 + $0x158] sm:$0xff]  ;;  %v5321_v11 = vld [vmem:[%s10255_s10 + $0x160] sm:$0xff]  ;;  %v5322_v12 = vld [vmem:[%s10255_s10 + $0x168] sm:$0xff] }
 0x58e   : > { %7080 = vmatpush3.bf16.msra.mxu1 %v7077_v36  ;;  %v7149_v1 = vpack.c.bf16 %v5320_v10, %v5319_v28  ;;  %v7153_v13 = vpack.c.bf16 %v5322_v12, %v5321_v11  ;;  %v5323_v14 = vld [vmem:[%s10255_s10 + $0x170] sm:$0xff]  ;;  %v5324_v17 = vld [vmem:[%s10255_s10 + $0x178] sm:$0xff]  ;;  %v5325_v25 = vld [vmem:[%s10256_s11] ss:$0 sm:$0xff] }
 0x58f   : > { %7082 = vmatprep.subr.bf16.mxu1 %v7081_v26  ;;  %v7157_v18 = vpack.c.bf16 %v5324_v17, %v5323_v14 }
 0x590   : > { %7116 = vmatpush3.bf16.msra.mxu0 %v7113_v35 }
 0x591   : > { %7118 = vmatprep.subr.bf16.mxu0 %v7117_v37 }
 0x592   : > { %v4352_v16 = vld [vmem:[#allocation7] sm:$0xff]  ;;  %7084 = vmatpush3.bf16.msra.mxu1 %v7081_v26 }
 0x593   : > { %6227 = vmatprep.mubr.f32.mxu0 %v4352_v16  ;;  %7086 = vmatprep.subr.bf16.mxu1 %v7085_v27 }
 0x594   : > { %7120 = vmatpush3.bf16.msra.mxu0 %v7117_v37 }
 0x595   : > { %7122 = vmatprep.subr.bf16.mxu0 %v7121_v41 }
 0x596   : > { %7088 = vmatpush3.bf16.msra.mxu1 %v7085_v27 }
 0x597   : > { %7090 = vmatprep.subr.bf16.mxu1 %v7089_v60 }
 0x598   : > { %7124 = vmatpush3.bf16.msra.mxu0 %v7121_v41 }
 0x599   : > { %7126 = vmatprep.subr.bf16.mxu0 %v7125_v44 }
 0x59a   : > { %7092 = vmatpush3.bf16.msra.mxu1 %v7089_v60 }
 0x59b   : > { %7094 = vmatprep.subr.bf16.mxu1 %v7093_v48 }
 0x59c   : > { %7128 = vmatpush3.bf16.msra.mxu0 %v7125_v44 }
 0x59d   : > { %7130 = vmatprep.subr.bf16.mxu0 %v7129_v47 }
 0x59e   : > { %7096 = vmatpush3.bf16.msra.mxu1 %v7093_v48 }
 0x59f   : > { %6228 = vmatmul.mubr.f32.vlgmr.msra.gmra.mrb[0].mxu0 %v4353_v51 }
 0x5a0   : > { %7132 = vmatpush3.bf16.msra.mxu0 %v7129_v47  ;;  %6262 = vmatprep.mubr.f32.mxu0 %v4539_v50 }
 0x5a1   : > { %7134 = vmatprep.subr.bf16.mxu0 %v7133_v2  ;;  %6193 = vmatmul.mubr.f32.vlgmr.msra.gmra.mrb[0].mxu1 %v10068_v21  ;;  %v4540_v21 = vld [vmem:[#allocation7 + $0xa] sm:$0xff] }
 0x5a4   : > { %7136 = vmatpush3.bf16.msra.mxu0 %v7133_v2 }
 0x5a5   : > { %7138 = vmatprep.subr.bf16.mxu0 %v7137_v62 }
 0x5a8   : > { %7140 = vmatpush3.bf16.msra.mxu0 %v7137_v62 }
 0x5a9   : > { %7142 = vmatprep.subr.bf16.mxu0 %v7141_v63 }
 0x5ac   : > { %7144 = vmatpush3.bf16.msra.mxu0 %v7141_v63 }
 0x5ad   : > { %7146 = vmatprep.subr.bf16.mxu0 %v7145_v4 }
 0x5b0   : > { %7148 = vmatpush3.bf16.msra.mxu0 %v7145_v4 }
 0x5b1   : > { %7150 = vmatprep.subr.bf16.mxu0 %v7149_v1 }
 0x5b4   : > { %7152 = vmatpush3.bf16.msra.mxu0 %v7149_v1 }
 0x5b5   : > { %7154 = vmatprep.subr.bf16.mxu0 %v7153_v13 }
 0x5b8   : > { %7156 = vmatpush3.bf16.msra.mxu0 %v7153_v13 }
 0x5b9   : > { %7158 = vmatprep.subr.bf16.mxu0 %v7157_v18 }
 0x5bc   : > { %7160 = vmatpush3.bf16.msra.mxu0 %v7157_v18 }
 0x5bf   : > { %6263 = vmatmul.mubr.f32.vlgmr.msra.gmra.mrb[0].mxu0 %v4540_v21 }
 0x674   : > { %v6194_v22 = vpop.f32.mrb[0].mxu1 }
 0x675   : > { %v4455_v23 = vpop.f32.mrb[1].mxu1 }
 0x692   : > { %v6264_v24 = vpop.f32.mrb[0].mxu0 }
 0x693   : > { %v7237_v19 = vadd.f32 %v6264_v24, %v6194_v22  ;;  %v4624_v52 = vpop.f32.mrb[1].mxu0 }
 0x694   : > { %v7238_v5 = vadd.f32 %v4624_v52, %v4455_v23 }
 0x695   : > { %v4643_v29 = vadd.f32 %v7237_v19, %v5325_v25 }
 0x696   : > { %v4642_v30 = vadd.f32 %v7238_v5, %v5325_v25 }
 0x697   : > { %4645 = vst.msk [vmem:[%s7580_s30 + $0x8] sm:$0xff] %vm396_vm0, %v4643_v29 }
 0x698   : > { %4644 = vst.msk [vmem:[%s7580_s30] sm:$0xff] %vm396_vm0, %v4642_v30 }
 0x699   : > { %7321 = shalt.err (!%p7318_p12)
}
 0x69a   : > { %s7322_s30 = scalar_lea.hbm %s10194_s20, 256  ;;  %s7326_s4 = scalar_lea.hbm %s10257_s12, 512 }
 0x69b   : > { %p7323_p13 = scmp.ne.s32.totalorder %s10194_s20, %s7322_s30  ;;  %p7327_p2 = scmp.lt.u32.totalorder %s10194_s20, %s10257_s12 }
 0x69c   : > { %p7328_p3 = scmp.lt.u32.totalorder %s7326_s4, %s7322_s30  ;;  %p7330_p5 = scmp.lt.u32.totalorder %s7322_s30, %s10194_s20 }
 0x69d   : > { %p7324_p0 = pnand %p7323_p13, %p7495_p10 }
 0x69e   : > { %p7329_p4 = por %p7328_p3, %p7327_p2 }
 0x69f   : > { %p7325_p1 = pneg %p7324_p0 }
 0x6a0   : > { %p7331_p6 = por %p7330_p5, %p7329_p4 }
 0x6a2   : > { %p7332_p7 = pnand %p7331_p6, %p7325_p1 }
 0x6a4   : > { %7335 = shalt.err (!%p7332_p7)
}
 0x6a5   : > { %s7387_s25 = smov 128   ;;  %s7388_s19 = smov 8  }
 0x6a6   : > { %7241 = dma.vmem_to_hbm [thread:$0]  (%p7495_p10), %s10196_s3, 256, %s10194_s20, %s10204_s21, %s7387_s25, %s7387_s25, %s7388_s19  }
 0x6a7 PF: > { %p7247_p8 = scmp.ge.s32.totalorder %s7376_s28, 2  ;;  %s4675_s29 = sand.u32 1, %s7364_s26  }
 0x6a8   : > { %s4676_s22 = scalar_lea.sflag [#allocation11], %s4675_s29 }
 0x6a9   : > { %p7244_p9 = pnand %p7247_p8, %p7499_p11 }
 0x6ab   : > { %7359 = dma.done.wait (!%p7244_p9), %s4676_s22, 256  }
 0x6ac   : > { %7361 = vsyncadd (!%p7244_p9), %s4676_s22, 4294967040  ;;  %s10271_s15 = sld [smem:[#allocation14_spill]]  ;;  %p28_p12 = scmp.ge.s32.totalorder %s7482_s13, 4  }
 0x6ad   : > { %s10272_s26 = smov %s7368_s27  ;;  %s10273_s27 = smov %s7372_s0 }
 0x6ae   : > { %s10275_s28 = smov %s7482_s13  ;;  %30 = sbr.rel (!%p28_p12) target bundleno = 20 (0x14), region = 133 }
 0x6b2   : > { %s10274_s0 = smov %s10271_s15 }
 0x6b5   :  { %4681 = vsyncpa [#allocation11], 1 }
 0x6b6   :  { %4683 = vsyncpa [#allocation11 + $0x1], 1 }

</bundles_post_ra>
